<compile_context>
chip_gen: v6e
topology: v6e:2x2x1
jax: 0.10.0
libtpu: 0.0.40
codegen_flags: <defaults>
</compile_context>

<pallas_src>
import math

import jax
import jax.numpy as jnp
from jax import lax
from jax.experimental import pallas as pl
from jax.experimental.pallas import tpu as pltpu

MIN_NORM = 1e-15          # geoopt clamp_min
PROJ_EPS = 1e-5           # geoopt BALL_EPS for the module's float64 default dtype
ATANH_EPS = 1e-7          # geoopt artanh input clamp
MAXNORM = 1.0 - PROJ_EPS


def _artanh(x):
    x = jnp.clip(x, -1.0 + ATANH_EPS, 1.0 - ATANH_EPS)
    return 0.5 * (jnp.log1p(x) - jnp.log1p(-x))


# ------------------------------- Pallas kernel ------------------------------
def probe_kernel(x_ref, proj_ref, w_ref, p_sq_ref, out_ref):
    x = x_ref[...]          # (R, H)   token rows, bf16
    proj = proj_ref[...]    # (H, D)   bf16
    w = w_ref[...]          # (D, L)   f32 = [trans.T @ [pos,neg].T | trans.T | 0]
    p_sq = p_sq_ref[...]    # (1, 2)   squared norms of pos / neg

    # 1) linear probe projection: bf16 x bf16 MXU, f32 accumulation
    u = jnp.dot(x, proj, preferred_element_type=jnp.float32)           # (R, D)

    # 2) expmap0 + project.  ||tanh(n) * u / n|| == tanh(n) * ||u|| / n, so the
    #    projected norm is analytic and the project rescale folds into one
    #    per-row scale applied to u (single (R,D) multiply).
    u_sq = jnp.sum(u * u, axis=-1, keepdims=True)                      # reduce #1
    u_rnorm = jnp.sqrt(u_sq)                                           # raw ||u||
    u_norm = jnp.maximum(u_rnorm, MIN_NORM)
    inv_u = lax.rsqrt(jnp.maximum(u_sq, MIN_NORM * MIN_NORM))          # 1/clamped (EUP)
    tanh_u = jnp.tanh(u_norm)
    t_norm = tanh_u * u_rnorm * inv_u                                  # ||expmap0(u)||
    n1 = jnp.maximum(t_norm, MIN_NORM)
    proj_fac = jnp.where(n1 > MAXNORM, MAXNORM / n1, 1.0)
    t = u * (tanh_u * inv_u * proj_fac)                                # (R, D)
    x_norm = jnp.minimum(n1, MAXNORM)                                  # ||t|| post-project

    # 3) fused mobius_matvec + distance contraction (res never materialized):
    #    m[:, 0:2] = <t@trans.T, pos/neg>,  m[:, 2:2+D] = t@trans.T, rest zero.
    m = jnp.dot(t, w, preferred_element_type=jnp.float32)              # (R, L)
    mp = m[:, 0:2]                                                     # (R, 2) = <mx, p>
    msq_all = jnp.sum(m * m, axis=-1, keepdims=True)                   # reduce #2
    mx_sq = jnp.maximum(msq_all - jnp.sum(mp * mp, axis=-1, keepdims=True), 0.0)
    mx_norm = jnp.maximum(jnp.sqrt(mx_sq), MIN_NORM)
    inv_mx = lax.rsqrt(jnp.maximum(mx_sq, MIN_NORM * MIN_NORM))
    gain = jnp.tanh(mx_norm / x_norm * _artanh(x_norm))                # ||res|| analytic
    zero = mx_sq == 0.0
    r_norm = jnp.where(zero, 0.0, gain)
    n2 = jnp.maximum(r_norm, MIN_NORM)
    # res = mx * res_scale  (but only <res,p> and ||res|| are ever needed)
    res_scale = (jnp.where(zero, 0.0, gain * inv_mx)
                 * jnp.where(n2 > MAXNORM, MAXNORM / n2, 1.0))          # (R, 1)
    y_sq = jnp.square(jnp.minimum(n2, MAXNORM))                        # ||res||^2 (R, 1)

    # 4) dist(p, res) = 2*artanh(|| (-p) (+) res ||) for both fixed points.
    #    With a = -p and num = A*a + B*res:
    #      ||num||^2 = A^2|p|^2 + 2AB<a,res> + B^2|res|^2,
    #    and <a,res> = -res_scale * <mx,p> -> per-row scalars only.
    xy = -res_scale * mp                                               # (R, 2) = <(-p), res>
    a_c = 1.0 + 2.0 * xy + y_sq
    b_c = 1.0 - p_sq
    den = jnp.maximum(1.0 + 2.0 * xy + p_sq * y_sq, MIN_NORM)
    num_sq = a_c * a_c * p_sq + 2.0 * a_c * b_c * xy + b_c * b_c * y_sq
    ma_norm = jnp.sqrt(jnp.maximum(num_sq, 0.0)) / den
    # column 0 = dist(pos, res), column 1 = dist(neg, res)
    out_ref[...] = 2.0 * _artanh(ma_norm)                              # (R, 2)


# --------------------------------- wrapper -----------------------------------
def _round_up(a, m):
    return (a + m - 1) // m * m


def poincare_probe_fixed(sequence_output, proj, trans, pos, neg, *, row_tile=2048):
    """Forward of PoincareProbeFixed: returns (B, 2) = stack((neg_logits, pos_logits), -1)."""
    B, S, H = sequence_output.shape
    D = proj.shape[1]
    N = B * S

    # bf16 activation stream (dominant HBM read halves; native bf16 MXU).
    x_flat = jnp.asarray(sequence_output, jnp.bfloat16).reshape(N, H)

    # Tile: multiple of 128 rows, as large as row_tile, and >= 2 grid steps once
    # N is big enough so both v7x TensorCores are used (dimension_semantics
    # "parallel" shards the grid axis across cores).
    row_tile = max(128, _round_up(row_tile, 128))
    chunks = _round_up(N, 128) // 128
    tile_chunks = max(1, min(row_tile // 128, chunks // 2)) if chunks >= 2 else 1
    tile = 128 * tile_chunks
    n_pad = _round_up(N, tile)
    if n_pad != N:
        # zero rows map to finite values and are sliced off below
        x_flat = jnp.pad(x_flat, ((0, n_pad - N), (0, 0)))

    proj_bf = jnp.asarray(proj, jnp.bfloat16)                     # (H, D) bf16 (tiny)
    trans_t = jnp.asarray(trans, jnp.float32).T                   # (D, D) hoisted transpose
    pts = jnp.concatenate([jnp.asarray(pos, jnp.float32).reshape(1, -1),
                           jnp.asarray(neg, jnp.float32).reshape(1, -1)], axis=0)  # (2, D)
    hp = lax.Precision.HIGHEST
    lane_w = _round_up(D + 2, 128)
    # W = [trans.T @ [pos,neg].T | trans.T | zero-pad]  -> fuses matmul #2 and #3
    w = jnp.concatenate(
        [jnp.dot(trans_t, pts.T, precision=hp),                   # (D, 2)
         trans_t,                                                 # (D, D)
         jnp.zeros((D, lane_w - 2 - D), jnp.float32)], axis=1)    # (D, lane_w)
    p_sq = jnp.sum(pts * pts, axis=-1, keepdims=True).T           # (1, 2)

    dists = pl.pallas_call(
        probe_kernel,
        out_shape=jax.ShapeDtypeStruct((n_pad, 2), jnp.float32),
        grid_spec=pltpu.PrefetchScalarGridSpec(
            num_scalar_prefetch=0,
            grid=(n_pad // tile,),
            in_specs=[
                pl.BlockSpec((tile, H), lambda i: (i, 0)),        # token rows (streamed, bf16)
                pl.BlockSpec((H, D), lambda i: (0, 0)),           # proj (resident, DMA'd once)
                pl.BlockSpec((D, lane_w), lambda i: (0, 0)),      # fused W (resident)
                pl.BlockSpec((1, 2), lambda i: (0, 0)),           # |pos|^2, |neg|^2
            ],
            out_specs=pl.BlockSpec((tile, 2), lambda i: (i, 0)),
        ),
        compiler_params=pltpu.CompilerParams(
            dimension_semantics=("parallel",),
            # bf16 x-tile double buffer (2 x 3 MiB at tile=2048) + out buffers +
            # (R,64)/(R,128) f32 temporaries ~ 12-14 MiB -> 32 MiB gives headroom
            # on every generation (v7x physical VMEM is 64 MiB).
            vmem_limit_bytes=32 * 1024 * 1024,
        ),
    )(x_flat, proj_bf, w, p_sq)

    # tiny per-batch reduction over the sequence axis (left to XLA):
    #   column 0 -> neg_logits (dist to pos), column 1 -> pos_logits (dist to neg)
    return jnp.sum(dists[:N].reshape(B, S, 2), axis=1)


# ------------------------- pure-JAX (geoopt-style) reference -----------------
def _norm_ref(x):
    return jnp.maximum(jnp.sqrt(jnp.sum(x * x, axis=-1, keepdims=True)), MIN_NORM)


def _project_ref(x):
    n = _norm_ref(x)
    return jnp.where(n > MAXNORM, x / n * MAXNORM, x)


def _expmap0_ref(u):
    n = _norm_ref(u)
    return _project_ref(jnp.tanh(n) * u / n)


def _mobius_add_ref(x, y):
    x2 = jnp.sum(x * x, axis=-1, keepdims=True)
    y2 = jnp.sum(y * y, axis=-1, keepdims=True)
    xy = jnp.sum(x * y, axis=-1, keepdims=True)
    num = (1.0 + 2.0 * xy + y2) * x + (1.0 - x2) * y
    den = jnp.maximum(1.0 + 2.0 * xy + x2 * y2, MIN_NORM)
    return num / den


def _dist_ref(p, y):
    ma = _mobius_add_ref(-p, y)
    return 2.0 * _artanh(jnp.sqrt(jnp.sum(ma * ma, axis=-1, keepdims=True)))


def reference(x, proj, trans, pos, neg):
    hp = lax.Precision.HIGHEST
    t = _expmap0_ref(jnp.einsum("bsh,hd->bsd", x, proj, precision=hp))
    xn = _norm_ref(t)
    mx = jnp.einsum("bsd,ed->bse", t, trans, precision=hp)
    mxn = _norm_ref(mx)
    res = jnp.tanh(mxn / xn * _artanh(xn)) * mx / mxn
    res = jnp.where(jnp.all(mx == 0.0, axis=-1, keepdims=True), 0.0, res)
    res = _project_ref(res)
    pos_logits = jnp.sum(_dist_ref(neg, res)[..., 0], axis=-1)
    neg_logits = jnp.sum(_dist_ref(pos, res)[..., 0], axis=-1)
    return jnp.stack((neg_logits, pos_logits), axis=-1)


if __name__ == "__main__":
    B, S, H, D = 2, 8, 768, 64   # H=768, D=64 are hardcoded in the module

    key = jax.random.PRNGKey(0)
    kx, kp, kt = jax.random.split(key, 3)
    x = jax.random.normal(kx, (B, S, H), dtype=jnp.float32)
    proj = jax.random.uniform(kp, (H, D), jnp.float32, -0.05, 0.05)
    trans = jax.random.uniform(kt, (D, D), jnp.float32, -0.05, 0.05)

    # fixed reference points of the module: expmap0(+/- bound * ones(D))
    bound = 0.5 / math.sqrt(D)
    pos = _expmap0_ref(jnp.full((1, D), bound, jnp.float32))
    neg = _expmap0_ref(jnp.full((1, D), -bound, jnp.float32))

    out = poincare_probe_fixed(x, proj, trans, pos, neg)
    jax.block_until_ready(out)
    assert out.shape == (B, 2)

    # The kernel streams activations/proj in bf16, so the exact-math comparison
    # is against the geoopt-style f32 reference evaluated on the same
    # bf16-rounded inputs.
    x_b = x.astype(jnp.bfloat16).astype(jnp.float32)
    p_b = proj.astype(jnp.bfloat16).astype(jnp.float32)

    # (1) Realistic BERT-scale activations push ||expmap0(x@proj)|| to the ball
    #     boundary, where artanh amplifies f32 rounding (~1e-7 -> ~1e-3 in the
    #     result); tolerance reflects that conditioning (the torch module is f64).
    ref = reference(x_b, p_b, trans, pos, neg)
    assert jnp.allclose(out, ref, rtol=2e-2, atol=2e-2), (out, ref)

    # (2) Well-conditioned regime (points away from the boundary): tight match
    #     against the reference on identical bf16-rounded inputs.
    xs = 0.25 * x
    out_s = poincare_probe_fixed(xs, proj, trans, pos, neg)
    ref_s = reference(xs.astype(jnp.bfloat16).astype(jnp.float32), p_b, trans, pos, neg)
    assert jnp.allclose(out_s, ref_s, rtol=1e-3, atol=1e-3), (out_s, ref_s)

    # (3) Same regime vs the full-f32 reference: bounds the cost of the bf16
    #     activation streaming itself.
    ref_s32 = reference(xs, proj, trans, pos, neg)
    assert jnp.allclose(out_s, ref_s32, rtol=5e-2, atol=5e-2), (out_s, ref_s32)

    print("KERNEL_OK")
</pallas_src>

<mosaic_0001>
module attributes {stable_mosaic.version = 11 : i64} {
  func.func @probe_kernel(%arg0: i32, %arg1: memref<128x768xbf16, #tpu.memory_space<vmem>>, %arg2: memref<768x64xbf16, #tpu.memory_space<vmem>>, %arg3: memref<64x128xf32, #tpu.memory_space<vmem>>, %arg4: memref<1x2xf32, #tpu.memory_space<vmem>>, %arg5: memref<128x2xf32, #tpu.memory_space<vmem>>) attributes {dimension_semantics = [#tpu.dimension_semantics<parallel>], iteration_bounds = array<i64: 1>, scalar_prefetch = 0 : i64, scratch_operands = 0 : i64, tpu.core_type = #tpu.core_type<tc>, window_params = [{transform_indices = @transform_0, window_bounds = array<i64: 128, 768>}, {pipeline_mode = #tpu.pipeline_mode<synchronous>, transform_indices = @transform_1, window_bounds = array<i64: 768, 64>}, {pipeline_mode = #tpu.pipeline_mode<synchronous>, transform_indices = @transform_2, window_bounds = array<i64: 64, 128>}, {pipeline_mode = #tpu.pipeline_mode<synchronous>, transform_indices = @transform_3, window_bounds = array<i64: 1, 2>}, {transform_indices = @transform_4, window_bounds = array<i64: 128, 2>}]} {
    %c0 = arith.constant 0 : index
    %c0_0 = arith.constant 0 : index
    %0 = vector.load %arg1[%c0, %c0_0] : memref<128x768xbf16, #tpu.memory_space<vmem>>, vector<128x768xbf16>
    %c0_1 = arith.constant 0 : index
    %c0_2 = arith.constant 0 : index
    %1 = vector.load %arg2[%c0_1, %c0_2] : memref<768x64xbf16, #tpu.memory_space<vmem>>, vector<768x64xbf16>
    %c0_3 = arith.constant 0 : index
    %c0_4 = arith.constant 0 : index
    %2 = vector.load %arg3[%c0_3, %c0_4] : memref<64x128xf32, #tpu.memory_space<vmem>>, vector<64x128xf32>
    %c0_5 = arith.constant 0 : index
    %c0_6 = arith.constant 0 : index
    %3 = vector.load %arg4[%c0_5, %c0_6] : memref<1x2xf32, #tpu.memory_space<vmem>>, vector<1x2xf32>
    %cst = arith.constant dense<0.000000e+00> : vector<128x64xf32>
    %4 = tpu.matmul %0, %1, %cst {dimension_numbers = #tpu.dot_dimension_numbers<[1], [0], [0], [1], [0, 0, 1, 1], [], []>} : vector<128x768xbf16>, vector<768x64xbf16>, vector<128x64xf32> -> vector<128x64xf32>
    %5 = arith.mulf %4, %4 : vector<128x64xf32>
    %cst_7 = arith.constant dense<0.000000e+00> : vector<128xf32>
    %6 = vector.multi_reduction <add>, %5, %cst_7 [1] : vector<128x64xf32> to vector<128xf32>
    %7 = vector.shape_cast %6 : vector<128xf32> to vector<128x1xf32>
    %8 = math.sqrt %7 : vector<128x1xf32>
    %cst_8 = arith.constant 1.000000e-15 : f32
    %9 = vector.broadcast %cst_8 : f32 to vector<128x1xf32>
    %10 = arith.maximumf %8, %9 : vector<128x1xf32>
    %cst_9 = arith.constant 1.000000e-30 : f32
    %11 = vector.broadcast %cst_9 : f32 to vector<128x1xf32>
    %12 = arith.maximumf %7, %11 : vector<128x1xf32>
    %13 = math.rsqrt %12 : vector<128x1xf32>
    %14 = math.tanh %10 : vector<128x1xf32>
    %15 = arith.mulf %14, %8 : vector<128x1xf32>
    %16 = arith.mulf %15, %13 : vector<128x1xf32>
    %cst_10 = arith.constant 1.000000e-15 : f32
    %17 = vector.broadcast %cst_10 : f32 to vector<128x1xf32>
    %18 = arith.maximumf %16, %17 : vector<128x1xf32>
    %cst_11 = arith.constant 0.999989986 : f32
    %19 = vector.broadcast %cst_11 : f32 to vector<128x1xf32>
    %20 = arith.cmpf ogt, %18, %19 : vector<128x1xf32>
    %cst_12 = arith.constant 0.999989986 : f32
    %21 = vector.broadcast %cst_12 : f32 to vector<128x1xf32>
    %22 = arith.divf %21, %18 : vector<128x1xf32>
    %cst_13 = arith.constant 1.000000e+00 : f32
    %23 = vector.broadcast %cst_13 : f32 to vector<128x1xf32>
    %24 = arith.select %20, %22, %23 : vector<128x1xi1>, vector<128x1xf32>
    %25 = arith.mulf %14, %13 : vector<128x1xf32>
    %26 = arith.mulf %25, %24 : vector<128x1xf32>
    %27 = vector.broadcast %26 : vector<128x1xf32> to vector<128x64xf32>
    %28 = arith.mulf %4, %27 : vector<128x64xf32>
    %cst_14 = arith.constant 0.999989986 : f32
    %29 = vector.broadcast %cst_14 : f32 to vector<128x1xf32>
    %30 = arith.minimumf %18, %29 : vector<128x1xf32>
    %cst_15 = arith.constant dense<0.000000e+00> : vector<128x128xf32>
    %31 = tpu.matmul %28, %2, %cst_15 {dimension_numbers = #tpu.dot_dimension_numbers<[1], [0], [0], [1], [0, 0, 1, 1], [], []>} : vector<128x64xf32>, vector<64x128xf32>, vector<128x128xf32> -> vector<128x128xf32>
    %32 = vector.extract_strided_slice %31 {offsets = [0, 0], sizes = [128, 2], strides = [1, 1]} : vector<128x128xf32> to vector<128x2xf32>
    %33 = arith.mulf %31, %31 : vector<128x128xf32>
    %cst_16 = arith.constant dense<0.000000e+00> : vector<128xf32>
    %34 = vector.multi_reduction <add>, %33, %cst_16 [1] : vector<128x128xf32> to vector<128xf32>
    %35 = vector.shape_cast %34 : vector<128xf32> to vector<128x1xf32>
    %36 = arith.mulf %32, %32 : vector<128x2xf32>
    %cst_17 = arith.constant dense<0.000000e+00> : vector<128xf32>
    %37 = vector.multi_reduction <add>, %36, %cst_17 [1] : vector<128x2xf32> to vector<128xf32>
    %38 = vector.shape_cast %37 : vector<128xf32> to vector<128x1xf32>
    %39 = arith.subf %35, %38 : vector<128x1xf32>
    %cst_18 = arith.constant 0.000000e+00 : f32
    %40 = vector.broadcast %cst_18 : f32 to vector<128x1xf32>
    %41 = arith.maximumf %39, %40 : vector<128x1xf32>
    %42 = math.sqrt %41 : vector<128x1xf32>
    %cst_19 = arith.constant 1.000000e-15 : f32
    %43 = vector.broadcast %cst_19 : f32 to vector<128x1xf32>
    %44 = arith.maximumf %42, %43 : vector<128x1xf32>
    %cst_20 = arith.constant 1.000000e-30 : f32
    %45 = vector.broadcast %cst_20 : f32 to vector<128x1xf32>
    %46 = arith.maximumf %41, %45 : vector<128x1xf32>
    %47 = math.rsqrt %46 : vector<128x1xf32>
    %48 = arith.divf %44, %30 : vector<128x1xf32>
    %cst_21 = arith.constant -0.99999988 : f32
    %cst_22 = arith.constant 0.99999988 : f32
    %49 = vector.broadcast %cst_21 : f32 to vector<128x1xf32>
    %50 = arith.maximumf %49, %30 : vector<128x1xf32>
    %51 = vector.broadcast %cst_22 : f32 to vector<128x1xf32>
    %52 = arith.minimumf %51, %50 : vector<128x1xf32>
    %53 = math.log1p %52 : vector<128x1xf32>
    %cst_23 = arith.constant 0.000000e+00 : f32
    %54 = vector.broadcast %cst_23 : f32 to vector<128x1xf32>
    %55 = arith.subf %54, %52 : vector<128x1xf32>
    %56 = math.log1p %55 : vector<128x1xf32>
    %57 = arith.subf %53, %56 : vector<128x1xf32>
    %cst_24 = arith.constant 5.000000e-01 : f32
    %58 = vector.broadcast %cst_24 : f32 to vector<128x1xf32>
    %59 = arith.mulf %58, %57 : vector<128x1xf32>
    %60 = arith.mulf %48, %59 : vector<128x1xf32>
    %61 = math.tanh %60 : vector<128x1xf32>
    %cst_25 = arith.constant 0.000000e+00 : f32
    %62 = vector.broadcast %cst_25 : f32 to vector<128x1xf32>
    %63 = arith.cmpf oeq, %41, %62 : vector<128x1xf32>
    %cst_26 = arith.constant 0.000000e+00 : f32
    %64 = vector.broadcast %cst_26 : f32 to vector<128x1xf32>
    %65 = arith.select %63, %64, %61 : vector<128x1xi1>, vector<128x1xf32>
    %cst_27 = arith.constant 1.000000e-15 : f32
    %66 = vector.broadcast %cst_27 : f32 to vector<128x1xf32>
    %67 = arith.maximumf %65, %66 : vector<128x1xf32>
    %68 = arith.mulf %61, %47 : vector<128x1xf32>
    %cst_28 = arith.constant 0.000000e+00 : f32
    %69 = vector.broadcast %cst_28 : f32 to vector<128x1xf32>
    %70 = arith.select %63, %69, %68 : vector<128x1xi1>, vector<128x1xf32>
    %cst_29 = arith.constant 0.999989986 : f32
    %71 = vector.broadcast %cst_29 : f32 to vector<128x1xf32>
    %72 = arith.cmpf ogt, %67, %71 : vector<128x1xf32>
    %cst_30 = arith.constant 0.999989986 : f32
    %73 = vector.broadcast %cst_30 : f32 to vector<128x1xf32>
    %74 = arith.divf %73, %67 : vector<128x1xf32>
    %cst_31 = arith.constant 1.000000e+00 : f32
    %75 = vector.broadcast %cst_31 : f32 to vector<128x1xf32>
    %76 = arith.select %72, %74, %75 : vector<128x1xi1>, vector<128x1xf32>
    %77 = arith.mulf %70, %76 : vector<128x1xf32>
    %cst_32 = arith.constant 0.999989986 : f32
    %78 = vector.broadcast %cst_32 : f32 to vector<128x1xf32>
    %79 = arith.minimumf %67, %78 : vector<128x1xf32>
    %80 = arith.mulf %79, %79 : vector<128x1xf32>
    %cst_33 = arith.constant 0.000000e+00 : f32
    %81 = vector.broadcast %cst_33 : f32 to vector<128x1xf32>
    %82 = arith.subf %81, %77 : vector<128x1xf32>
    %83 = vector.broadcast %82 : vector<128x1xf32> to vector<128x2xf32>
    %84 = arith.mulf %83, %32 : vector<128x2xf32>
    %cst_34 = arith.constant 2.000000e+00 : f32
    %85 = vector.broadcast %cst_34 : f32 to vector<128x2xf32>
    %86 = arith.mulf %85, %84 : vector<128x2xf32>
    %cst_35 = arith.constant 1.000000e+00 : f32
    %87 = vector.broadcast %cst_35 : f32 to vector<128x2xf32>
    %88 = arith.addf %87, %86 : vector<128x2xf32>
    %89 = vector.broadcast %80 : vector<128x1xf32> to vector<128x2xf32>
    %90 = arith.addf %88, %89 : vector<128x2xf32>
    %cst_36 = arith.constant 1.000000e+00 : f32
    %91 = vector.broadcast %cst_36 : f32 to vector<1x2xf32>
    %92 = arith.subf %91, %3 : vector<1x2xf32>
    %cst_37 = arith.constant 2.000000e+00 : f32
    %93 = vector.broadcast %cst_37 : f32 to vector<128x2xf32>
    %94 = arith.mulf %93, %84 : vector<128x2xf32>
    %cst_38 = arith.constant 1.000000e+00 : f32
    %95 = vector.broadcast %cst_38 : f32 to vector<128x2xf32>
    %96 = arith.addf %95, %94 : vector<128x2xf32>
    %97 = vector.broadcast %3 : vector<1x2xf32> to vector<128x2xf32>
    %98 = vector.broadcast %80 : vector<128x1xf32> to vector<128x2xf32>
    %99 = arith.mulf %97, %98 : vector<128x2xf32>
    %100 = arith.addf %96, %99 : vector<128x2xf32>
    %cst_39 = arith.constant 1.000000e-15 : f32
    %101 = vector.broadcast %cst_39 : f32 to vector<128x2xf32>
    %102 = arith.maximumf %100, %101 : vector<128x2xf32>
    %103 = arith.mulf %90, %90 : vector<128x2xf32>
    %104 = vector.broadcast %3 : vector<1x2xf32> to vector<128x2xf32>
    %105 = arith.mulf %103, %104 : vector<128x2xf32>
    %cst_40 = arith.constant 2.000000e+00 : f32
    %106 = vector.broadcast %cst_40 : f32 to vector<128x2xf32>
    %107 = arith.mulf %106, %90 : vector<128x2xf32>
    %108 = vector.broadcast %92 : vector<1x2xf32> to vector<128x2xf32>
    %109 = arith.mulf %107, %108 : vector<128x2xf32>
    %110 = arith.mulf %109, %84 : vector<128x2xf32>
    %111 = arith.addf %105, %110 : vector<128x2xf32>
    %112 = arith.mulf %92, %92 : vector<1x2xf32>
    %113 = vector.broadcast %112 : vector<1x2xf32> to vector<128x2xf32>
    %114 = vector.broadcast %80 : vector<128x1xf32> to vector<128x2xf32>
    %115 = arith.mulf %113, %114 : vector<128x2xf32>
    %116 = arith.addf %111, %115 : vector<128x2xf32>
    %cst_41 = arith.constant 0.000000e+00 : f32
    %117 = vector.broadcast %cst_41 : f32 to vector<128x2xf32>
    %118 = arith.maximumf %116, %117 : vector<128x2xf32>
    %119 = math.sqrt %118 : vector<128x2xf32>
    %120 = arith.divf %119, %102 : vector<128x2xf32>
    %cst_42 = arith.constant -0.99999988 : f32
    %cst_43 = arith.constant 0.99999988 : f32
    %121 = vector.broadcast %cst_42 : f32 to vector<128x2xf32>
    %122 = arith.maximumf %121, %120 : vector<128x2xf32>
    %123 = vector.broadcast %cst_43 : f32 to vector<128x2xf32>
    %124 = arith.minimumf %123, %122 : vector<128x2xf32>
    %125 = math.log1p %124 : vector<128x2xf32>
    %cst_44 = arith.constant 0.000000e+00 : f32
    %126 = vector.broadcast %cst_44 : f32 to vector<128x2xf32>
    %127 = arith.subf %126, %124 : vector<128x2xf32>
    %128 = math.log1p %127 : vector<128x2xf32>
    %129 = arith.subf %125, %128 : vector<128x2xf32>
    %cst_45 = arith.constant 5.000000e-01 : f32
    %130 = vector.broadcast %cst_45 : f32 to vector<128x2xf32>
    %131 = arith.mulf %130, %129 : vector<128x2xf32>
    %cst_46 = arith.constant 2.000000e+00 : f32
    %132 = vector.broadcast %cst_46 : f32 to vector<128x2xf32>
    %133 = arith.mulf %132, %131 : vector<128x2xf32>
    %c0_47 = arith.constant 0 : index
    %c0_48 = arith.constant 0 : index
    %134 = vector.load %arg5[%c0_47, %c0_48] : memref<128x2xf32, #tpu.memory_space<vmem>>, vector<128x2xf32>
    tpu.vector_store %arg5[%c0_47, %c0_48], %133 {strides = array<i32>} : memref<128x2xf32, #tpu.memory_space<vmem>>, vector<128x2xf32>,
    return
  }
  func.func @transform_0(%arg0: i32) -> (i32, i32) {
    %c0_i32 = arith.constant 0 : i32
    %c0_i32_0 = arith.constant 0 : i32
    return %arg0, %c0_i32 : i32, i32
  }
  func.func @transform_1(%arg0: i32) -> (i32, i32) {
    %c0_i32 = arith.constant 0 : i32
    %c0_i32_0 = arith.constant 0 : i32
    %c0_i32_1 = arith.constant 0 : i32
    return %c0_i32, %c0_i32_0 : i32, i32
  }
  func.func @transform_2(%arg0: i32) -> (i32, i32) {
    %c0_i32 = arith.constant 0 : i32
    %c0_i32_0 = arith.constant 0 : i32
    %c0_i32_1 = arith.constant 0 : i32
    return %c0_i32, %c0_i32_0 : i32, i32
  }
  func.func @transform_3(%arg0: i32) -> (i32, i32) {
    %c0_i32 = arith.constant 0 : i32
    %c0_i32_0 = arith.constant 0 : i32
    %c0_i32_1 = arith.constant 0 : i32
    return %c0_i32, %c0_i32_0 : i32, i32
  }
  func.func @transform_4(%arg0: i32) -> (i32, i32) {
    %c0_i32 = arith.constant 0 : i32
    %c0_i32_0 = arith.constant 0 : i32
    return %arg0, %c0_i32 : i32, i32
  }
}

</mosaic_0001>

<bundles_post_ra>
// kernel: tpu_custom_call.1
= control target key start
LH: loop header
LB: loop body
LE: loop exit
PB: predicated region body
PF: predicated region fallthrough
CT: control target
= control target key end

     0   :  { %vm1006_vm0 = vcmask 523264   ;;  %s7305_s1 = inlined_call_operand.vmem [shape: bf16[768,64], index: 1, kind: input, shape index: {}]   ;;  %s7306_s0 = inlined_call_operand.vmem [shape: bf16[128,768], index: 0, kind: input, shape index: {}]   ;;  %s7307_s2 = inlined_call_operand.vmem [shape: f32[64,128], index: 2, kind: input, shape index: {}]   ;;  %s7308_s3 = inlined_call_operand.vmem [shape: f32[1,2], index: 3, kind: input, shape index: {}]   ;;  %s7309_s4 = inlined_call_operand.vmem [shape: f32[128,2], index: 4, kind: output, shape index: {}]  }
   0x1   :  { %v3769_v0 = vld [vmem:[%s7305_s1 + $0x78] sm:$0xff]   ;;  %v3773_v4 = vld [vmem:[%s7305_s1 + $0x70] sm:$0xff]   ;;  %v3777_v8 = vld [vmem:[%s7305_s1 + $0x68] sm:$0xff]  }
   0x2   :  { %v3770_v1 = vld [vmem:[%s7305_s1 + $0xf8] sm:$0xff]   ;;  %3497 = vmatprep.subr.bf16.mxu0 %v3769_v0  ;;  %v3774_v5 = vld [vmem:[%s7305_s1 + $0xf0] sm:$0xff]   ;;  %v3778_v9 = vld [vmem:[%s7305_s1 + $0xe8] sm:$0xff]  }
   0x3   :  { %v3771_v2 = vld [vmem:[%s7305_s1 + $0x38] sm:$0xff]   ;;  %3561 = vmatprep.subr.bf16.mxu1 %v3770_v1  ;;  %v3775_v6 = vld [vmem:[%s7305_s1 + $0x30] sm:$0xff]   ;;  %v3779_v10 = vld [vmem:[%s7305_s1 + $0x28] sm:$0xff]  }
   0x4   :  { %v3772_v3 = vld [vmem:[%s7305_s1 + $0xb8] sm:$0xff]   ;;  %3498 = vmatpush3.bf16.msra.mxu0 %v3771_v2  ;;  %v3776_v7 = vld [vmem:[%s7305_s1 + $0xb0] sm:$0xff]   ;;  %v3780_v11 = vld [vmem:[%s7305_s1 + $0xa8] sm:$0xff]  }
   0x5   :  { %3562 = vmatpush3.bf16.msra.mxu1 %v3772_v3  ;;  %3499 = vmatprep.subr.bf16.mxu0 %v3773_v4  ;;  %v3781_v12 = vld [vmem:[%s7305_s1 + $0x60] sm:$0xff]   ;;  %v3785_v16 = vld [vmem:[%s7305_s1 + $0x58] sm:$0xff]   ;;  %v3789_v20 = vld [vmem:[%s7305_s1 + $0x50] sm:$0xff]  }
   0x6   :  { %3563 = vmatprep.subr.bf16.mxu1 %v3774_v5  ;;  %v3782_v13 = vld [vmem:[%s7305_s1 + $0xe0] sm:$0xff]   ;;  %v3786_v17 = vld [vmem:[%s7305_s1 + $0xd8] sm:$0xff]   ;;  %v3790_v21 = vld [vmem:[%s7305_s1 + $0xd0] sm:$0xff]  }
   0x7   :  { %v3783_v14 = vld [vmem:[%s7305_s1 + $0x20] sm:$0xff]   ;;  %v3787_v18 = vld [vmem:[%s7305_s1 + $0x18] sm:$0xff]   ;;  %v3791_v22 = vld [vmem:[%s7305_s1 + $0x10] sm:$0xff]  }
   0x8   :  { %3500 = vmatpush3.bf16.msra.mxu0 %v3775_v6  ;;  %v3784_v15 = vld [vmem:[%s7305_s1 + $0xa0] sm:$0xff]   ;;  %v3788_v19 = vld [vmem:[%s7305_s1 + $0x98] sm:$0xff]   ;;  %v3792_v23 = vld [vmem:[%s7305_s1 + $0x90] sm:$0xff]  }
   0x9   :  { %3564 = vmatpush3.bf16.msra.mxu1 %v3776_v7  ;;  %3501 = vmatprep.subr.bf16.mxu0 %v3777_v8  ;;  %v3793_v24 = vld [vmem:[%s7305_s1 + $0x48] sm:$0xff]   ;;  %v3797_v28 = vld [vmem:[%s7305_s1 + $0x40] sm:$0xff]   ;;  %v3807_v36 = vld [vmem:[%s7305_s1 + $0x178] sm:$0xff]  }
   0xa   :  { %3565 = vmatprep.subr.bf16.mxu1 %v3778_v9  ;;  %v3794_v25 = vld [vmem:[%s7305_s1 + $0xc8] sm:$0xff]   ;;  %v3798_v29 = vld [vmem:[%s7305_s1 + $0xc0] sm:$0xff]   ;;  %v3808_v37 = vld [vmem:[%s7305_s1 + $0x138] sm:$0xff]  }
   0xb   :  { %v3795_v26 = vld [vmem:[%s7305_s1 + $0x8] sm:$0xff]   ;;  %v3799_v30 = vld [vmem:[%s7305_s1] sm:$0xff]   ;;  %v3811_v39 = vld [vmem:[%s7306_s0 + $0x3c] ss:$24 sps:$4 sm:$0xff]  }
   0xc   :  { %3502 = vmatpush3.bf16.msra.mxu0 %v3779_v10  ;;  %v3796_v27 = vld [vmem:[%s7305_s1 + $0x88] sm:$0xff]   ;;  %v3800_v31 = vld [vmem:[%s7305_s1 + $0x80] sm:$0xff]   ;;  %v3814_v41 = vld [vmem:[%s7306_s0 + $0x38] ss:$24 sps:$4 sm:$0xff]  }
   0xd   :  { %3566 = vmatpush3.bf16.msra.mxu1 %v3780_v11  ;;  %3503 = vmatprep.subr.bf16.mxu0 %v3781_v12  ;;  %v3801_v32 = vld [vmem:[%s7306_s0] ss:$24 sps:$4 sm:$0xff]   ;;  %v3803_v33 = vld [vmem:[%s7306_s0 + $0x4] ss:$24 sps:$4 sm:$0xff]   ;;  %v3809_v38 = vld [vmem:[%s7306_s0 + $0x34] ss:$24 sps:$4 sm:$0xff]  }
   0xe   :  { %3567 = vmatprep.subr.bf16.mxu1 %v3782_v13  ;;  %v3804_v34 = vld [vmem:[%s7306_s0 + $0x8] ss:$24 sps:$4 sm:$0xff]   ;;  %v3806_v35 = vld [vmem:[%s7306_s0 + $0xc] ss:$24 sps:$4 sm:$0xff]   ;;  %731 = vmatprep.mubr.bf16.mxu0 %v3803_v33  ;;  %v3815_v42 = vld [vmem:[%s7305_s1 + $0x170] sm:$0xff]  }
   0xf   :  { %828 = vmatprep.mubr.bf16.mxu1 %v3806_v35  ;;  %v3813_v40 = vld [vmem:[%s7306_s0 + $0x30] ss:$24 sps:$4 sm:$0xff]   ;;  %v3817_v44 = vld [vmem:[%s7306_s0 + $0x64] ss:$24 sps:$4 sm:$0xff]   ;;  %v3821_v48 = vld [vmem:[%s7306_s0 + $0x60] ss:$24 sps:$4 sm:$0xff]  }
  0x10   :  { %3504 = vmatpush3.bf16.msra.mxu0 %v3783_v14  ;;  %v3816_v43 = vld [vmem:[%s7305_s1 + $0x130] sm:$0xff]   ;;  %v3819_v45 = vld [vmem:[%s7306_s0 + $0x6c] ss:$24 sps:$4 sm:$0xff]   ;;  %v3822_v49 = vld [vmem:[%s7306_s0 + $0x68] ss:$24 sps:$4 sm:$0xff]  }
  0x11   :  { %3568 = vmatpush3.bf16.msra.mxu1 %v3784_v15  ;;  %3505 = vmatprep.subr.bf16.mxu0 %v3785_v16  ;;  %v3823_v46 = vld [vmem:[%s7305_s1 + $0x168] sm:$0xff]   ;;  %v3827_v51 = vld [vmem:[%s7306_s0 + $0x9c] ss:$24 sps:$4 sm:$0xff]   ;;  %v3831_v52 = vld [vmem:[%s7305_s1 + $0x160] sm:$0xff]  }
  0x12   :  { %3569 = vmatprep.subr.bf16.mxu1 %v3786_v17  ;;  %v3824_v47 = vld [vmem:[%s7305_s1 + $0x128] sm:$0xff]   ;;  %v3832_v53 = vld [vmem:[%s7305_s1 + $0x120] sm:$0xff]   ;;  %v3839_v54 = vld [vmem:[%s7305_s1 + $0x158] sm:$0xff]  }
  0x13   :  { %v3825_v50 = vld [vmem:[%s7306_s0 + $0x94] ss:$24 sps:$4 sm:$0xff]   ;;  %v3840_v55 = vld [vmem:[%s7305_s1 + $0x118] sm:$0xff]   ;;  %v3829_v56 = vld [vmem:[%s7306_s0 + $0x90] ss:$24 sps:$4 sm:$0xff]  }
  0x14   :  { %3506 = vmatpush3.bf16.msra.mxu0 %v3787_v18  ;;  %v3830_v57 = vld [vmem:[%s7306_s0 + $0x98] ss:$24 sps:$4 sm:$0xff]   ;;  %v3833_v58 = vld [vmem:[%s7306_s0 + $0xc4] ss:$24 sps:$4 sm:$0xff]   ;;  %v3838_v63 = vld [vmem:[%s7306_s0 + $0xc8] ss:$24 sps:$4 sm:$0xff]  }
  0x15   :  { %3570 = vmatpush3.bf16.msra.mxu1 %v3788_v19  ;;  %3507 = vmatprep.subr.bf16.mxu0 %v3789_v20  ;;  %v3835_v59 = vld [vmem:[%s7306_s0 + $0xcc] ss:$24 sps:$4 sm:$0xff]   ;;  %v3847_v60 = vld [vmem:[%s7305_s1 + $0x150] sm:$0xff]   ;;  %v3837_v62 = vld [vmem:[%s7306_s0 + $0xc0] ss:$24 sps:$4 sm:$0xff]  }
  0x16   :  { %3571 = vmatprep.subr.bf16.mxu1 %v3790_v21  ;;  %v3848_v61 = vld [vmem:[%s7305_s1 + $0x110] sm:$0xff]   ;;  %v3855_v0 = vld [vmem:[%s7305_s1 + $0x148] sm:$0xff]   ;;  %v3863_v4 = vld [vmem:[%s7305_s1 + $0x140] sm:$0xff]  }
  0x17   :  { %v3856_v1 = vld [vmem:[%s7305_s1 + $0x108] sm:$0xff]   ;;  %v3843_v3 = vld [vmem:[%s7306_s0 + $0xfc] ss:$24 sps:$4 sm:$0xff]   ;;  %v3864_v5 = vld [vmem:[%s7305_s1 + $0x100] sm:$0xff]  }
  0x18   :  { %3508 = vmatpush3.bf16.msra.mxu0 %v3791_v22  ;;  %v3841_v2 = vld [vmem:[%s7306_s0 + $0xf4] ss:$24 sps:$4 sm:$0xff]   ;;  %v3845_v6 = vld [vmem:[%s7306_s0 + $0xf0] ss:$24 sps:$4 sm:$0xff]   ;;  %v3849_v8 = vld [vmem:[%s7306_s0 + $0x124] ss:$24 sps:$4 sm:$0xff]  }
  0x19   :  { %3572 = vmatpush3.bf16.msra.mxu1 %v3792_v23  ;;  %3509 = vmatprep.subr.bf16.mxu0 %v3793_v24  ;;  %v3846_v7 = vld [vmem:[%s7306_s0 + $0xf8] ss:$24 sps:$4 sm:$0xff]   ;;  %v3851_v9 = vld [vmem:[%s7306_s0 + $0x12c] ss:$24 sps:$4 sm:$0xff]   ;;  %v3854_v11 = vld [vmem:[%s7306_s0 + $0x128] ss:$24 sps:$4 sm:$0xff]  }
  0x1a   :  { %3573 = vmatprep.subr.bf16.mxu1 %v3794_v25  ;;  %v3853_v10 = vld [vmem:[%s7306_s0 + $0x120] ss:$24 sps:$4 sm:$0xff]   ;;  %v3857_v12 = vld [vmem:[%s7306_s0 + $0x154] ss:$24 sps:$4 sm:$0xff]   ;;  %v3861_v14 = vld [vmem:[%s7306_s0 + $0x150] ss:$24 sps:$4 sm:$0xff]  }
  0x1b   :  { %v3859_v13 = vld [vmem:[%s7306_s0 + $0x15c] ss:$24 sps:$4 sm:$0xff]   ;;  %v3862_v15 = vld [vmem:[%s7306_s0 + $0x158] ss:$24 sps:$4 sm:$0xff]  }
  0x1c   :  { %3510 = vmatpush3.bf16.msra.mxu0 %v3795_v26  ;;  %v3867_v16 = vld [vmem:[%s7306_s0 + $0x14] ss:$24 sps:$4 sm:$0xff]   ;;  %v3865_v18 = vld [vmem:[%s7306_s0 + $0x10] ss:$24 sps:$4 sm:$0xff]   ;;  %v3871_v20 = vld [vmem:[%s7306_s0 + $0x44] ss:$24 sps:$4 sm:$0xff]  }
  0x1d   :  { %3574 = vmatpush3.bf16.msra.mxu1 %v3796_v27  ;;  %3511 = vmatprep.subr.bf16.mxu0 %v3797_v28  ;;  %v3870_v17 = vld [vmem:[%s7306_s0 + $0x134] ss:$24 sps:$4 sm:$0xff]   ;;  %v3868_v19 = vld [vmem:[%s7306_s0 + $0x130] ss:$24 sps:$4 sm:$0xff]   ;;  %v3873_v21 = vld [vmem:[%s7306_s0 + $0x164] ss:$24 sps:$4 sm:$0xff]  }
  0x1e   :  { %3575 = vmatprep.subr.bf16.mxu1 %v3798_v29  ;;  %v3875_v22 = vld [vmem:[%s7306_s0 + $0x40] ss:$24 sps:$4 sm:$0xff]   ;;  %v3877_v24 = vld [vmem:[%s7306_s0 + $0x74] ss:$24 sps:$4 sm:$0xff]   ;;  %v3879_v25 = vld [vmem:[%s7306_s0 + $0x70] ss:$24 sps:$4 sm:$0xff]  }
  0x1f   :  { %v3876_v23 = vld [vmem:[%s7306_s0 + $0x160] ss:$24 sps:$4 sm:$0xff]   ;;  %v3880_v26 = vld [vmem:[%s7306_s0 + $0xa4] ss:$24 sps:$4 sm:$0xff]   ;;  %v3883_v28 = vld [vmem:[%s7306_s0 + $0xd4] ss:$24 sps:$4 sm:$0xff]  }
  0x20   :  { %3512 = vmatpush3.bf16.msra.mxu0 %v3799_v30  ;;  %v3882_v27 = vld [vmem:[%s7306_s0 + $0xa0] ss:$24 sps:$4 sm:$0xff]   ;;  %v3885_v29 = vld [vmem:[%s7306_s0 + $0xd0] ss:$24 sps:$4 sm:$0xff]   ;;  %v3886_v30 = vld [vmem:[%s7306_s0 + $0x104] ss:$24 sps:$4 sm:$0xff]  }
  0x21   :  { %3576 = vmatpush3.bf16.msra.mxu1 %v3800_v31  ;;  %3625 = vmatprep.subr.bf16.mxu0 %v3807_v36  ;;  %v3888_v31 = vld [vmem:[%s7306_s0 + $0x100] ss:$24 sps:$4 sm:$0xff]  }
  0x22   :  { %3753 = vmatprep.subr.bf16.mxu1 %v3807_v36 }
  0x23   :  { %732 = vmatmul.mubr.bf16.vlgmr.msra.gmra.mxu0 %v3801_v32 }
  0x24   :  { %829 = vmatmul.mubr.bf16.vlgmr.msra.gmra.mxu1 %v3804_v34  ;;  %3626 = vmatpush3.bf16.msra.mxu0 %v3808_v37 }
  0x25   :  { %739 = vmatprep.mubr.bf16.mxu0 %v3809_v38  ;;  %3761 = vmatpush3.bf16.msra.mxu1 %v3808_v37 }
  0x26   :  { %836 = vmatprep.mubr.bf16.mxu1 %v3811_v39  ;;  %3627 = vmatprep.subr.bf16.mxu0 %v3815_v42 }
  0x27   :  { %3754 = vmatprep.subr.bf16.mxu1 %v3815_v42 }
  0x28   :  { %3628 = vmatpush3.bf16.msra.mxu0 %v3816_v43 }
  0x29   :  { %3762 = vmatpush3.bf16.msra.mxu1 %v3816_v43  ;;  %3629 = vmatprep.subr.bf16.mxu0 %v3823_v46 }
  0x2a   :  { %3755 = vmatprep.subr.bf16.mxu1 %v3823_v46 }
  0x2b   :  { %740 = vmatmul.mubr.bf16.gmra.mxu0 %v3813_v40 }
  0x2c   :  { %837 = vmatmul.mubr.bf16.gmra.mxu1 %v3814_v41  ;;  %747 = vmatprep.mubr.bf16.mxu0 %v3817_v44 }
  0x2d   :  { %844 = vmatprep.mubr.bf16.mxu1 %v3819_v45  ;;  %3630 = vmatpush3.bf16.msra.mxu0 %v3824_v47 }
  0x2e   :  { %3763 = vmatpush3.bf16.msra.mxu1 %v3824_v47  ;;  %3631 = vmatprep.subr.bf16.mxu0 %v3831_v52 }
  0x2f   :  { %3756 = vmatprep.subr.bf16.mxu1 %v3831_v52 }
  0x31   :  { %3632 = vmatpush3.bf16.msra.mxu0 %v3832_v53 }
  0x32   :  { %3764 = vmatpush3.bf16.msra.mxu1 %v3832_v53  ;;  %3633 = vmatprep.subr.bf16.mxu0 %v3839_v54 }
  0x33   :  { %748 = vmatmul.mubr.bf16.gmra.mxu0 %v3821_v48  ;;  %3757 = vmatprep.subr.bf16.mxu1 %v3839_v54 }
  0x34   :  { %845 = vmatmul.mubr.bf16.gmra.mxu1 %v3822_v49  ;;  %755 = vmatprep.mubr.bf16.mxu0 %v3825_v50 }
  0x35   :  { %852 = vmatprep.mubr.bf16.mxu1 %v3827_v51  ;;  %3634 = vmatpush3.bf16.msra.mxu0 %v3840_v55 }
  0x36   :  { %3765 = vmatpush3.bf16.msra.mxu1 %v3840_v55  ;;  %3635 = vmatprep.subr.bf16.mxu0 %v3847_v60 }
  0x37   :  { %3758 = vmatprep.subr.bf16.mxu1 %v3847_v60 }
  0x39   :  { %3636 = vmatpush3.bf16.msra.mxu0 %v3848_v61 }
  0x3a   :  { %3766 = vmatpush3.bf16.msra.mxu1 %v3848_v61  ;;  %3637 = vmatprep.subr.bf16.mxu0 %v3855_v0 }
  0x3b   :  { %756 = vmatmul.mubr.bf16.gmra.mxu0 %v3829_v56  ;;  %3759 = vmatprep.subr.bf16.mxu1 %v3855_v0 }
  0x3c   :  { %853 = vmatmul.mubr.bf16.gmra.mxu1 %v3830_v57  ;;  %763 = vmatprep.mubr.bf16.mxu0 %v3833_v58 }
  0x3d   :  { %860 = vmatprep.mubr.bf16.mxu1 %v3835_v59  ;;  %3638 = vmatpush3.bf16.msra.mxu0 %v3856_v1 }
  0x3e   :  { %3767 = vmatpush3.bf16.msra.mxu1 %v3856_v1  ;;  %3639 = vmatprep.subr.bf16.mxu0 %v3863_v4 }
  0x3f   :  { %3760 = vmatprep.subr.bf16.mxu1 %v3863_v4 }
  0x41   :  { %3640 = vmatpush3.bf16.msra.mxu0 %v3864_v5 }
  0x42   :  { %3768 = vmatpush3.bf16.msra.mxu1 %v3864_v5 }
  0x43   :  { %764 = vmatmul.mubr.bf16.gmra.mxu0 %v3837_v62 }
  0x44   :  { %861 = vmatmul.mubr.bf16.gmra.mxu1 %v3838_v63  ;;  %771 = vmatprep.mubr.bf16.mxu0 %v3841_v2 }
  0x45   :  { %868 = vmatprep.mubr.bf16.mxu1 %v3843_v3 }
  0x4b   :  { %772 = vmatmul.mubr.bf16.gmra.mxu0 %v3845_v6 }
  0x4c   :  { %869 = vmatmul.mubr.bf16.gmra.mxu1 %v3846_v7  ;;  %779 = vmatprep.mubr.bf16.mxu0 %v3849_v8 }
  0x4d   :  { %876 = vmatprep.mubr.bf16.mxu1 %v3851_v9 }
  0x53   :  { %780 = vmatmul.mubr.bf16.gmra.mxu0 %v3853_v10 }
  0x54   :  { %877 = vmatmul.mubr.bf16.gmra.mxu1 %v3854_v11  ;;  %787 = vmatprep.mubr.bf16.mxu0 %v3857_v12 }
  0x55   :  { %884 = vmatprep.mubr.bf16.mxu1 %v3859_v13 }
  0x5b   :  { %788 = vmatmul.mubr.bf16.gmra.mxu0 %v3861_v14 }
  0x5c   :  { %885 = vmatmul.mubr.bf16.gmra.mxu1 %v3862_v15  ;;  %925 = vmatprep.mubr.bf16.mxu0 %v3867_v16 }
  0x5d   :  { %973 = vmatprep.mubr.bf16.mxu1 %v3870_v17 }
  0x63   :  { %926 = vmatmul.mubr.bf16.vlgmr.msra.gmra.mxu0 %v3865_v18 }
  0x64   :  { %974 = vmatmul.mubr.bf16.vlgmr.msra.gmra.mxu1 %v3868_v19  ;;  %933 = vmatprep.mubr.bf16.mxu0 %v3871_v20 }
  0x65   :  { %981 = vmatprep.mubr.bf16.mxu1 %v3873_v21 }
  0x6b   :  { %934 = vmatmul.mubr.bf16.gmra.mxu0 %v3875_v22 }
  0x6c   :  { %982 = vmatmul.mubr.bf16.gmra.mxu1 %v3876_v23  ;;  %941 = vmatprep.mubr.bf16.mxu0 %v3877_v24 }
  0x73   :  { %942 = vmatmul.mubr.bf16.gmra.mxu0 %v3879_v25 }
  0x74   :  { %949 = vmatprep.mubr.bf16.mxu0 %v3880_v26 }
  0x7b   :  { %950 = vmatmul.mubr.bf16.gmra.mxu0 %v3882_v27 }
  0x7c   :  { %957 = vmatprep.mubr.bf16.mxu0 %v3883_v28 }
  0x83   :  { %958 = vmatmul.mubr.bf16.gmra.mxu0 %v3885_v29 }
  0x84   :  { %965 = vmatprep.mubr.bf16.mxu0 %v3886_v30 }
  0x8b   :  { %966 = vmatmul.mubr.bf16.gmra.mxu0 %v3888_v31 }
  0xe3   :  { %v3513_v32 = vpop.f32.mrf.mxu0 }
  0xe4   :  { %v3577_v33 = vpop.f32.mrf.mxu1 }
  0xe5   :  { %v3514_v34 = vpop.f32.mrf.mxu0 }
  0xe6   :  { %v3578_v35 = vpop.f32.mrf.mxu1  ;;  %v3515_v28 = vadd.f32 %v3514_v34, %v3513_v32 }
  0xe7   :  { %v3516_v36 = vpop.f32.mrf.mxu0  ;;  %v3579_v29 = vadd.f32 %v3578_v35, %v3577_v33 }
  0xe8   :  { %v3580_v37 = vpop.f32.mrf.mxu1 }
  0xe9   :  { %v3517_v38 = vpop.f32.mrf.mxu0 }
  0xea   :  { %v3581_v39 = vpop.f32.mrf.mxu1  ;;  %v3518_v31 = vadd.f32 %v3517_v38, %v3516_v36 }
  0xeb   :  { %v4682_v40 = vpop.f32.mrf.mxu0 }
  0xec   :  { %v4684_v41 = vpop.f32.mrf.mxu1 }
  0xed   :  { %v4686_v42 = vpop.f32.mrf.mxu0 }
  0xee   :  { %v4688_v43 = vpop.f32.mrf.mxu1  ;;  %v3521_v32 = vadd.f32 %v4686_v42, %v4682_v40 }
  0xef   :  { %v4690_v44 = vpop.f32.mrf.mxu0  ;;  %v3585_v33 = vadd.f32 %v4688_v43, %v4684_v41 }
  0xf0   :  { %v4692_v45 = vpop.f32.mrf.mxu1 }
  0xf1   :  { %v4694_v46 = vpop.f32.mrf.mxu0  ;;  %v839_v41 = vadd.f32 %v3585_v33, %v3521_v32 }
  0xf2   :  { %v4696_v47 = vpop.f32.mrf.mxu1 }
  0xf3   :  { %v4698_v48 = vpop.f32.mrf.mxu0 }
  0xf4   :  { %v4700_v49 = vpop.f32.mrf.mxu1 }
  0xf5   :  { %v4702_v50 = vpop.f32.mrf.mxu0 }
  0xf6   :  { %v4704_v51 = vpop.f32.mrf.mxu1 }
  0xf7   :  { %v4706_v52 = vpop.f32.mrf.mxu0 }
  0xf8   :  { %v4708_v53 = vpop.f32.mrf.mxu1 }
  0xf9   :  { %v4710_v54 = vpop.f32.mrf.mxu0 }
  0xfa   :  { %v4712_v55 = vpop.f32.mrf.mxu1  ;;  %v3530_v32 = vadd.f32 %v4710_v54, %v4706_v52 }
  0xfb   :  { %v4714_v56 = vpop.f32.mrf.mxu0  ;;  %v3594_v33 = vadd.f32 %v4712_v55, %v4708_v53 }
  0xfc   :  { %v4716_v57 = vpop.f32.mrf.mxu1 }
  0xfd   :  { %v4718_v58 = vpop.f32.mrf.mxu0 }
  0xfe   :  { %v4720_v59 = vpop.f32.mrf.mxu1  ;;  %v3533_v53 = vadd.f32 %v4718_v58, %v4714_v56 }
  0xff   :  { %v4722_v60 = vpop.f32.mrf.mxu0  ;;  %v3597_v54 = vadd.f32 %v4720_v59, %v4716_v57 }
 0x100   :  { %v4724_v61 = vpop.f32.mrf.mxu1 }
 0x101   :  { %v4726_v62 = vpop.f32.mrf.mxu0  ;;  %v855_v58 = vadd.f32 %v3597_v54, %v3533_v53 }
 0x102   :  { %v4728_v63 = vpop.f32.mrf.mxu1 }
 0x103   :  { %v4730_v0 = vpop.f32.mrf.mxu0 }
 0x104   :  { %v4732_v1 = vpop.f32.mrf.mxu1 }
 0x105   :  { %v4734_v2 = vpop.f32.mrf.mxu0 }
 0x106   :  { %v4736_v3 = vpop.f32.mrf.mxu1 }
 0x107   :  { %v4738_v4 = vpop.f32.mrf.mxu0 }
 0x108   :  { %v4740_v5 = vpop.f32.mrf.mxu1 }
 0x109   :  { %v4742_v6 = vpop.f32.mrf.mxu0 }
 0x10a   :  { %v4744_v7 = vpop.f32.mrf.mxu1 }
 0x10b   :  { %v4746_v8 = vpop.f32.mrf.mxu0 }
 0x10c   :  { %v4748_v9 = vpop.f32.mrf.mxu1 }
 0x10d   :  { %v4750_v10 = vpop.f32.mrf.mxu0 }
 0x10e   :  { %v4752_v11 = vpop.f32.mrf.mxu1 }
 0x10f   :  { %v4754_v12 = vpop.f32.mrf.mxu0  ;;  %v3609_v53 = vadd.f32 %v4752_v11, %v4748_v9 }
 0x110   :  { %7347 = vst [vmem:[#allocation2_spill] sm:$0xff] %v4754_v12  ;;  %v4756_v13 = vpop.f32.mrf.mxu1 }
 0x111   :  { %7348 = vst [vmem:[#allocation3_spill] sm:$0xff] %v4756_v13  ;;  %v4758_v14 = vpop.f32.mrf.mxu0  ;;  %v831_v13 = vadd.f32 %v3579_v29, %v3515_v28 }
 0x112   :  { %7349 = vst [vmem:[#allocation4_spill] sm:$0xff] %v4758_v14  ;;  %v4760_v15 = vpop.f32.mrf.mxu1 }
 0x113   :  { %7350 = vst [vmem:[#allocation5_spill] sm:$0xff] %v4760_v15  ;;  %v4762_v16 = vpop.f32.mrf.mxu0 }
 0x114   :  { %v4764_v17 = vpop.f32.mrf.mxu1 }
 0x115   :  { %v4766_v18 = vpop.f32.mrf.mxu0 }
 0x116   :  { %v4770_v20 = vpop.f32.mrf.mxu1 }
 0x117   :  { %v4768_v19 = vpop.f32.mrf.mxu0 }
 0x118   :  { %7351 = vst [vmem:[#allocation6_spill] sm:$0xff] %v4768_v19  ;;  %v4776_v23 = vpop.f32.mrf.mxu1  ;;  %v3582_v19 = vadd.f32 %v3581_v39, %v3580_v37  ;;  %v3524_v39 = vadd.f32 %v4694_v46, %v4690_v44  ;;  %v3591_v46 = vadd.f32 %v4704_v51, %v4700_v49 }
 0x119   :  { %v4772_v21 = vpop.f32.mrf.mxu0  ;;  %7354 = vst [vmem:[#allocation9_spill] sm:$0xff] %v4776_v23 }
 0x11a   :  { %7352 = vst [vmem:[#allocation7_spill] sm:$0xff] %v4772_v21  ;;  %v4782_v26 = vpop.f32.mrf.mxu1 }
 0x11b   :  { %v4774_v22 = vpop.f32.mrf.mxu0 }
 0x11c   :  { %7353 = vst [vmem:[#allocation8_spill] sm:$0xff] %v4774_v22  ;;  %v4786_v15 = vpop.f32.mrf.mxu1 }
 0x11d   :  { %v4778_v24 = vpop.f32.mrf.mxu0 }
 0x11e   :  { %7355 = vst [vmem:[#allocation10_spill] sm:$0xff] %v4778_v24  ;;  %v834_v24 = vadd.f32 %v3582_v19, %v3518_v31  ;;  %v4790_v12 = vpop.f32.mrf.mxu1 }
 0x11f   :  { %v4780_v25 = vpop.f32.mrf.mxu0 }
 0x120   :  { %7356 = vst [vmem:[#allocation11_spill] sm:$0xff] %v4780_v25  ;;  %v4805_v19 = vpop.f32.mrf.mxu1 }
 0x121   :  { %v4784_v27 = vpop.f32.mrf.mxu0  ;;  %v7362_v9 = vld [vmem:[#allocation7_spill] sm:$0xff] }
 0x123   :  { %v3641_v30 = vpop.f32.mrf.mxu0 }
 0x125   :  { %v3642_v21 = vpop.f32.mrf.mxu0 }
 0x126   :  { %v3643_v22 = vadd.f32 %v3642_v21, %v3641_v30 }
 0x127   :  { %v3644_v14 = vpop.f32.mrf.mxu0 }
 0x128   :  { %v4788_v23 = vadd.f32 %v3643_v22, %v831_v13  ;;  %v3588_v13 = vadd.f32 %v4696_v47, %v4692_v45  ;;  %v3527_v45 = vadd.f32 %v4702_v50, %v4698_v48 }
 0x129   :  { %v3645_v25 = vpop.f32.mrf.mxu0 }
 0x12a   :  { %v3646_v34 = vadd.f32 %v3645_v25, %v3644_v14  ;;  %v990_v35 = vmul.f32 %v4788_v23, %v4788_v23  ;;  %v4812_v25 = vpop.f32.mrf.mxu1  ;;  %v847_v49 = vadd.f32 %v3591_v46, %v3527_v45 }
 0x12b   :  { %v3647_v36 = vpop.f32.mrf.mxu0 }
 0x12c   :  { %v4798_v37 = vadd.f32 %v3646_v34, %v834_v24  ;;  %v1007_v38 = vsel %vm1006_vm0, %v990_v35, 0.0  ;;  %v842_v24 = vadd.f32 %v3588_v13, %v3524_v39  ;;  %v4827_v34 = vpop.f32.mrf.mxu1  ;;  %v850_v39 = vadd.f32 %v3594_v33, %v3530_v32 }
 0x12d   :  { %v3648_v40 = vpop.f32.mrf.mxu0  ;;  %1008 = vadd.xlane.f32.xlu0 %v1007_v38 }
 0x12e   :  { %v3649_v42 = vadd.f32 %v3648_v40, %v3647_v36  ;;  %v991_v43 = vmul.f32 %v4798_v37, %v4798_v37  ;;  %v3678_v13 = vpop.f32.mrf.mxu1 }
 0x12f   :  { %v3650_v14 = vpop.f32.mrf.mxu0 }
 0x130   :  { %v4809_v21 = vadd.f32 %v3649_v42, %v839_v41  ;;  %v1010_v22 = vsel %vm1006_vm0, %v991_v43, 0.0 }
 0x131   :  { %v3651_v44 = vpop.f32.mrf.mxu0  ;;  %1011 = vadd.xlane.f32.xlu0 %v1010_v22  ;;  %v3600_v22 = vadd.f32 %v4728_v63, %v4724_v61  ;;  %v3603_v61 = vadd.f32 %v4736_v3, %v4732_v1 }
 0x132   :  { %v3652_v47 = vadd.f32 %v3651_v44, %v3650_v14  ;;  %v992_v28 = vmul.f32 %v4809_v21, %v4809_v21  ;;  %v3536_v14 = vadd.f32 %v4726_v62, %v4722_v60  ;;  %v3539_v60 = vadd.f32 %v4734_v2, %v4730_v0 }
 0x133   :  { %v3653_v29 = vpop.f32.mrf.mxu0 }
 0x134   :  { %v4820_v30 = vadd.f32 %v3652_v47, %v842_v24  ;;  %v1013_v31 = vsel %vm1006_vm0, %v992_v28, 0.0  ;;  %v3680_v24 = vpop.f32.mrf.mxu1  ;;  %v858_v47 = vadd.f32 %v3600_v22, %v3536_v14  ;;  %v863_v2 = vadd.f32 %v3603_v61, %v3539_v60 }
 0x135   :  { %v3654_v48 = vpop.f32.mrf.mxu0  ;;  %1014 = vadd.xlane.f32.xlu1 %v1013_v31 }
 0x136   :  { %v3655_v50 = vadd.f32 %v3654_v48, %v3653_v29  ;;  %v993_v51 = vmul.f32 %v4820_v30, %v4820_v30  ;;  %v3681_v28 = vpop.f32.mrf.mxu1  ;;  %v3542_v48 = vadd.f32 %v4742_v6, %v4738_v4 }
 0x137   :  { %v3656_v35 = vpop.f32.mrf.mxu0 }
 0x138   :  { %v4831_v36 = vadd.f32 %v3655_v50, %v847_v49  ;;  %v1016_v38 = vsel %vm1006_vm0, %v993_v51, 0.0  ;;  %v3606_v49 = vadd.f32 %v4744_v7, %v4740_v5  ;;  %v3683_v50 = vpop.f32.mrf.mxu1 }
 0x139   :  { %v3657_v52 = vpop.f32.mrf.mxu0  ;;  %1017 = vadd.xlane.f32.xlu1 %v1016_v38  ;;  %v3615_v38 = vadd.f32 %v4770_v20, %v4764_v17  ;;  %v7358_v17 = vld [vmem:[#allocation4_spill] sm:$0xff] }
 0x13a   :  { %v3658_v55 = vadd.f32 %v3657_v52, %v3656_v35  ;;  %v994_v40 = vmul.f32 %v4831_v36, %v4831_v36  ;;  %v3551_v35 = vadd.f32 %v4766_v18, %v4762_v16  ;;  %v866_v5 = vadd.f32 %v3606_v49, %v3542_v48  ;;  %v3684_v6 = vpop.f32.mrf.mxu1  ;;  %v7357_v18 = vld [vmem:[#allocation2_spill] sm:$0xff] }
 0x13b   :  { %v3659_v41 = vpop.f32.mrf.mxu0  ;;  %v3545_v52 = vadd.f32 %v4750_v10, %v4746_v8  ;;  %v3548_v20 = vadd.f32 %v7358_v17, %v7357_v18  ;;  %v7361_v10 = vld [vmem:[#allocation6_spill] sm:$0xff] }
 0x13c   :  { %v4840_v42 = vadd.f32 %v3658_v55, %v850_v39  ;;  %v1019_v43 = vsel %vm1006_vm0, %v994_v40, 0.0  ;;  %v3679_v55 = vadd.f32 %v3678_v13, %v4827_v34  ;;  %v879_v22 = vadd.f32 %v3615_v38, %v3551_v35  ;;  %v3686_v13 = vpop.f32.mrf.mxu1 }
 0x13d   :  { %v3660_v56 = vpop.f32.mrf.mxu0  ;;  %1020 = vadd.xlane.f32.xlu0 %v1019_v43  ;;  %v7360_v43 = vld [vmem:[#allocation5_spill] sm:$0xff]  ;;  %v3554_v11 = vadd.f32 %v7362_v9, %v7361_v10  ;;  %v3621_v34 = vadd.f32 %v4790_v12, %v4786_v15  ;;  %v162_v10 = vld [vmem:[%s7307_s2] sm:$0xff] }
 0x13e   :  { %v3661_v57 = vadd.f32 %v3660_v56, %v3659_v41  ;;  %v995_v59 = vmul.f32 %v4840_v42, %v4840_v42  ;;  %v7359_v41 = vld [vmem:[#allocation3_spill] sm:$0xff]  ;;  %v3687_v15 = vpop.f32.mrf.mxu1 }
 0x13f   :  { %v3662_v44 = vpop.f32.mrf.mxu0  ;;  %v3612_v14 = vadd.f32 %v7360_v43, %v7359_v41  ;;  %v167_v41 = vld [vmem:[%s7307_s2 + $0x28] sm:$0xff]  ;;  %v166_v43 = vld [vmem:[%s7307_s2 + $0x20] sm:$0xff] }
 0x140   :  { %v4849_v45 = vadd.f32 %v3661_v57, %v855_v58  ;;  %v1022_v46 = vsel %vm1006_vm0, %v995_v59, 0.0  ;;  %v7363_v58 = vld [vmem:[#allocation9_spill] sm:$0xff]  ;;  %v7364_v59 = vld [vmem:[#allocation8_spill] sm:$0xff] }
 0x141   :  { %v3663_v29 = vpop.f32.mrf.mxu0  ;;  %1023 = vadd.xlane.f32.xlu1 %v1022_v46  ;;  %v3618_v57 = vadd.f32 %v4782_v26, %v7363_v58  ;;  %v874_v49 = vadd.f32 %v3612_v14, %v3548_v20  ;;  %v165_v14 = vld [vmem:[%s7307_s2 + $0x18] sm:$0xff] }
 0x142   :  { %v3664_v62 = vadd.f32 %v3663_v29, %v3662_v44  ;;  %v996_v63 = vmul.f32 %v4849_v45, %v4849_v45  ;;  %v7365_v44 = vld [vmem:[#allocation10_spill] sm:$0xff]  ;;  %v871_v29 = vadd.f32 %v3609_v53, %v3545_v52 }
 0x143   :  { %v3665_v31 = vpop.f32.mrf.mxu0  ;;  %v3557_v46 = vadd.f32 %v7365_v44, %v7364_v59 }
 0x144   :  { %v4858_v32 = vadd.f32 %v3664_v62, %v858_v47  ;;  %v1025_v33 = vsel %vm1006_vm0, %v996_v63, 0.0  ;;  %v4898_v62 = vadd.f32 %v3679_v55, %v879_v22  ;;  %v3682_v63 = vadd.f32 %v3681_v28, %v3680_v24  ;;  %v169_v55 = vld [vmem:[%s7307_s2 + $0x38] sm:$0xff]  ;;  %v164_v22 = vld [vmem:[%s7307_s2 + $0x10] sm:$0xff] }
 0x145   :  { %v3666_v0 = vpop.f32.mrf.mxu0  ;;  %1026 = vadd.xlane.f32.xlu0 %v1025_v33  ;;  %v3685_v33 = vadd.f32 %v3684_v6, %v3683_v50  ;;  %v887_v12 = vadd.f32 %v3621_v34, %v3557_v46  ;;  %3713 = vmatprep.subr.mxu1 %v169_v55 }
 0x146   :  { %v3667_v1 = vadd.f32 %v3666_v0, %v3665_v31  ;;  %v997_v3 = vmul.f32 %v4858_v32, %v4858_v32  ;;  %v882_v0 = vadd.f32 %v3618_v57, %v3554_v11  ;;  %v1002_v50 = vmul.f32 %v4898_v62, %v4898_v62  ;;  %3714 = vmatpush3.msra.mxu1 %v169_v55 }
 0x147   :  { %v3668_v51 = vpop.f32.mrf.mxu0  ;;  %v4913_v38 = vadd.f32 %v3685_v33, %v887_v12 }
 0x148   :  { %v4871_v39 = vadd.f32 %v3667_v1, %v863_v2  ;;  %v1028_v4 = vsel %vm1006_vm0, %v997_v3, 0.0  ;;  %v7366_v1 = vld [vmem:[#allocation11_spill] sm:$0xff]  ;;  %v4909_v28 = vadd.f32 %v3682_v63, %v882_v0 }
 0x149   :  { %v3669_v7 = vpop.f32.mrf.mxu0  ;;  %1029 = vadd.xlane.f32.xlu1 %v1028_v4  ;;  %v3560_v3 = vadd.f32 %v4784_v27, %v7366_v1  ;;  %v3688_v4 = vadd.f32 %v3687_v15, %v3686_v13 }
 0x14a   :  { %v3670_v54 = vadd.f32 %v3669_v7, %v3668_v51  ;;  %v998_v16 = vmul.f32 %v4871_v39, %v4871_v39  ;;  %v3624_v51 = vadd.f32 %v4812_v25, %v4805_v19  ;;  %v1043_v25 = vsel %vm1006_vm0, %v1002_v50, 0.0 }
 0x14b   :  { %v3671_v40 = vpop.f32.mrf.mxu0  ;;  %v1003_v53 = vmul.f32 %v4909_v28, %v4909_v28 }
 0x14c   :  { %v4885_v56 = vadd.f32 %v3670_v54, %v866_v5  ;;  %v1031_v8 = vsel %vm1006_vm0, %v998_v16, 0.0  ;;  %v890_v27 = vadd.f32 %v3624_v51, %v3560_v3  ;;  %v1004_v54 = vmul.f32 %v4913_v38, %v4913_v38 }
 0x14d   :  { %v3672_v47 = vpop.f32.mrf.mxu0  ;;  %1032 = vadd.xlane.f32.xlu0 %v1031_v8  ;;  %v1046_v16 = vsel %vm1006_vm0, %v1003_v53, 0.0  ;;  %v163_v8 = vld [vmem:[%s7307_s2 + $0x8] sm:$0xff] }
 0x14e   :  { %v3673_v60 = vadd.f32 %v3672_v47, %v3671_v40  ;;  %v999_v61 = vmul.f32 %v4885_v56, %v4885_v56  ;;  %v4921_v7 = vadd.f32 %v3688_v4, %v890_v27  ;;  %v1049_v18 = vsel %vm1006_vm0, %v1004_v54, 0.0  ;;  %v168_v40 = vld [vmem:[%s7307_s2 + $0x30] sm:$0xff] }
 0x14f   :  { %v3674_v31 = vpop.f32.mrf.mxu0  ;;  %3715 = vmatprep.subr.mxu1 %v168_v40 }
 0x150   :  { %v4900_v26 = vadd.f32 %v3673_v60, %v871_v29  ;;  %v1034_v48 = vsel %vm1006_vm0, %v999_v61, 0.0  ;;  %v1005_v17 = vmul.f32 %v4921_v7, %v4921_v7  ;;  %3716 = vmatpush3.msra.mxu1 %v168_v40 }
 0x151   :  { %v3675_v2 = vpop.f32.mrf.mxu0  ;;  %1035 = vadd.xlane.f32.xlu1 %v1034_v48  ;;  %3717 = vmatprep.subr.mxu1 %v167_v41 }
 0x152   :  { %v3676_v35 = vadd.f32 %v3675_v2, %v3674_v31  ;;  %v1000_v24 = vmul.f32 %v4900_v26, %v4900_v26  ;;  %v1052_v20 = vsel %vm1006_vm0, %v1005_v17, 0.0  ;;  %3718 = vmatpush3.msra.mxu1 %v167_v41 }
 0x153   :  { %3719 = vmatprep.subr.mxu1 %v166_v43 }
 0x154   :  { %v4915_v5 = vadd.f32 %v3676_v35, %v874_v49  ;;  %v1037_v6 = vsel %vm1006_vm0, %v1000_v24, 0.0  ;;  %3720 = vmatpush3.msra.mxu1 %v166_v43 }
 0x155   :  { %1038 = vadd.xlane.f32.xlu0 %v1037_v6  ;;  %3721 = vmatprep.subr.mxu1 %v165_v14 }
 0x156   :  { %v1001_v19 = vmul.f32 %v4915_v5, %v4915_v5  ;;  %3722 = vmatpush3.msra.mxu1 %v165_v14 }
 0x157   :  { %3723 = vmatprep.subr.mxu1 %v164_v22 }
 0x158   :  { %v1040_v52 = vsel %vm1006_vm0, %v1001_v19, 0.0  ;;  %3724 = vmatpush3.msra.mxu1 %v164_v22 }
 0x159   :  { %1041 = vadd.xlane.f32.xlu1 %v1040_v52  ;;  %1044 = vadd.xlane.f32.xlu0 %v1043_v25 }
 0x15a   :  { %3725 = vmatprep.subr.mxu1 %v163_v8 }
 0x15b   :  { %3726 = vmatpush3.msra.mxu1 %v163_v8 }
 0x15c   :  { %3727 = vmatprep.subr.mxu1 %v162_v10 }
 0x15d   :  { %1047 = vadd.xlane.f32.xlu1 %v1046_v16  ;;  %1050 = vadd.xlane.f32.xlu0 %v1049_v18 }
 0x15e   :  { %3728 = vmatpush3.msra.mxu1 %v162_v10 }
 0x161   :  { %1053 = vadd.xlane.f32.xlu1 %v1052_v20 }
 0x1b6   :  { %v1009_v9 = vpop.xlane.xlu0 %1008 }
 0x1b7   :  { %3889 = vrsqrt.f32 %v1009_v9  ;;  %vm1057_vm1 = vcmp.eq.f32.partialorder %v1009_v9, inf  ;;  %v1060_v46 = vand.u32 2147483648, %v1009_v9  ;;  %vm1059_vm2 = vcmp.eq.f32.partialorder %v1009_v9, 0.0 }
 0x1b8   :  { %v1183_v63 = vmax.f32 %v1009_v9, 1e-30 }
 0x1ba   :  { %v1012_v11 = vpop.xlane.xlu0 %1011 }
 0x1bb   :  { %3891 = vrsqrt.f32 %v1012_v11  ;;  %vm1064_vm3 = vcmp.eq.f32.partialorder %v1012_v11, inf  ;;  %v1067_v31 = vand.u32 2147483648, %v1012_v11  ;;  %vm1066_vm4 = vcmp.eq.f32.partialorder %v1012_v11, 0.0 }
 0x1bc   :  { %v1184_v0 = vmax.f32 %v1012_v11, 1e-30 }
 0x1be   :  { %v4957_v58 = vpop.xlane.xlu1 %1014 }
 0x1bf   :  { %3893 = vrsqrt.f32 %v4957_v58  ;;  %vm1071_vm5 = vcmp.eq.f32.partialorder %v4957_v58, inf  ;;  %v1074_v50 = vand.u32 2147483648, %v4957_v58  ;;  %vm1073_vm6 = vcmp.eq.f32.partialorder %v4957_v58, 0.0 }
 0x1c2   :  { %v4960_v57 = vpop.xlane.xlu1 %1017 }
 0x1c3   :  { %3895 = vrsqrt.f32 %v4960_v57  ;;  %vm1078_vm7 = vcmp.eq.f32.partialorder %v4960_v57, inf  ;;  %v1081_v52 = vand.u32 2147483648, %v4960_v57  ;;  %vm1080_vm8 = vcmp.eq.f32.partialorder %v4960_v57, 0.0 }
 0x1c4   :  { %v3890_v59 = vpop.eup %3889 }
 0x1c5   :  { %v1056_v44 = vmul.f32 %v3890_v59, %v1009_v9  ;;  %v1185_v59 = vmax.f32 %v4957_v58, 1e-30 }
 0x1c6   :  { %v4963_v13 = vpop.xlane.xlu0 %1020 }
 0x1c7   :  { %v1058_v34 = vsel %vm1057_vm1, %v1009_v9, %v1056_v44  ;;  %3897 = vrsqrt.f32 %v4963_v13  ;;  %vm1085_vm9 = vcmp.eq.f32.partialorder %v4963_v13, inf  ;;  %v1088_v44 = vand.u32 2147483648, %v4963_v13 }
 0x1c8   :  { %v3892_v47 = vpop.eup %3891  ;;  %v1061_v29 = vsel %vm1059_vm2, %v1060_v46, %v1058_v34  ;;  %vm1087_vm10 = vcmp.eq.f32.partialorder %v4963_v13, 0.0 }
 0x1c9   :  { %v1167_v60 = vmax.f32 %v1061_v29, 1e-15  ;;  %v1063_v61 = vmul.f32 %v3892_v47, %v1012_v11  ;;  %v1186_v47 = vmax.f32 %v4960_v57, 1e-30 }
 0x1ca   :  { %v4966_v12 = vpop.xlane.xlu1 %1023 }
 0x1cb   :  { %3899 = vtanh.f32 %v1167_v60  ;;  %v1065_v33 = vsel %vm1064_vm3, %v1012_v11, %v1063_v61  ;;  %vm1092_vm11 = vcmp.eq.f32.partialorder %v4966_v12, inf  ;;  %vm1094_vm12 = vcmp.eq.f32.partialorder %v4966_v12, 0.0 }
 0x1cc   :  { %v1068_v48 = vsel %vm1066_vm4, %v1067_v31, %v1065_v33  ;;  %v3894_v15 = vpop.eup %3893  ;;  %3901 = vrsqrt.f32 %v1183_v63  ;;  %v1095_v33 = vand.u32 2147483648, %v4966_v12 }
 0x1cd   :  { %v1168_v49 = vmax.f32 %v1068_v48, 1e-15  ;;  %v1070_v3 = vmul.f32 %v3894_v15, %v4957_v58 }
 0x1ce   :  { %v4969_v2 = vpop.xlane.xlu0 %1026 }
 0x1cf   :  { %3903 = vtanh.f32 %v1168_v49  ;;  %v1072_v24 = vsel %vm1071_vm5, %v4957_v58, %v1070_v3  ;;  %vm1099_vm13 = vcmp.eq.f32.partialorder %v4969_v2, inf  ;;  %v1188_v3 = vmax.f32 %v4966_v12, 1e-30 }
 0x1d0   :  { %3905 = vrsqrt.f32 %v4966_v12  ;;  %v3896_v1 = vpop.eup %3895  ;;  %v4986_v19 = vsel %vm1073_vm6, %v1074_v50, %v1072_v24  ;;  %vm1101_vm14 = vcmp.eq.f32.partialorder %v4969_v2, 0.0 }
 0x1d1   :  { %3907 = vrsqrt.f32 %v1184_v0  ;;  %v1077_v51 = vmul.f32 %v3896_v1, %v4960_v57  ;;  %v1169_v16 = vmax.f32 %v4986_v19, 1e-15 }
 0x1d2   :  { %3909 = vrsqrt.f32 %v4969_v2  ;;  %v4975_v35 = vpop.xlane.xlu1 %1029 }
 0x1d3   :  { %3911 = vrsqrt.f32 %v4975_v35  ;;  %v1079_v25 = vsel %vm1078_vm7, %v4960_v57, %v1077_v51  ;;  %v1102_v51 = vand.u32 2147483648, %v4969_v2  ;;  %vm1106_vm15 = vcmp.eq.f32.partialorder %v4975_v35, inf }
 0x1d4   :  { %v3898_v4 = vpop.eup %3897  ;;  %v4996_v18 = vsel %vm1080_vm8, %v1081_v52, %v1079_v25  ;;  %vm1108_vm1 = vcmp.eq.f32.partialorder %v4975_v35, 0.0 }
 0x1d5   :  { %v1084_v17 = vmul.f32 %v3898_v4, %v4963_v13  ;;  %v1170_v22 = vmax.f32 %v4996_v18, 1e-15 }
 0x1d6   :  { %v4982_v6 = vpop.xlane.xlu0 %1032 }
 0x1d7   :  { %3913 = vrsqrt.f32 %v4982_v6  ;;  %v1086_v9 = vsel %vm1085_vm9, %v4963_v13, %v1084_v17  ;;  %vm1113_vm2 = vcmp.eq.f32.partialorder %v4982_v6, inf  ;;  %vm1115_vm3 = vcmp.eq.f32.partialorder %v4982_v6, 0.0 }
 0x1d8   :  { %v4984_v27 = vpop.eup %3899  ;;  %3915 = vtanh.f32 %v1169_v16 }
 0x1d9   :  { %v1231_v53 = vmul.f32 %v4984_v27, %v1061_v29  ;;  %v4993_v54 = vpop.eup %3901  ;;  %v5022_v29 = vsel %vm1087_vm10, %v1088_v44, %v1086_v9 }
 0x1da   :  { %v5003_v43 = vpop.xlane.xlu1 %1035  ;;  %v1171_v31 = vmax.f32 %v5022_v29, 1e-15  ;;  %v1343_v9 = vmul.f32 %v4993_v54, %v4984_v27 }
 0x1db   :  { %v1247_v55 = vmul.f32 %v4993_v54, %v1231_v53  ;;  %3917 = vrsqrt.f32 %v5003_v43  ;;  %vm1120_vm4 = vcmp.eq.f32.partialorder %v5003_v43, inf  ;;  %v1123_v44 = vand.u32 2147483648, %v5003_v43 }
 0x1dc   :  { %v4999_v20 = vpop.eup %3903  ;;  %vm1122_vm7 = vcmp.eq.f32.partialorder %v5003_v43, 0.0 }
 0x1dd   :  { %v3906_v40 = vpop.eup %3905  ;;  %v1232_v41 = vmul.f32 %v4999_v20, %v1068_v48  ;;  %v5009_v8 = vmax.f32 %v1247_v55, 1e-15  ;;  %v1187_v48 = vmax.f32 %v4963_v13, 1e-30  ;;  %v1189_v13 = vmax.f32 %v4969_v2, 1e-30 }
 0x1de   :  { %v5005_v14 = vpop.eup %3907  ;;  %v1091_v46 = vmul.f32 %v3906_v40, %v4966_v12  ;;  %v5027_v60 = vpop.xlane.xlu0 %1038 }
 0x1df   :  { %v1248_v10 = vmul.f32 %v5005_v14, %v1232_v41  ;;  %v3910_v11 = vpop.eup %3909  ;;  %3919 = vrcp.f32 %v5009_v8  ;;  %vm1279_vm5 = vcmp.gt.f32.partialorder %v5009_v8, 0.99999  ;;  %vm1127_vm8 = vcmp.eq.f32.partialorder %v5027_v60, inf }
 0x1e0   :  { %3921 = vtanh.f32 %v1170_v22  ;;  %v1098_v58 = vmul.f32 %v3910_v11, %v4969_v2  ;;  %v3912_v61 = vpop.eup %3911  ;;  %v1093_v63 = vsel %vm1092_vm11, %v4966_v12, %v1091_v46  ;;  %v1109_v12 = vand.u32 2147483648, %v4975_v35 }
 0x1e1   :  { %v5017_v34 = vmax.f32 %v1248_v10, 1e-15  ;;  %v5038_v0 = vsel %vm1094_vm12, %v1095_v33, %v1093_v63  ;;  %v1105_v1 = vmul.f32 %v3912_v61, %v4975_v35  ;;  %v1116_v22 = vand.u32 2147483648, %v4982_v6 }
 0x1e2   :  { %v5030_v57 = vpop.xlane.xlu1 %1041  ;;  %v1100_v15 = vsel %vm1099_vm13, %v4969_v2, %v1098_v58  ;;  %v1172_v24 = vmax.f32 %v5038_v0, 1e-15  ;;  %v5059_v2 = vpop.xlane.xlu0 %1044  ;;  %vm1129_vm10 = vcmp.eq.f32.partialorder %v5027_v60, 0.0 }
 0x1e3   :  { %3923 = vrcp.f32 %v5017_v34  ;;  %v5048_v50 = vsel %vm1101_vm14, %v1102_v51, %v1100_v15  ;;  %v1107_v25 = vsel %vm1106_vm15, %v4975_v35, %v1105_v1  ;;  %vm1280_vm6 = vcmp.gt.f32.partialorder %v5017_v34, 0.99999 }
 0x1e4   :  { %3925 = vrsqrt.f32 %v1185_v59  ;;  %v3914_v49 = vpop.eup %3913  ;;  %v1173_v16 = vmax.f32 %v5048_v50, 1e-15  ;;  %v5061_v55 = vsel %vm1108_vm1, %v1109_v12, %v1107_v25  ;;  %v1344_v15 = vmul.f32 %v5005_v14, %v4999_v20 }
 0x1e5   :  { %3927 = vrsqrt.f32 %v1186_v47  ;;  %v1112_v4 = vmul.f32 %v3914_v49, %v4982_v6  ;;  %v5053_v52 = vpop.eup %3915  ;;  %v1174_v58 = vmax.f32 %v5061_v55, 1e-15  ;;  %vm1134_vm9 = vcmp.eq.f32.partialorder %v5030_v57, inf }
 0x1e6   :  { %3929 = vrsqrt.f32 %v5027_v60  ;;  %v5073_v46 = vpop.xlane.xlu1 %1047  ;;  %v1233_v33 = vmul.f32 %v5053_v52, %v4986_v19  ;;  %v5087_v49 = vpop.xlane.xlu0 %1050  ;;  %vm1136_vm11 = vcmp.eq.f32.partialorder %v5030_v57, 0.0  ;;  %vm1141_vm12 = vcmp.eq.f32.partialorder %v5059_v2, inf }
 0x1e7   :  { %3931 = vrsqrt.f32 %v5030_v57  ;;  %v1114_v40 = vsel %vm1113_vm2, %v4982_v6, %v1112_v4  ;;  %vm1143_vm13 = vcmp.eq.f32.partialorder %v5059_v2, 0.0  ;;  %vm1148_vm14 = vcmp.eq.f32.partialorder %v5073_v46, inf }
 0x1e8   :  { %3933 = vtanh.f32 %v1171_v31  ;;  %v3918_v53 = vpop.eup %3917  ;;  %v5079_v61 = vsel %vm1115_vm3, %v1116_v22, %v1114_v40  ;;  %v1190_v22 = vmax.f32 %v4975_v35, 1e-30  ;;  %vm1150_vm15 = vcmp.eq.f32.partialorder %v5073_v46, 0.0 }
 0x1e9   :  { %3935 = vrsqrt.f32 %v1187_v48  ;;  %v1119_v59 = vmul.f32 %v3918_v53, %v5003_v43  ;;  %v1175_v51 = vmax.f32 %v5079_v61, 1e-15  ;;  %vm1155_vm1 = vcmp.eq.f32.partialorder %v5087_v49, inf }
 0x1ea   :  { %3937 = vrsqrt.f32 %v1188_v3  ;;  %v5110_v53 = vpop.xlane.xlu1 %1053 }
 0x1eb   :  { %3939 = vrsqrt.f32 %v1189_v13  ;;  %v1121_v19 = vsel %vm1120_vm4, %v5003_v43, %v1119_v59  ;;  %vm1157_vm4 = vcmp.eq.f32.partialorder %v5087_v49, 0.0 }
 0x1ec   :  { %v3920_v17 = vpop.eup %3919  ;;  %3941 = vtanh.f32 %v1172_v24  ;;  %v5107_v14 = vsel %vm1122_vm7, %v1123_v44, %v1121_v19 }
 0x1ed   :  { %v5064_v41 = vpop.eup %3921  ;;  %v1296_v10 = vmul.f32 0.99999, %v3920_v17  ;;  %3943 = vtanh.f32 %v1173_v16  ;;  %v1176_v59 = vmax.f32 %v5107_v14, 1e-15 }
 0x1ee   :  { %3945 = vrsqrt.f32 %v5059_v2  ;;  %v1234_v1 = vmul.f32 %v5064_v41, %v4996_v18 }
 0x1ef   :  { %v1327_v63 = vsel %vm1279_vm5, %v1296_v10, 1.0  ;;  %3947 = vrsqrt.f32 %v5073_v46  ;;  %vm1162_vm5 = vcmp.eq.f32.partialorder %v5110_v53, inf }
 0x1f0   :  { %v3924_v11 = vpop.eup %3923  ;;  %v1359_v54 = vmul.f32 %v1343_v9, %v1327_v63  ;;  %3949 = vtanh.f32 %v1174_v58  ;;  %v1191_v58 = vmax.f32 %v4982_v6, 1e-30  ;;  %v1130_v63 = vand.u32 2147483648, %v5027_v60 }
 0x1f1   :  { %v5076_v47 = vpop.eup %3925  ;;  %v1298_v31 = vmul.f32 0.99999, %v3924_v11  ;;  %3951 = vrsqrt.f32 %v5087_v49 }
 0x1f2   :  { %v5081_v27 = vpop.eup %3927  ;;  %v1375_v13 = vmul.f32 %v1359_v54, %v4788_v23  ;;  %v1249_v25 = vmul.f32 %v5076_v47, %v1233_v33  ;;  %3953 = vtanh.f32 %v1175_v51 }
 0x1f3   :  { %v3930_v48 = vpop.eup %3929  ;;  %v1328_v24 = vsel %vm1280_vm6, %v1298_v31, 1.0  ;;  %v1250_v12 = vmul.f32 %v5081_v27, %v1234_v1  ;;  %v1137_v31 = vand.u32 2147483648, %v5030_v57  ;;  %vm1164_vm6 = vcmp.eq.f32.partialorder %v5110_v53, 0.0 }
 0x1f4   :  { %v3932_v3 = vpop.eup %3931  ;;  %v1360_v4 = vmul.f32 %v1344_v15, %v1328_v24  ;;  %v1126_v18 = vmul.f32 %v3930_v48, %v5027_v60  ;;  %3729 = vmatprep.mubr.msk.f32.mxu1 %vm1006_vm0, %v1375_v13  ;;  %v5113_v17 = vmax.f32 %v1249_v25, 1e-15  ;;  %v1193_v48 = vmax.f32 %v5027_v60, 1e-30 }
 0x1f5   :  { %v5101_v20 = vpop.eup %3933  ;;  %v1133_v23 = vmul.f32 %v3932_v3, %v5030_v57  ;;  %v5118_v10 = vmax.f32 %v1250_v12, 1e-15  ;;  %v1194_v3 = vmax.f32 %v5030_v57, 1e-30  ;;  %v1144_v12 = vand.u32 2147483648, %v5059_v2 }
 0x1f6   :  { %v1376_v16 = vmul.f32 %v1360_v4, %v4798_v37  ;;  %v5115_v40 = vpop.eup %3935  ;;  %3955 = vrcp.f32 %v5113_v17  ;;  %v1235_v37 = vmul.f32 %v5101_v20, %v5022_v29  ;;  %v1128_v35 = vsel %vm1127_vm8, %v5027_v60, %v1126_v18 }
 0x1f7   :  { %v5120_v9 = vpop.eup %3937  ;;  %3957 = vrsqrt.f32 %v5110_v53  ;;  %v1135_v54 = vsel %vm1134_vm9, %v5030_v57, %v1133_v23  ;;  %v1192_v29 = vmax.f32 %v5003_v43, 1e-30  ;;  %v5142_v33 = vsel %vm1129_vm10, %v1130_v63, %v1128_v35 }
 0x1f8   :  { %3730 = vmatmul.mubr.msk.f32.vlgmr.msra.gmra.mxu1 %vm1006_vm0, %v1376_v16  ;;  %v5127_v11 = vpop.eup %3939  ;;  %3959 = vrcp.f32 %v5118_v10  ;;  %v1251_v6 = vmul.f32 %v5115_v40, %v1235_v37  ;;  %v5149_v1 = vsel %vm1136_vm11, %v1137_v31, %v1135_v54  ;;  %v1177_v60 = vmax.f32 %v5142_v33, 1e-15 }
 0x1f9   :  { %v5133_v44 = vpop.eup %3941  ;;  %3961 = vrsqrt.f32 %v1190_v22  ;;  %v1178_v13 = vmax.f32 %v5149_v1, 1e-15  ;;  %v1195_v23 = vmax.f32 %v5059_v2, 1e-30  ;;  %v1158_v31 = vand.u32 2147483648, %v5087_v49 }
 0x1fa   :  { %v5147_v15 = vpop.eup %3943  ;;  %3963 = vtanh.f32 %v1176_v59  ;;  %v1236_v43 = vmul.f32 %v5133_v44, %v5038_v0  ;;  %v5156_v24 = vmax.f32 %v1251_v6, 1e-15  ;;  %v1151_v59 = vand.u32 2147483648, %v5073_v46 }
 0x1fb   :  { %v3946_v51 = vpop.eup %3945  ;;  %3965 = vrsqrt.f32 %v1191_v58  ;;  %v1237_v22 = vmul.f32 %v5147_v15, %v5048_v50  ;;  %vm1281_vm2 = vcmp.gt.f32.partialorder %v5113_v17, 0.99999  ;;  %vm1282_vm3 = vcmp.gt.f32.partialorder %v5118_v10, 0.99999 }
 0x1fc   :  { %v3948_v19 = vpop.eup %3947  ;;  %3967 = vrsqrt.f32 %v1192_v29  ;;  %v1140_v25 = vmul.f32 %v3946_v51, %v5059_v2  ;;  %v1252_v57 = vmul.f32 %v5120_v9, %v1236_v43  ;;  %v1345_v43 = vmul.f32 %v5076_v47, %v5053_v52 }
 0x1fd   :  { %3969 = vrsqrt.f32 %v1193_v48  ;;  %v5158_v4 = vpop.eup %3949  ;;  %v1147_v18 = vmul.f32 %v3948_v19, %v5073_v46  ;;  %v1253_v50 = vmul.f32 %v5127_v11, %v1237_v22  ;;  %v1346_v51 = vmul.f32 %v5081_v27, %v5064_v41 }
 0x1fe   :  { %3971 = vrsqrt.f32 %v1194_v3  ;;  %v3952_v0 = vpop.eup %3951  ;;  %v5168_v16 = vmax.f32 %v1252_v57, 1e-15  ;;  %v1142_v58 = vsel %vm1141_vm12, %v5059_v2, %v1140_v25  ;;  %v1238_v6 = vmul.f32 %v5158_v4, %v5061_v55 }
 0x1ff   :  { %3973 = vrcp.f32 %v5156_v24  ;;  %v5172_v37 = vpop.eup %3953  ;;  %v1154_v63 = vmul.f32 %v3952_v0, %v5087_v49  ;;  %v1149_v29 = vsel %vm1148_vm14, %v5073_v46, %v1147_v18  ;;  %v5207_v47 = vmax.f32 %v1253_v50, 1e-15 }
 0x200   :  { %3975 = vtanh.f32 %v1177_v60  ;;  %v5197_v60 = vsel %vm1143_vm13, %v1144_v12, %v1142_v58  ;;  %v5202_v25 = vsel %vm1150_vm15, %v1151_v59, %v1149_v29  ;;  %v1239_v12 = vmul.f32 %v5172_v37, %v5079_v61 }
 0x201   :  { %3977 = vtanh.f32 %v1178_v13  ;;  %v1156_v52 = vsel %vm1155_vm1, %v5087_v49, %v1154_v63  ;;  %v1179_v22 = vmax.f32 %v5197_v60, 1e-15  ;;  %v1180_v29 = vmax.f32 %v5202_v25, 1e-15 }
 0x202   :  { %3979 = vrcp.f32 %v5168_v16  ;;  %v5222_v63 = vsel %vm1157_vm4, %v1158_v31, %v1156_v52  ;;  %vm1283_vm7 = vcmp.gt.f32.partialorder %v5156_v24, 0.99999  ;;  %vm1284_vm8 = vcmp.gt.f32.partialorder %v5168_v16, 0.99999 }
 0x203   :  { %v3956_v35 = vpop.eup %3955  ;;  %3981 = vrcp.f32 %v5207_v47  ;;  %vm1285_vm9 = vcmp.gt.f32.partialorder %v5207_v47, 0.99999  ;;  %vm1648_vm4 = vcmask 15360  }
 0x204   :  { %v3958_v54 = vpop.eup %3957  ;;  %v1300_v48 = vmul.f32 0.99999, %v3956_v35  ;;  %3983 = vrsqrt.f32 %v1195_v23 }
 0x205   :  { %v3960_v3 = vpop.eup %3959  ;;  %v1161_v2 = vmul.f32 %v3958_v54, %v5110_v53 }
 0x206   :  { %v5193_v19 = vpop.eup %3961  ;;  %v1329_v13 = vsel %vm1281_vm2, %v1300_v48, 1.0  ;;  %v1302_v55 = vmul.f32 0.99999, %v3960_v3 }
 0x207   :  { %v1361_v41 = vmul.f32 %v1345_v43, %v1329_v13  ;;  %v5209_v27 = vpop.eup %3963  ;;  %v1254_v0 = vmul.f32 %v5193_v19, %v1238_v6  ;;  %v1196_v6 = vmax.f32 %v5073_v46, 1e-30  ;;  %v1163_v3 = vsel %vm1162_vm5, %v5110_v53, %v1161_v2 }
 0x208   :  { %v1330_v57 = vsel %vm1282_vm3, %v1302_v55, 1.0  ;;  %v5215_v18 = vpop.eup %3965  ;;  %v1240_v31 = vmul.f32 %v5209_v27, %v5107_v14  ;;  %v1165_v13 = vand.u32 2147483648, %v5110_v53  ;;  %v1197_v2 = vmax.f32 %v5087_v49, 1e-30 }
 0x209   :  { %v1377_v59 = vmul.f32 %v1361_v41, %v4809_v21  ;;  %v1362_v35 = vmul.f32 %v1346_v51, %v1330_v57  ;;  %v5220_v58 = vpop.eup %3967  ;;  %v5225_v50 = vmax.f32 %v1254_v0, 1e-15  ;;  %v1255_v54 = vmul.f32 %v5215_v18, %v1239_v12 }
 0x20a   :  { %v5228_v61 = vpop.eup %3969  ;;  %v1181_v51 = vmax.f32 %v5222_v63, 1e-15  ;;  %v1256_v46 = vmul.f32 %v5220_v58, %v1240_v31  ;;  %v5252_v52 = vsel %vm1164_vm6, %v1165_v13, %v1163_v3  ;;  %v1347_v41 = vmul.f32 %v5115_v40, %v5101_v20 }
 0x20b   :  { %3732 = vmatprep.mubr.msk.f32.mxu1 %vm1006_vm0, %v1377_v59  ;;  %v1378_v21 = vmul.f32 %v1362_v35, %v4820_v30  ;;  %v5236_v48 = vpop.eup %3971  ;;  %3985 = vrcp.f32 %v5225_v50  ;;  %v5244_v30 = vmax.f32 %v1255_v54, 1e-15  ;;  %v1348_v40 = vmul.f32 %v5133_v44, %v5120_v9 }
 0x20c   :  { %v3974_v43 = vpop.eup %3973  ;;  %3987 = vtanh.f32 %v1179_v22  ;;  %v1182_v22 = vmax.f32 %v5252_v52, 1e-15  ;;  %v5260_v59 = vmax.f32 %v1256_v46, 1e-15  ;;  %v1349_v44 = vmul.f32 %v5147_v15, %v5127_v11 }
 0x20d   :  { %3733 = vmatmul.mubr.msk.f32.gmra.mxu1 %vm1006_vm0, %v1378_v21  ;;  %v5246_v55 = vpop.eup %3975  ;;  %v1304_v14 = vmul.f32 0.99999, %v3974_v43  ;;  %3989 = vtanh.f32 %v1180_v29  ;;  %vm1286_vm10 = vcmp.gt.f32.partialorder %v5225_v50, 0.99999  ;;  %v1350_v11 = vmul.f32 %v5193_v19, %v5158_v4 }
 0x20e   :  { %v5250_v23 = vpop.eup %3977  ;;  %3991 = vrcp.f32 %v5244_v30  ;;  %v1241_v35 = vmul.f32 %v5246_v55, %v5142_v33  ;;  %vm1287_vm11 = vcmp.gt.f32.partialorder %v5244_v30, 0.99999  ;;  %vm1288_vm12 = vcmp.gt.f32.partialorder %v5260_v59, 0.99999 }
 0x20f   :  { %v1331_v57 = vsel %vm1283_vm7, %v1304_v14, 1.0  ;;  %3993 = vtanh.f32 %v1181_v51  ;;  %v3980_v12 = vpop.eup %3979  ;;  %v1242_v54 = vmul.f32 %v5250_v23, %v5149_v1 }
 0x210   :  { %v1363_v0 = vmul.f32 %v1347_v41, %v1331_v57  ;;  %3995 = vrsqrt.f32 %v1196_v6  ;;  %v1306_v49 = vmul.f32 0.99999, %v3980_v12  ;;  %v1257_v33 = vmul.f32 %v5228_v61, %v1241_v35  ;;  %v3982_v31 = vpop.eup %3981 }
 0x211   :  { %3997 = vrsqrt.f32 %v1197_v2  ;;  %v1258_v1 = vmul.f32 %v5236_v48, %v1242_v54  ;;  %v1308_v3 = vmul.f32 0.99999, %v3982_v31  ;;  %v5278_v9 = vpop.eup %3983  ;;  %v1351_v35 = vmul.f32 %v5215_v18, %v5172_v37 }
 0x212   :  { %v1379_v20 = vmul.f32 %v1363_v0, %v4831_v36  ;;  %v1332_v29 = vsel %vm1284_vm8, %v1306_v49, 1.0  ;;  %3999 = vrcp.f32 %v5260_v59  ;;  %v1198_v36 = vmax.f32 %v5110_v53, 1e-30 }
 0x213   :  { %4001 = vtanh.f32 %v1182_v22  ;;  %v1364_v21 = vmul.f32 %v1348_v40, %v1332_v29  ;;  %v5276_v43 = vmax.f32 %v1257_v33, 1e-15  ;;  %v5283_v51 = vmax.f32 %v1258_v1, 1e-15 }
 0x214   :  { %3735 = vmatprep.mubr.msk.f32.mxu1 %vm1006_vm0, %v1379_v20  ;;  %v1333_v14 = vsel %vm1285_vm9, %v1308_v3, 1.0 }
 0x215   :  { %v1380_v6 = vmul.f32 %v1364_v21, %v4840_v42  ;;  %4003 = vrcp.f32 %v5276_v43  ;;  %v1365_v42 = vmul.f32 %v1349_v44, %v1333_v14  ;;  %vm1289_vm13 = vcmp.gt.f32.partialorder %v5276_v43, 0.99999 }
 0x216   :  { %4005 = vrsqrt.f32 %v1198_v36  ;;  %v1353_v14 = vmul.f32 %v5246_v55, %v5228_v61  ;;  %vm1290_vm14 = vcmp.gt.f32.partialorder %v5283_v51, 0.99999 }
 0x217   :  { %3736 = vmatmul.mubr.msk.f32.gmra.mxu1 %vm1006_vm0, %v1380_v6  ;;  %v1381_v2 = vmul.f32 %v1365_v42, %v4849_v45  ;;  %4007 = vrcp.f32 %v5283_v51 }
 0x218   :  { %v3986_v13 = vpop.eup %3985 }
 0x219   :  { %v5287_v53 = vpop.eup %3987  ;;  %v1310_v46 = vmul.f32 0.99999, %v3986_v13  ;;  %3738 = vmatprep.mubr.msk.f32.mxu1 %vm1006_vm0, %v1381_v2 }
 0x21a   :  { %v5289_v41 = vpop.eup %3989  ;;  %v1243_v45 = vmul.f32 %v5287_v53, %v5197_v60  ;;  %v1352_v60 = vmul.f32 %v5220_v58, %v5209_v27 }
 0x21b   :  { %v3992_v15 = vpop.eup %3991  ;;  %v1334_v57 = vsel %vm1286_vm10, %v1310_v46, 1.0  ;;  %v1244_v33 = vmul.f32 %v5289_v41, %v5202_v25 }
 0x21c   :  { %v5296_v0 = vpop.eup %3993  ;;  %v1366_v12 = vmul.f32 %v1350_v11, %v1334_v57  ;;  %v1312_v22 = vmul.f32 0.99999, %v3992_v15  ;;  %v1259_v29 = vmul.f32 %v5278_v9, %v1243_v45 }
 0x21d   :  { %v3996_v54 = vpop.eup %3995  ;;  %v1245_v37 = vmul.f32 %v5296_v0, %v5222_v63 }
 0x21e   :  { %v1382_v4 = vmul.f32 %v1366_v12, %v4858_v32  ;;  %v1335_v19 = vsel %vm1287_vm11, %v1312_v22, 1.0  ;;  %v3998_v20 = vpop.eup %3997  ;;  %v5317_v1 = vmax.f32 %v1259_v29, 1e-15  ;;  %v1260_v31 = vmul.f32 %v3996_v54, %v1244_v33 }
 0x21f   :  { %v1367_v49 = vmul.f32 %v1351_v35, %v1335_v19  ;;  %v4000_v40 = vpop.eup %3999  ;;  %v1261_v36 = vmul.f32 %v3998_v20, %v1245_v37  ;;  %v1357_v37 = vmul.f32 %v3998_v20, %v5296_v0 }
 0x220   :  { %3739 = vmatmul.mubr.msk.f32.gmra.mxu1 %vm1006_vm0, %v1382_v4  ;;  %v5311_v18 = vpop.eup %4001  ;;  %v1314_v21 = vmul.f32 0.99999, %v4000_v40  ;;  %4009 = vrcp.f32 %v5317_v1  ;;  %v5323_v3 = vmax.f32 %v1260_v31, 1e-15  ;;  %vm1291_vm15 = vcmp.gt.f32.partialorder %v5317_v1, 0.99999 }
 0x221   :  { %v1383_v32 = vmul.f32 %v1367_v49, %v4871_v39  ;;  %v1246_v63 = vmul.f32 %v5311_v18, %v5252_v52  ;;  %v5325_v44 = vmax.f32 %v1261_v36, 1e-15 }
 0x222   :  { %v1336_v25 = vsel %vm1288_vm12, %v1314_v21, 1.0  ;;  %v4004_v39 = vpop.eup %4003  ;;  %4011 = vrcp.f32 %v5323_v3  ;;  %vm1292_vm1 = vcmp.gt.f32.partialorder %v5323_v3, 0.99999 }
 0x223   :  { %3741 = vmatprep.mubr.msk.f32.mxu1 %vm1006_vm0, %v1383_v32  ;;  %v1368_v6 = vmul.f32 %v1352_v60, %v1336_v25  ;;  %v1316_v58 = vmul.f32 0.99999, %v4004_v39  ;;  %v4006_v13 = vpop.eup %4005  ;;  %4013 = vrcp.f32 %v5325_v44  ;;  %vm1293_vm2 = vcmp.gt.f32.partialorder %v5325_v44, 0.99999 }
 0x224   :  { %v4008_v42 = vpop.eup %4007  ;;  %v1262_v46 = vmul.f32 %v4006_v13, %v1246_v63 }
 0x225   :  { %v1384_v27 = vmul.f32 %v1368_v6, %v4885_v56  ;;  %v1337_v52 = vsel %vm1289_vm13, %v1316_v58, 1.0  ;;  %v1318_v15 = vmul.f32 0.99999, %v4008_v42  ;;  %v1354_v56 = vmul.f32 %v5250_v23, %v5236_v48 }
 0x226   :  { %v1369_v11 = vmul.f32 %v1353_v14, %v1337_v52  ;;  %v5338_v55 = vmax.f32 %v1262_v46, 1e-15  ;;  %v1355_v48 = vmul.f32 %v5287_v53, %v5278_v9 }
 0x227   :  { %3742 = vmatmul.mubr.msk.f32.gmra.mxu1 %vm1006_vm0, %v1384_v27  ;;  %v1338_v57 = vsel %vm1290_vm14, %v1318_v15, 1.0 }
 0x228   :  { %v1385_v2 = vmul.f32 %v1369_v11, %v4900_v26  ;;  %v1370_v61 = vmul.f32 %v1354_v56, %v1338_v57  ;;  %4015 = vrcp.f32 %v5338_v55  ;;  %vm1294_vm3 = vcmp.gt.f32.partialorder %v5338_v55, 0.99999 }
 0x22a   :  { %3744 = vmatprep.mubr.msk.f32.mxu1 %vm1006_vm0, %v1385_v2  ;;  %v1386_v12 = vmul.f32 %v1370_v61, %v4915_v5  ;;  %v1356_v5 = vmul.f32 %v3996_v54, %v5289_v41 }
 0x22c   :  { %3745 = vmatmul.mubr.msk.f32.gmra.mxu1 %vm1006_vm0, %v1386_v12 }
 0x22d   :  { %v4010_v22 = vpop.eup %4009 }
 0x22e   :  { %v1320_v35 = vmul.f32 0.99999, %v4010_v22 }
 0x22f   :  { %v4012_v26 = vpop.eup %4011 }
 0x230   :  { %v1339_v23 = vsel %vm1291_vm15, %v1320_v35, 1.0  ;;  %v1322_v19 = vmul.f32 0.99999, %v4012_v26  ;;  %v4014_v45 = vpop.eup %4013 }
 0x231   :  { %v1371_v4 = vmul.f32 %v1355_v48, %v1339_v23  ;;  %v1324_v29 = vmul.f32 0.99999, %v4014_v45 }
 0x232   :  { %v1340_v40 = vsel %vm1292_vm1, %v1322_v19, 1.0 }
 0x233   :  { %v1387_v49 = vmul.f32 %v1371_v4, %v4898_v62  ;;  %v1372_v33 = vmul.f32 %v1356_v5, %v1340_v40  ;;  %v1341_v9 = vsel %vm1293_vm2, %v1324_v29, 1.0  ;;  %v1358_v62 = vmul.f32 %v4006_v13, %v5311_v18 }
 0x234   :  { %v1373_v32 = vmul.f32 %v1357_v37, %v1341_v9 }
 0x235   :  { %3747 = vmatprep.mubr.msk.f32.mxu1 %vm1006_vm0, %v1387_v49  ;;  %v1388_v53 = vmul.f32 %v1372_v33, %v4909_v28  ;;  %v4016_v21 = vpop.eup %4015 }
 0x236   :  { %v1389_v41 = vmul.f32 %v1373_v32, %v4913_v38  ;;  %v1326_v54 = vmul.f32 0.99999, %v4016_v21 }
 0x237   :  { %3748 = vmatmul.mubr.msk.f32.gmra.mxu1 %vm1006_vm0, %v1388_v53 }
 0x238   :  { %3750 = vmatprep.mubr.msk.f32.mxu1 %vm1006_vm0, %v1389_v41  ;;  %v1342_v60 = vsel %vm1294_vm3, %v1326_v54, 1.0 }
 0x239   :  { %v1374_v0 = vmul.f32 %v1358_v62, %v1342_v60 }
 0x23b   :  { %v1390_v20 = vmul.f32 %v1374_v0, %v4921_v7 }
 0x23d   :  { %3751 = vmatmul.mubr.msk.f32.gmra.mxu1 %vm1006_vm0, %v1390_v20 }
 0x2b8   :  { %v5361_v28 = vpop.f32.mrf.mxu1 }
 0x2b9   :  { %7367 = vst [vmem:[#allocation2_spill] sm:$0xff] %v5361_v28  ;;  %v1601_v31 = vmul.f32 %v5361_v28, %v5361_v28 }
 0x2ba   :  { %v5365_v36 = vpop.f32.mrf.mxu1 }
 0x2bb   :  { %7368 = vst [vmem:[#allocation4_spill] sm:$0xff] %v5365_v36  ;;  %1618 = vadd.xlane.f32.xlu1 %v1601_v31  ;;  %v1600_v38 = vmul.f32 %v5365_v36, %v5365_v36  ;;  %v1652_v18 = vsel %vm1648_vm4, %v1601_v31, 0.0  ;;  %v5442_v31 = vmin.f32 %v5009_v8, 0.99999  ;;  %v5458_v8 = vmin.f32 %v5156_v24, 0.99999 }
 0x2bc   :  { %v5470_v24 = vmin.f32 %v5207_v47, 0.99999 }
 0x2bd   :  { %1616 = vadd.xlane.f32.xlu0 %v1600_v38  ;;  %v1649_v7 = vsel %vm1648_vm4, %v1600_v38, 0.0  ;;  %v5445_v38 = vmin.f32 %v5017_v34, 0.99999 }
 0x2bf   :  { %1653 = vadd.xlane.f32.xlu1 %v1652_v18  ;;  %v5448_v18 = vmin.f32 %v5113_v17, 0.99999  ;;  %4017 = vrcp.f32 %v5445_v38  ;;  %v5463_v17 = vmin.f32 %v5168_v16, 0.99999  ;;  %v1992_v16 = vmul.f32 -0.5, %v5458_v8 }
 0x2c0   :  { %4019 = vrcp.f32 %v5442_v31 }
 0x2c1   :  { %1650 = vadd.xlane.f32.xlu0 %v1649_v7  ;;  %v1953_v7 = vadd.f32 1.0, %v5442_v31 }
 0x2c3   :  { %4021 = vlog2.f32 %v1953_v7 }
 0x2c4   :  { %4023 = vrcp.f32 %v5448_v18 }
 0x2cd   :  { %v5371_v25 = vpop.f32.mrf.mxu1 }
 0x2ce   :  { %7369 = vst [vmem:[#allocation3_spill] sm:$0xff] %v5371_v25  ;;  %v1603_v6 = vmul.f32 %v5371_v25, %v5371_v25 }
 0x2cf   :  { %v5375_v63 = vpop.f32.mrf.mxu1 }
 0x2d0   :  { %7370 = vst [vmem:[#allocation5_spill] sm:$0xff] %v5375_v63  ;;  %1622 = vadd.xlane.f32.xlu1 %v1603_v6  ;;  %v1602_v39 = vmul.f32 %v5375_v63, %v5375_v63  ;;  %v1658_v27 = vsel %vm1648_vm4, %v1603_v6, 0.0  ;;  %v5452_v6 = vmin.f32 %v5118_v10, 0.99999  ;;  %v1974_v10 = vmul.f32 -0.5, %v5448_v18 }
 0x2d2   :  { %1620 = vadd.xlane.f32.xlu0 %v1602_v39  ;;  %v1655_v58 = vsel %vm1648_vm4, %v1602_v39, 0.0  ;;  %v1956_v39 = vmul.f32 -0.5, %v5442_v31  ;;  %v1980_v34 = vadd.f32 1.0, %v5452_v6  ;;  %v1975_v47 = vadd.f32 1.0, %v1974_v10 }
 0x2d4   :  { %1659 = vadd.xlane.f32.xlu1 %v1658_v27  ;;  %v1971_v27 = vadd.f32 1.0, %v5448_v18 }
 0x2d6   :  { %1656 = vadd.xlane.f32.xlu0 %v1655_v58  ;;  %v1983_v58 = vmul.f32 -0.5, %v5452_v6  ;;  %4025 = vlog2.f32 %v1971_v27 }
 0x2d7   :  { %v5381_v13 = vpop.f32.mrf.mxu1  ;;  %4027 = vrcp.f32 %v5452_v6 }
 0x2d8   :  { %7371 = vst [vmem:[#allocation6_spill] sm:$0xff] %v5381_v13  ;;  %v1605_v14 = vmul.f32 %v5381_v13, %v5381_v13  ;;  %4029 = vlog2.f32 %v1980_v34  ;;  %v5531_v34 = vmin.f32 %v5276_v43, 0.99999 }
 0x2d9   :  { %v5385_v42 = vpop.f32.mrf.mxu1  ;;  %4031 = vrcp.f32 %v5458_v8 }
 0x2da   :  { %7372 = vst [vmem:[#allocation7_spill] sm:$0xff] %v5385_v42  ;;  %1626 = vadd.xlane.f32.xlu1 %v1605_v14  ;;  %v1604_v52 = vmul.f32 %v5385_v42, %v5385_v42  ;;  %v1664_v46 = vsel %vm1648_vm4, %v1605_v14, 0.0  ;;  %v1957_v14 = vadd.f32 1.0, %v1956_v39  ;;  %v5611_v13 = vsub.f32 0.0, %v5531_v34 }
 0x2dc   :  { %1624 = vadd.xlane.f32.xlu0 %v1604_v52  ;;  %v1661_v15 = vsel %vm1648_vm4, %v1604_v52, 0.0  ;;  %v1989_v52 = vadd.f32 1.0, %v5458_v8  ;;  %7392 = vst [vmem:[#allocation27_spill] sm:$0xff] %v5611_v13 }
 0x2de   :  { %1665 = vadd.xlane.f32.xlu1 %v1664_v46  ;;  %v1962_v46 = vadd.f32 1.0, %v5445_v38  ;;  %4033 = vlog2.f32 %v1989_v52  ;;  %v5539_v52 = vmin.f32 %v5283_v51, 0.99999 }
 0x2df   :  { %4035 = vrcp.f32 %v5463_v17 }
 0x2e0   :  { %v5390_v11 = vpop.f32.mrf.mxu1  ;;  %1662 = vadd.xlane.f32.xlu0 %v1661_v15  ;;  %v5474_v15 = vsub.f32 0.0, %v5445_v38 }
 0x2e1   :  { %7373 = vst [vmem:[#allocation9_spill] sm:$0xff] %v5390_v11  ;;  %v1607_v56 = vmul.f32 %v5390_v11, %v5390_v11  ;;  %v1965_v11 = vmul.f32 -0.5, %v5445_v38 }
 0x2e2   :  { %v5395_v2 = vpop.f32.mrf.mxu1  ;;  %v2122_v51 = vadd.f32 1.0, %v5474_v15 }
 0x2e3   :  { %7374 = vst [vmem:[#allocation8_spill] sm:$0xff] %v5395_v2  ;;  %1630 = vadd.xlane.f32.xlu1 %v1607_v56  ;;  %v1606_v57 = vmul.f32 %v5395_v2, %v5395_v2  ;;  %v1670_v61 = vsel %vm1648_vm4, %v1607_v56, 0.0  ;;  %v1998_v56 = vadd.f32 1.0, %v5463_v17 }
 0x2e5   :  { %1628 = vadd.xlane.f32.xlu0 %v1606_v57  ;;  %v1667_v22 = vsel %vm1648_vm4, %v1606_v57, 0.0  ;;  %v5480_v57 = vmin.f32 %v5225_v50, 0.99999  ;;  %v5495_v50 = vsub.f32 0.0, %v5452_v6  ;;  %4037 = vlog2.f32 %v1998_v56 }
 0x2e6   :  { %4039 = vrcp.f32 %v5470_v24 }
 0x2e7   :  { %1671 = vadd.xlane.f32.xlu1 %v1670_v61  ;;  %v5400_v12 = vpop.f32.mrf.mxu1  ;;  %v5483_v61 = vsub.f32 0.0, %v5442_v31 }
 0x2e8   :  { %7375 = vst [vmem:[#allocation10_spill] sm:$0xff] %v5400_v12  ;;  %v1609_v35 = vmul.f32 %v5400_v12, %v5400_v12 }
 0x2e9   :  { %1668 = vadd.xlane.f32.xlu0 %v1667_v22  ;;  %v5405_v48 = vpop.f32.mrf.mxu1  ;;  %v1984_v22 = vadd.f32 1.0, %v1983_v58  ;;  %v2113_v42 = vadd.f32 1.0, %v5483_v61 }
 0x2ea   :  { %7376 = vst [vmem:[#allocation11_spill] sm:$0xff] %v5405_v48  ;;  %v1608_v26 = vmul.f32 %v5405_v48, %v5405_v48  ;;  %v1676_v23 = vsel %vm1648_vm4, %v1609_v35, 0.0 }
 0x2eb   :  { %1634 = vadd.xlane.f32.xlu1 %v1609_v35  ;;  %v5487_v35 = vmul.f32 %v1957_v14, %v5442_v31 }
 0x2ec   :  { %v5410_v4 = vpop.f32.mrf.mxu1  ;;  %v1673_v19 = vsel %vm1648_vm4, %v1608_v26, 0.0 }
 0x2ed   :  { %1632 = vadd.xlane.f32.xlu0 %v1608_v26  ;;  %7377 = vst [vmem:[#allocation12_spill] sm:$0xff] %v5410_v4  ;;  %v1611_v45 = vmul.f32 %v5410_v4, %v5410_v4  ;;  %v2001_v26 = vmul.f32 -0.5, %v5463_v17  ;;  %v5595_v4 = vmin.f32 %v5325_v44, 0.99999 }
 0x2ee   :  { %v5415_v5 = vpop.f32.mrf.mxu1 }
 0x2ef   :  { %1677 = vadd.xlane.f32.xlu1 %v1676_v23  ;;  %7378 = vst [vmem:[#allocation13_spill] sm:$0xff] %v5415_v5  ;;  %v1610_v49 = vmul.f32 %v5415_v5, %v5415_v5  ;;  %v1682_v40 = vsel %vm1648_vm4, %v1611_v45, 0.0  ;;  %v2007_v23 = vadd.f32 1.0, %v5470_v24  ;;  %7390 = vst [vmem:[#allocation25_spill] sm:$0xff] %v5595_v4  ;;  %v2082_v63 = vmul.f32 -0.5, %v5595_v4 }
 0x2f1   :  { %1674 = vadd.xlane.f32.xlu0 %v1673_v19  ;;  %v1679_v29 = vsel %vm1648_vm4, %v1610_v49, 0.0  ;;  %v5492_v19 = vsub.f32 0.0, %v5448_v18  ;;  %4041 = vlog2.f32 %v2007_v23 }
 0x2f2   :  { %4043 = vrcp.f32 %v5480_v57 }
 0x2f3   :  { %1638 = vadd.xlane.f32.xlu1 %v1611_v45  ;;  %v5499_v45 = vmin.f32 %v5244_v30, 0.99999  ;;  %v5514_v30 = vsub.f32 0.0, %v5458_v8 }
 0x2f5   :  { %1636 = vadd.xlane.f32.xlu0 %v1610_v49  ;;  %v1993_v49 = vadd.f32 1.0, %v1992_v16  ;;  %v2028_v7 = vmul.f32 -0.5, %v5499_v45 }
 0x2f7   :  { %1683 = vadd.xlane.f32.xlu1 %v1682_v40  ;;  %v5421_v33 = vpop.f32.mrf.mxu1  ;;  %v2010_v40 = vmul.f32 -0.5, %v5470_v24  ;;  %v5528_v39 = vmul.f32 %v1993_v49, %v5458_v8  ;;  %v2029_v23 = vadd.f32 1.0, %v2028_v7  ;;  %v2055_v7 = vmul.f32 -0.5, %v5539_v52 }
 0x2f8   :  { %7379 = vst [vmem:[#allocation14_spill] sm:$0xff] %v5421_v33  ;;  %v1613_v37 = vmul.f32 %v5421_v33, %v5421_v33 }
 0x2f9   :  { %1680 = vadd.xlane.f32.xlu0 %v1679_v29  ;;  %v5425_v9 = vpop.f32.mrf.mxu1  ;;  %v2016_v29 = vadd.f32 1.0, %v5480_v57  ;;  %v2011_v27 = vadd.f32 1.0, %v2010_v40  ;;  %v2056_v2 = vadd.f32 1.0, %v2055_v7 }
 0x2fa   :  { %7380 = vst [vmem:[#allocation15_spill] sm:$0xff] %v5425_v9  ;;  %v1612_v53 = vmul.f32 %v5425_v9, %v5425_v9  ;;  %v1688_v32 = vsel %vm1648_vm4, %v1613_v37, 0.0 }
 0x2fb   :  { %1642 = vadd.xlane.f32.xlu1 %v1613_v37  ;;  %v5504_v37 = vmul.f32 %v1975_v47, %v5448_v18  ;;  %4045 = vlog2.f32 %v2016_v29  ;;  %v5547_v47 = vsub.f32 0.0, %v5470_v24  ;;  %v5558_v40 = vmul.f32 %v2011_v27, %v5470_v24 }
 0x2fc   :  { %v1685_v41 = vsel %vm1648_vm4, %v1612_v53, 0.0  ;;  %4047 = vrcp.f32 %v5499_v45  ;;  %v2043_v29 = vadd.f32 1.0, %v5531_v34  ;;  %v5630_v28 = vmul.f32 %v2056_v2, %v5539_v52 }
 0x2fd   :  { %1640 = vadd.xlane.f32.xlu0 %v1612_v53  ;;  %v5430_v21 = vpop.f32.mrf.mxu1  ;;  %v5507_v53 = vmul.f32 %v1984_v22, %v5452_v6 }
 0x2fe   :  { %7381 = vst [vmem:[#allocation16_spill] sm:$0xff] %v5430_v21  ;;  %v1615_v62 = vmul.f32 %v5430_v21, %v5430_v21  ;;  %v2052_v21 = vadd.f32 1.0, %v5539_v52 }
 0x2ff   :  { %1689 = vadd.xlane.f32.xlu1 %v1688_v32  ;;  %v5433_v54 = vpop.f32.mrf.mxu1  ;;  %v5511_v32 = vmin.f32 %v5260_v59, 0.99999 }
 0x300   :  { %7382 = vst [vmem:[#allocation17_spill] sm:$0xff] %v5433_v54  ;;  %v1614_v60 = vmul.f32 %v5433_v54, %v5433_v54  ;;  %v1694_v0 = vsel %vm1648_vm4, %v1615_v62, 0.0 }
 0x301   :  { %1686 = vadd.xlane.f32.xlu0 %v1685_v41  ;;  %v2002_v41 = vadd.f32 1.0, %v2001_v26  ;;  %v2034_v58 = vadd.f32 1.0, %v5511_v32  ;;  %v2037_v14 = vmul.f32 -0.5, %v5511_v32  ;;  %v5552_v26 = vsub.f32 0.0, %v5480_v57 }
 0x302   :  { %v1691_v20 = vsel %vm1648_vm4, %v1614_v60, 0.0  ;;  %v5588_v33 = vsub.f32 0.0, %v5511_v32 }
 0x303   :  { %1646 = vadd.xlane.f32.xlu1 %v1615_v62  ;;  %v2019_v62 = vmul.f32 -0.5, %v5480_v57  ;;  %v5544_v56 = vmul.f32 %v2002_v41, %v5463_v17 }
 0x305   :  { %1644 = vadd.xlane.f32.xlu0 %v1614_v60  ;;  %v5517_v60 = vpop.eup %4017  ;;  %v2020_v43 = vadd.f32 1.0, %v2019_v62  ;;  %4049 = vlog2.f32 %v1962_v46  ;;  %v5563_v46 = vmin.f32 %v5317_v1, 0.99999  ;;  %v2038_v62 = vadd.f32 1.0, %v2037_v14 }
 0x306   :  { %7383 = vst [vmem:[#allocation18_spill] sm:$0xff] %v5517_v60  ;;  %v5525_v59 = vpop.eup %4019  ;;  %v5577_v1 = vmin.f32 %v5323_v3, 0.99999  ;;  %v5585_v14 = vsub.f32 0.0, %v5499_v45 }
 0x307   :  { %1695 = vadd.xlane.f32.xlu1 %v1694_v0  ;;  %v5520_v0 = vsub.f32 0.0, %v5463_v17  ;;  %7384 = vst [vmem:[#allocation19_spill] sm:$0xff] %v5525_v59  ;;  %v5533_v10 = vpop.eup %4021  ;;  %7387 = vst [vmem:[#allocation22_spill] sm:$0xff] %v5563_v46  ;;  %v5572_v27 = vmul.f32 %v2020_v43, %v5480_v57  ;;  %v2061_v5 = vadd.f32 1.0, %v5563_v46  ;;  %v2064_v3 = vmul.f32 -0.5, %v5563_v46 }
 0x308   :  { %v5541_v16 = vpop.eup %4023 }
 0x309   :  { %1692 = vadd.xlane.f32.xlu0 %v1691_v20  ;;  %v2025_v20 = vadd.f32 1.0, %v5499_v45  ;;  %7385 = vst [vmem:[#allocation20_spill] sm:$0xff] %v5541_v16  ;;  %v5549_v22 = vpop.eup %4025  ;;  %v5638_v16 = vsub.f32 0.0, %v5563_v46 }
 0x30a   :  { %v5555_v49 = vpop.eup %4027 }
 0x30b   :  { %4051 = vlog2.f32 %v2025_v20  ;;  %7386 = vst [vmem:[#allocation21_spill] sm:$0xff] %v5555_v49  ;;  %v5565_v41 = vpop.eup %4029  ;;  %v2046_v20 = vmul.f32 -0.5, %v5531_v34  ;;  %7397 = vst [vmem:[#allocation32_spill] sm:$0xff] %v5638_v16  ;;  %v2125_v16 = vmul.f32 -0.5, %v5474_v15 }
 0x30c   :  { %4053 = vrcp.f32 %v5511_v32  ;;  %v5569_v54 = vpop.eup %4031 }
 0x30d   :  { %4055 = vlog2.f32 %v2034_v58  ;;  %7388 = vst [vmem:[#allocation23_spill] sm:$0xff] %v5569_v54  ;;  %v5579_v9 = vpop.eup %4033  ;;  %v5582_v58 = vmul.f32 %v2029_v23, %v5499_v45  ;;  %v5600_v23 = vmul.f32 %v2038_v62, %v5511_v32  ;;  %v2047_v12 = vadd.f32 1.0, %v2046_v20 }
 0x30e   :  { %4057 = vrcp.f32 %v5531_v34  ;;  %v5590_v43 = vpop.eup %4035  ;;  %v2070_v62 = vadd.f32 1.0, %v5577_v1  ;;  %v5616_v20 = vmin.f32 %v5338_v55, 0.99999  ;;  %v2079_v55 = vadd.f32 1.0, %v5595_v4 }
 0x30f   :  { %4059 = vlog2.f32 %v2122_v51  ;;  %7389 = vst [vmem:[#allocation24_spill] sm:$0xff] %v5590_v43  ;;  %v5597_v48 = vpop.eup %4037  ;;  %v5627_v36 = vmul.f32 %v2047_v12, %v5531_v34  ;;  %v1966_v43 = vadd.f32 1.0, %v1965_v11  ;;  %v5641_v12 = vsub.f32 0.0, %v5577_v1 }
 0x310   :  { %4061 = vlog2.f32 %v2043_v29  ;;  %v5603_v51 = vpop.eup %4039  ;;  %v2073_v29 = vmul.f32 -0.5, %v5577_v1  ;;  %7393 = vst [vmem:[#allocation28_spill] sm:$0xff] %v5616_v20  ;;  %v2091_v2 = vmul.f32 -0.5, %v5616_v20  ;;  %v5651_v11 = vsub.f32 0.0, %v5595_v4 }
 0x311   :  { %4063 = vrcp.f32 %v5539_v52  ;;  %7391 = vst [vmem:[#allocation26_spill] sm:$0xff] %v5603_v51  ;;  %v5608_v44 = vpop.eup %4041  ;;  %v2065_v51 = vadd.f32 1.0, %v2064_v3  ;;  %7395 = vst [vmem:[#allocation30_spill] sm:$0xff] %v5627_v36 }
 0x312   :  { %4065 = vlog2.f32 %v2052_v21  ;;  %v5618_v7 = vpop.eup %4043  ;;  %v5621_v21 = vsub.f32 0.0, %v5539_v52  ;;  %v2074_v54 = vadd.f32 1.0, %v2073_v29  ;;  %7398 = vst [vmem:[#allocation33_spill] sm:$0xff] %v5641_v12  ;;  %7400 = vst [vmem:[#allocation35_spill] sm:$0xff] %v5651_v11  ;;  %v2092_v11 = vadd.f32 1.0, %v2091_v2 }
 0x313   :  { %4067 = vrcp.f32 %v5563_v46  ;;  %7394 = vst [vmem:[#allocation29_spill] sm:$0xff] %v5618_v7  ;;  %v5624_v25 = vpop.eup %4045  ;;  %v5647_v36 = vmul.f32 %v2065_v51, %v5563_v46  ;;  %v2116_v12 = vmul.f32 -0.5, %v5483_v61  ;;  %v1959_v2 = vand.u32 2147483647, %v5442_v31 }
 0x314   :  { %4069 = vlog2.f32 %v2061_v5  ;;  %v5634_v7 = vpop.eup %4047  ;;  %v2140_v5 = vadd.f32 1.0, %v5495_v50  ;;  %v5661_v51 = vmul.f32 %v2074_v54, %v5577_v1  ;;  %v5674_v54 = vsub.f32 0.0, %v5616_v20 }
 0x315   :  { %4071 = vrcp.f32 %v5577_v1  ;;  %7396 = vst [vmem:[#allocation31_spill] sm:$0xff] %v5634_v7  ;;  %v4050_v3 = vpop.eup %4049  ;;  %7399 = vst [vmem:[#allocation34_spill] sm:$0xff] %v5647_v36  ;;  %v1968_v7 = vand.u32 2147483647, %v5445_v38  ;;  %v2117_v31 = vadd.f32 1.0, %v2116_v12  ;;  %v2134_v12 = vmul.f32 -0.5, %v5492_v19 }
 0x316   :  { %4073 = vlog2.f32 %v2113_v42  ;;  %v2083_v42 = vadd.f32 1.0, %v2082_v63  ;;  %7402 = vst [vmem:[#allocation37_spill] sm:$0xff] %v5661_v51  ;;  %v1964_v36 = vmul.f32 0.6931472, %v4050_v3  ;;  %v2131_v63 = vadd.f32 1.0, %v5492_v19  ;;  %7405 = vst [vmem:[#allocation40_spill] sm:$0xff] %v5674_v54 }
 0x317   :  { %4075 = vlog2.f32 %v2070_v62  ;;  %v2088_v62 = vadd.f32 1.0, %v5616_v20  ;;  %vm5679_vm0 = vcmp.lt.f32.partialorder %v1968_v7, 0.0004427343  ;;  %v5695_v7 = vmul.f32 %v2092_v11, %v5616_v20 }
 0x318   :  { %v5644_v49 = vpop.eup %4051  ;;  %4077 = vrcp.f32 %v5595_v4  ;;  %v5670_v60 = vmul.f32 %v2083_v42, %v5595_v4  ;;  %v2119_v4 = vand.u32 2147483647, %v5483_v61  ;;  %vm5709_vm6 = vcmp.lt.f32.partialorder %v1959_v2, 0.0004427343 }
 0x319   :  { %v5653_v29 = vpop.eup %4053  ;;  %4079 = vlog2.f32 %v2079_v55  ;;  %v1967_v55 = vmul.f32 %v1966_v43, %v5445_v38  ;;  %v2126_v43 = vadd.f32 1.0, %v2125_v16  ;;  %7409 = vst [vmem:[#allocation42_spill] sm:$0xff] %v5695_v7  ;;  %v2135_v16 = vadd.f32 1.0, %v2134_v12 }
 0x31a   :  { %7401 = vst [vmem:[#allocation36_spill] sm:$0xff] %v5653_v29  ;;  %v5658_v59 = vpop.eup %4055  ;;  %4081 = vlog2.f32 %v2140_v5  ;;  %v2128_v29 = vand.u32 2147483647, %v5474_v15  ;;  %7404 = vst [vmem:[#allocation39_spill] sm:$0xff] %v5670_v60  ;;  %v2158_v5 = vadd.f32 1.0, %v5520_v0 }
 0x31b   :  { %v5664_v46 = vpop.eup %4057  ;;  %4083 = vrcp.f32 %v5616_v20  ;;  %v1970_v42 = vsel %vm5679_vm0, %v1967_v55, %v1964_v36  ;;  %v5689_v60 = vmul.f32 0.6931472, %v5533_v10  ;;  %v1986_v36 = vand.u32 2147483647, %v5452_v6 }
 0x31c   :  { %7403 = vst [vmem:[#allocation38_spill] sm:$0xff] %v5664_v46  ;;  %v4060_v13 = vpop.eup %4059  ;;  %4085 = vlog2.f32 %v2088_v62  ;;  %vm5697_vm5 = vcmp.lt.f32.partialorder %v2128_v29, 0.0004427343  ;;  %v2143_v10 = vmul.f32 -0.5, %v5495_v50  ;;  %v2127_v11 = vmul.f32 %v2126_v43, %v5474_v15 }
 0x31d   :  { %v5677_v3 = vpop.eup %4061  ;;  %4087 = vlog2.f32 %v2131_v63  ;;  %v2124_v62 = vmul.f32 0.6931472, %v4060_v13  ;;  %v2149_v63 = vadd.f32 1.0, %v5514_v30  ;;  %v5714_v29 = vmul.f32 0.6931472, %v5565_v41 }
 0x31e   :  { %v5684_v46 = vpop.eup %4063  ;;  %4089 = vlog2.f32 %v2158_v5  ;;  %v1961_v6 = vsel %vm5709_vm6, %v5487_v35, %v5689_v60  ;;  %vm5723_vm7 = vcmp.lt.f32.partialorder %v2119_v4, 0.0004427343  ;;  %v2146_v15 = vand.u32 2147483647, %v5495_v50 }
 0x31f   :  { %7408 = vst [vmem:[#allocation41_spill] sm:$0xff] %v5684_v46  ;;  %v5692_v54 = vpop.eup %4065  ;;  %v1977_v43 = vand.u32 2147483647, %v5448_v18  ;;  %v2130_v41 = vsel %vm5697_vm5, %v2127_v11, %v2124_v62  ;;  %v2161_v13 = vmul.f32 -0.5, %v5520_v0  ;;  %vm5738_vm8 = vcmp.lt.f32.partialorder %v1986_v36, 0.0004427343 }
 0x320   :  { %v5701_v46 = vpop.eup %4067  ;;  %v2144_v60 = vadd.f32 1.0, %v2143_v10  ;;  %v2004_v18 = vand.u32 2147483647, %v5463_v17  ;;  %4091 = vlog2.f32 %v2149_v63  ;;  %v2258_v36 = vsub.f32 %v1970_v42, %v2130_v41  ;;  %v7454_v10 = vld [vmem:[#allocation27_spill] sm:$0xff] }
 0x321   :  { %7412 = vst [vmem:[#allocation43_spill] sm:$0xff] %v5701_v46  ;;  %v5706_v55 = vpop.eup %4069  ;;  %v2118_v46 = vmul.f32 %v2117_v31, %v5483_v61  ;;  %v2137_v61 = vand.u32 2147483647, %v5492_v19  ;;  %v2176_v31 = vadd.f32 1.0, %v5552_v26  ;;  %vm5752_vm9 = vcmp.lt.f32.partialorder %v2146_v15, 0.0004427343 }
 0x322   :  { %v5717_v38 = vpop.eup %4071  ;;  %vm5756_vm10 = vcmp.lt.f32.partialorder %v1977_v43, 0.0004427343  ;;  %v1995_v42 = vand.u32 2147483647, %v5458_v8  ;;  %v2145_v15 = vmul.f32 %v2144_v60, %v5495_v50  ;;  %vm5771_vm11 = vcmp.lt.f32.partialorder %v2004_v18, 0.0004427343 }
 0x323   :  { %7415 = vst [vmem:[#allocation44_spill] sm:$0xff] %v5717_v38  ;;  %v4074_v2 = vpop.eup %4073  ;;  %v5733_v38 = vmul.f32 0.6931472, %v5549_v22  ;;  %v5747_v22 = vmul.f32 0.6931472, %v5597_v48  ;;  %v1988_v48 = vsel %vm5738_vm8, %v5507_v53, %v5714_v29  ;;  %v2152_v41 = vmul.f32 -0.5, %v5514_v30 }
 0x324   :  { %v5736_v35 = vpop.eup %4075  ;;  %v2115_v20 = vmul.f32 0.6931472, %v4074_v2  ;;  %v2136_v29 = vmul.f32 %v2135_v16, %v5492_v19  ;;  %vm5779_vm12 = vcmp.lt.f32.partialorder %v2137_v61, 0.0004427343  ;;  %4093 = vlog2.f32 %v2176_v31 }
 0x325   :  { %v5743_v7 = vpop.eup %4077  ;;  %v1979_v43 = vsel %vm5756_vm10, %v5504_v37, %v5733_v38  ;;  %v2006_v50 = vsel %vm5771_vm11, %v5544_v56, %v5747_v22  ;;  %v5788_v37 = vmul.f32 0.6931472, %v5579_v9  ;;  %vm5801_vm14 = vcmp.lt.f32.partialorder %v1995_v42, 0.0004427343 }
 0x326   :  { %7420 = vst [vmem:[#allocation45_spill] sm:$0xff] %v5743_v7  ;;  %v5750_v11 = vpop.eup %4079  ;;  %v2162_v7 = vadd.f32 1.0, %v2161_v13  ;;  %v5792_v13 = vmul.f32 0.5, %v2258_v36  ;;  %v2121_v19 = vsel %vm5723_vm7, %v2118_v46, %v2115_v20  ;;  %v2155_v31 = vand.u32 2147483647, %v5514_v30 }
 0x327   :  { %7421 = vst [vmem:[#allocation46_spill] sm:$0xff] %v5750_v11  ;;  %v4082_v63 = vpop.eup %4081  ;;  %v2164_v11 = vand.u32 2147483647, %v5520_v0  ;;  %v2153_v20 = vadd.f32 1.0, %v2152_v41  ;;  %v2022_v36 = vand.u32 2147483647, %v5480_v57 }
 0x328   :  { %v5776_v4 = vpop.eup %4083  ;;  %v2142_v18 = vmul.f32 0.6931472, %v4082_v63  ;;  %v2163_v17 = vmul.f32 %v2162_v7, %v5520_v0  ;;  %v2257_v7 = vsub.f32 %v1961_v6, %v2121_v19  ;;  %v2179_v63 = vmul.f32 -0.5, %v5552_v26 }
 0x329   :  { %7428 = vst [vmem:[#allocation47_spill] sm:$0xff] %v5776_v4  ;;  %v5790_v38 = vpop.eup %4085  ;;  %vm5797_vm13 = vcmp.lt.f32.partialorder %v2164_v11, 0.0004427343  ;;  %v1997_v11 = vsel %vm5801_vm14, %v5528_v39, %v5788_v37  ;;  %v2167_v42 = vadd.f32 1.0, %v5547_v47  ;;  %v2170_v41 = vmul.f32 -0.5, %v5547_v47 }
 0x32a   :  { %v4088_v16 = vpop.eup %4087  ;;  %vm5824_vm15 = vcmp.lt.f32.partialorder %v2155_v31, 0.0004427343  ;;  %v2182_v39 = vand.u32 2147483647, %v5552_v26  ;;  %v2194_v37 = vadd.f32 1.0, %v5588_v33  ;;  %v2154_v19 = vmul.f32 %v2153_v20, %v5514_v30 }
 0x32b   :  { %v4090_v0 = vpop.eup %4089  ;;  %vm5832_vm1 = vcmp.lt.f32.partialorder %v2022_v36, 0.0004427343  ;;  %v2180_v9 = vadd.f32 1.0, %v2179_v63  ;;  %v2171_v31 = vadd.f32 1.0, %v2170_v41  ;;  %v2197_v30 = vmul.f32 -0.5, %v5588_v33 }
 0x32c   :  { %vm5856_vm3 = vcmp.lt.f32.partialorder %v2182_v39, 0.0004427343  ;;  %v2185_v36 = vadd.f32 1.0, %v5585_v14  ;;  %v5868_v4 = vmul.f32 0.6931472, %v5658_v59 }
 0x32d   :  { %v2181_v63 = vmul.f32 %v2180_v9, %v5552_v26  ;;  %v2198_v41 = vadd.f32 1.0, %v2197_v30  ;;  %v2200_v59 = vand.u32 2147483647, %v5588_v33  ;;  %v2031_v39 = vand.u32 2147483647, %v5499_v45 }
 0x32e   :  { %v2191_v6 = vand.u32 2147483647, %v5585_v14 }
 0x32f   :  { %v5900_v45 = vmul.f32 %v2198_v41, %v5588_v33  ;;  %vm5907_vm5 = vcmp.lt.f32.partialorder %v2031_v39, 0.0004427343  ;;  %vm5937_vm10 = vcmp.lt.f32.partialorder %v2200_v59, 0.0004427343 }
 0x344   :  { %v1619_v62 = vpop.xlane.xlu1 %1618 }
 0x346   :  { %v1617_v12 = vpop.xlane.xlu0 %1616 }
 0x348   :  { %v1654_v53 = vpop.xlane.xlu1 %1653 }
 0x349   :  { %v1698_v60 = vsub.f32 %v1619_v62, %v1654_v53  ;;  %v5807_v62 = vmul.f32 0.6931472, %v5624_v25  ;;  %v2148_v25 = vsel %vm5752_vm9, %v2145_v15, %v2142_v18  ;;  %v2013_v53 = vand.u32 2147483647, %v5470_v24  ;;  %v4092_v18 = vpop.eup %4091 }
 0x34a   :  { %v1651_v61 = vpop.xlane.xlu0 %1650  ;;  %v5837_v15 = vmul.f32 0.6931472, %v5608_v44  ;;  %v2151_v8 = vmul.f32 0.6931472, %v4092_v18 }
 0x34b   :  { %v5809_v5 = vmax.f32 %v1698_v60, 0.0  ;;  %v1697_v46 = vsub.f32 %v1617_v12, %v1651_v61  ;;  %v2133_v12 = vmul.f32 0.6931472, %v4088_v16  ;;  %v2160_v60 = vmul.f32 0.6931472, %v4090_v0 }
 0x34c   :  { %v5839_v16 = vmul.f32 0.5, %v2257_v7  ;;  %v2260_v61 = vsub.f32 %v1988_v48, %v2148_v25  ;;  %v2024_v44 = vsel %vm5832_vm1, %v5572_v27, %v5807_v62  ;;  %vm5849_vm2 = vcmp.lt.f32.partialorder %v2013_v53, 0.0004427343 }
 0x34d   :  { %4095 = vrsqrt.f32 %v5809_v5  ;;  %v5822_v57 = vmax.f32 %v1697_v46, 0.0  ;;  %v2139_v24 = vsel %vm5779_vm12, %v2136_v29, %v2133_v12  ;;  %v2040_v48 = vand.u32 2147483647, %v5511_v32 }
 0x34e   :  { %4097 = vlog2.f32 %v2167_v42  ;;  %v2166_v20 = vsel %vm5797_vm13, %v2163_v17, %v2160_v60  ;;  %v2188_v0 = vmul.f32 -0.5, %v5585_v14  ;;  %v2259_v7 = vsub.f32 %v1979_v43, %v2139_v24  ;;  %v4094_v17 = vpop.eup %4093 }
 0x34f   :  { %4099 = vrsqrt.f32 %v5822_v57  ;;  %v2015_v32 = vsel %vm5849_vm2, %v5558_v40, %v5837_v15  ;;  %v5870_v42 = vmul.f32 0.5, %v2260_v61  ;;  %v5873_v25 = vmul.f32 %v2171_v31, %v5547_v47  ;;  %v7464_v40 = vld [vmem:[#allocation30_spill] sm:$0xff] }
 0x350   :  { %4101 = vlog2.f32 %v2194_v37  ;;  %v2173_v12 = vand.u32 2147483647, %v5547_v47  ;;  %v2262_v26 = vsub.f32 %v2006_v50, %v2166_v20  ;;  %vm5881_vm0 = vcmp.lt.f32.partialorder %v2040_v48, 0.0004427343 }
 0x351   :  { %v2157_v53 = vsel %vm5824_vm15, %v2154_v19, %v2151_v8  ;;  %v5890_v47 = vmul.f32 0.6931472, %v5644_v49  ;;  %4103 = vlog2.f32 %v2185_v36  ;;  %v2189_v2 = vadd.f32 1.0, %v2188_v0  ;;  %v7491_v8 = vld [vmem:[#allocation20_spill] sm:$0xff] }
 0x352   :  { %v5892_v37 = vmul.f32 0.5, %v2259_v7  ;;  %v2178_v56 = vmul.f32 0.6931472, %v4094_v17  ;;  %v2042_v22 = vsel %vm5881_vm0, %v5600_v23, %v5868_v4  ;;  %v2058_v50 = vand.u32 2147483647, %v5539_v52 }
 0x353   :  { %v2212_v49 = vadd.f32 1.0, %v5621_v21  ;;  %v2215_v60 = vmul.f32 -0.5, %v5621_v21  ;;  %v5905_v18 = vmul.f32 0.5, %v2262_v26  ;;  %v2261_v61 = vsub.f32 %v1997_v11, %v2157_v53 }
 0x354   :  { %v5912_v24 = vmul.f32 0.6931472, %v5692_v54  ;;  %vm5915_vm6 = vcmp.lt.f32.partialorder %v2173_v12, 0.0004427343  ;;  %v2033_v30 = vsel %vm5907_vm5, %v5582_v58, %v5890_v47  ;;  %v5924_v11 = vmul.f32 %v2189_v2, %v5585_v14 }
 0x355   :  { %v2218_v48 = vand.u32 2147483647, %v5621_v21  ;;  %vm1738_vm7 = vcmp.eq.f32.partialorder %v5809_v5, inf  ;;  %v1741_v54 = vand.u32 2147483648, %v5809_v5  ;;  %v2184_v20 = vsel %vm5856_vm3, %v2181_v63, %v2178_v56 }
 0x356   :  { %vm5931_vm8 = vcmp.lt.f32.partialorder %v2058_v50, 0.0004427343  ;;  %vm1740_vm9 = vcmp.eq.f32.partialorder %v5809_v5, 0.0  ;;  %4105 = vlog2.f32 %v2212_v49  ;;  %v2216_v17 = vadd.f32 1.0, %v2215_v60 }
 0x357   :  { %v5943_v63 = vmul.f32 0.5, %v2261_v61  ;;  %v2060_v41 = vsel %vm5931_vm8, %v5630_v28, %v5912_v24  ;;  %v5950_v26 = vmul.f32 0.6931472, %v5677_v3  ;;  %v2264_v56 = vsub.f32 %v2024_v44, %v2184_v20 }
 0x358   :  { %v2049_v50 = vand.u32 2147483647, %v5531_v34  ;;  %vm1731_vm11 = vcmp.eq.f32.partialorder %v5822_v57, inf  ;;  %v1734_v49 = vand.u32 2147483648, %v5822_v57  ;;  %vm1733_vm12 = vcmp.eq.f32.partialorder %v5822_v57, 0.0 }
 0x359   :  { %v1623_v52 = vpop.xlane.xlu1 %1622  ;;  %vm5969_vm13 = vcmp.lt.f32.partialorder %v2191_v6, 0.0004427343  ;;  %v2209_v6 = vand.u32 2147483647, %v7454_v10  ;;  %v6006_v7 = vmul.f32 0.6931472, %v5736_v35 }
 0x35a   :  { %v4096_v19 = vpop.eup %4095  ;;  %vm5993_vm14 = vcmp.lt.f32.partialorder %v2049_v50, 0.0004427343  ;;  %v6020_v15 = vmul.f32 0.6931472, %v5706_v55  ;;  %vm6049_vm2 = vcmp.lt.f32.partialorder %v2218_v48, 0.0004427343 }
 0x35b   :  { %v1737_v33 = vmul.f32 %v4096_v19, %v5809_v5  ;;  %v4098_v36 = vpop.eup %4097  ;;  %v1621_v14 = vpop.xlane.xlu0 %1620  ;;  %v7453_v19 = vld [vmem:[#allocation18_spill] sm:$0xff]  ;;  %v2051_v35 = vsel %vm5993_vm14, %v7464_v40, %v5950_v26  ;;  %v7474_v48 = vld [vmem:[#allocation40_spill] sm:$0xff]  ;;  %v1857_v58 = vmax.f32 %v5822_v57, 1e-30  ;;  %vm6075_vm3 = vcmp.lt.f32.partialorder %v2209_v6, 0.0004427343 }
 0x35c   :  { %v4100_v12 = vpop.eup %4099  ;;  %v2169_v3 = vmul.f32 0.6931472, %v4098_v36  ;;  %7461 = vst [vmem:[#allocation18_spill] sm:$0xff] %v6006_v7  ;;  %7465 = vst [vmem:[#allocation27_spill] sm:$0xff] %v6020_v15 }
 0x35d   :  { %v1739_v0 = vsel %vm1738_vm7, %v5809_v5, %v1737_v33  ;;  %v4102_v59 = vpop.eup %4101  ;;  %v1730_v53 = vmul.f32 %v4100_v12, %v5822_v57  ;;  %v1660_v2 = vpop.xlane.xlu1 %1659  ;;  %v5975_v12 = vmul.f32 %v2216_v17, %v5621_v21  ;;  %v7488_v21 = vld [vmem:[#allocation21_spill] sm:$0xff] }
 0x35e   :  { %v1742_v29 = vsel %vm1740_vm9, %v1741_v54, %v1739_v0  ;;  %v1700_v60 = vsub.f32 %v1623_v52, %v1660_v2  ;;  %v2203_v0 = vadd.f32 1.0, %v7454_v10  ;;  %v2196_v44 = vmul.f32 0.6931472, %v4102_v59  ;;  %v7457_v59 = vld [vmem:[#allocation33_spill] sm:$0xff]  ;;  %v7458_v2 = vld [vmem:[#allocation19_spill] sm:$0xff] }
 0x35f   :  { %v1842_v39 = vmax.f32 %v1742_v29, 1e-15  ;;  %v1732_v33 = vsel %vm1731_vm11, %v5822_v57, %v1730_v53  ;;  %v1657_v54 = vpop.xlane.xlu0 %1656  ;;  %v2206_v29 = vmul.f32 -0.5, %v7454_v10  ;;  %v2230_v53 = vadd.f32 1.0, %v7457_v59 }
 0x360   :  { %v1735_v27 = vsel %vm1733_vm12, %v1734_v49, %v1732_v33  ;;  %v5967_v62 = vmax.f32 %v1700_v60, 0.0  ;;  %v1699_v34 = vsub.f32 %v1621_v14, %v1657_v54  ;;  %v2175_v14 = vsel %vm5915_vm6, %v5873_v25, %v2169_v3 }
 0x361   :  { %v1892_v61 = vmul.f32 %v7453_v19, %v1842_v39  ;;  %v1841_v36 = vmax.f32 %v1735_v27, 1e-15  ;;  %v4104_v39 = vpop.eup %4103  ;;  %v2233_v17 = vmul.f32 -0.5, %v7457_v59  ;;  %v5988_v60 = vmul.f32 0.5, %v2264_v56  ;;  %v7462_v56 = vld [vmem:[#allocation22_spill] sm:$0xff] }
 0x362   :  { %4107 = vrsqrt.f32 %v5967_v62  ;;  %v5985_v49 = vmax.f32 %v1699_v34, 0.0  ;;  %v2202_v19 = vsel %vm5937_vm10, %v5900_v45, %v2196_v44  ;;  %v2187_v3 = vmul.f32 0.6931472, %v4104_v39 }
 0x363   :  { %v2290_v52 = vmul.f32 %v5792_v13, %v1892_v61  ;;  %v1890_v13 = vmul.f32 %v7458_v2, %v1841_v36  ;;  %v2207_v61 = vadd.f32 1.0, %v2206_v29  ;;  %v2076_v33 = vand.u32 2147483647, %v5577_v1  ;;  %v1627_v54 = vpop.xlane.xlu1 %1626  ;;  %v4106_v46 = vpop.eup %4105 }
 0x364   :  { %v2263_v45 = vsub.f32 %v2015_v32, %v2175_v14  ;;  %v2067_v50 = vand.u32 2147483647, %v7462_v56  ;;  %v2266_v1 = vsub.f32 %v2042_v22, %v2202_v19  ;;  %v2193_v23 = vsel %vm5969_vm13, %v5924_v11, %v2187_v3 }
 0x365   :  { %4109 = vtanh.f32 %v2290_v52  ;;  %v2289_v25 = vmul.f32 %v5839_v16, %v1890_v13  ;;  %v2234_v16 = vadd.f32 1.0, %v2233_v17  ;;  %v1625_v34 = vpop.xlane.xlu0 %1624  ;;  %v6027_v4 = vmul.f32 %v2207_v61, %v7454_v10 }
 0x366   :  { %4111 = vlog2.f32 %v2203_v0  ;;  %v7463_v0 = vld [vmem:[#allocation32_spill] sm:$0xff]  ;;  %vm6029_vm15 = vcmp.lt.f32.partialorder %v2076_v33, 0.0004427343  ;;  %v2236_v22 = vand.u32 2147483647, %v7457_v59  ;;  %v6035_v55 = vmul.f32 0.5, %v2263_v45 }
 0x367   :  { %4113 = vrsqrt.f32 %v5985_v49  ;;  %v2224_v27 = vmul.f32 -0.5, %v7463_v0  ;;  %v2221_v32 = vadd.f32 1.0, %v7463_v0  ;;  %v1858_v44 = vmax.f32 %v5809_v5, 1e-30  ;;  %v1666_v52 = vpop.xlane.xlu1 %1665 }
 0x368   :  { %4115 = vtanh.f32 %v2289_v25  ;;  %vm6041_vm1 = vcmp.lt.f32.partialorder %v2067_v50, 0.0004427343  ;;  %v7468_v11 = vmov 0  ;;  %v1702_v10 = vsub.f32 %v1627_v54, %v1666_v52 }
 0x369   :  { %4117 = vlog2.f32 %v2230_v53  ;;  %v7469_v11 = vsel %vm6041_vm1, 4294967295, %v7468_v11  ;;  %v6045_v36 = vmul.f32 0.5, %v2266_v1  ;;  %v6054_v39 = vmul.f32 %v2234_v16, %v7457_v59  ;;  %v1663_v53 = vpop.xlane.xlu0 %1662 }
 0x36a   :  { %7470 = vst [vmem:[#allocation33_spill] sm:$0xff] %v7469_v11  ;;  %v2225_v14 = vadd.f32 1.0, %v2224_v27  ;;  %v2265_v2 = vsub.f32 %v2033_v30, %v2193_v23  ;;  %4119 = vlog2.f32 %v2221_v32  ;;  %v2248_v17 = vadd.f32 1.0, %v7474_v48  ;;  %v7476_v30 = vld [vmem:[#allocation28_spill] sm:$0xff] }
 0x36b   :  { %v6066_v19 = vmax.f32 %v1702_v10, 0.0  ;;  %v1701_v59 = vsub.f32 %v1625_v34, %v1663_v53  ;;  %v6070_v3 = vmul.f32 0.6931472, %v5790_v38  ;;  %4121 = vrsqrt.f32 %v1858_v44 }
 0x36c   :  { %v1631_v47 = vpop.xlane.xlu1 %1630  ;;  %v2214_v9 = vmul.f32 0.6931472, %v4106_v46  ;;  %v2094_v61 = vand.u32 2147483647, %v7476_v30  ;;  %v6080_v45 = vmul.f32 %v2225_v14, %v7463_v0  ;;  %v2251_v38 = vmul.f32 -0.5, %v7474_v48 }
 0x36d   :  { %7475 = vst [vmem:[#allocation19_spill] sm:$0xff] %v6070_v3  ;;  %4123 = vrsqrt.f32 %v6066_v19  ;;  %v6087_v16 = vmax.f32 %v1701_v59, 0.0  ;;  %v6089_v27 = vmul.f32 0.5, %v2265_v2  ;;  %v2595_v46 = vlaneseq  ;;  %v7485_v2 = vld [vmem:[#allocation46_spill] sm:$0xff] }
 0x36e   :  { %7479 = vst [vmem:[#allocation22_spill] sm:$0xff] %v6080_v45  ;;  %4125 = vlog2.f32 %v2248_v17  ;;  %vm1752_vm0 = vcmp.eq.f32.partialorder %v5967_v62, inf  ;;  %v1755_v32 = vand.u32 2147483648, %v5967_v62  ;;  %vm1754_vm5 = vcmp.eq.f32.partialorder %v5967_v62, 0.0  ;;  %v6149_v56 = vpop.xlane.xlu0 %1628 }
 0x36f   :  { %v4108_v33 = vpop.eup %4107  ;;  %4127 = vrsqrt.f32 %v1857_v58  ;;  %vm6103_vm6 = vcmp.lt.f32.partialorder %v2236_v22, 0.0004427343  ;;  %vm6107_vm7 = vcmp.lt.f32.partialorder %v2094_v61, 0.0004427343  ;;  %v7482_v53 = vmov 0 }
 0x370   :  { %v1751_v1 = vmul.f32 %v4108_v33, %v5967_v62  ;;  %4129 = vrsqrt.f32 %v6087_v16  ;;  %v7483_v53 = vsel %vm6107_vm7, 4294967295, %v7482_v53  ;;  %v6112_v17 = vmul.f32 0.6931472, %v7485_v2  ;;  %v170_v58 = vld [vmem:[%s7308_s3] sm:$0x1]  ;;  %v1672_v22 = vpop.xlane.xlu1 %1671 }
 0x371   :  { %7484 = vst [vmem:[#allocation32_spill] sm:$0xff] %v7483_v53  ;;  %v2220_v61 = vsel %vm6049_vm2, %v5975_v12, %v2214_v9  ;;  %vm1745_vm10 = vcmp.eq.f32.partialorder %v5985_v49, inf  ;;  %v6135_v12 = vadd.f32 1.0, %v2251_v38  ;;  %v2593_v29 = vsub.f32 1.0, %v170_v58  ;;  %v7498_v53 = vld [vmem:[#allocation29_spill] sm:$0xff] }
 0x372   :  { %v6084_v50 = vpop.eup %4109  ;;  %v1753_v44 = vsel %vm1752_vm0, %v5967_v62, %v1751_v1  ;;  %7486 = vst [vmem:[#allocation30_spill] sm:$0xff] %v6112_v17  ;;  %vm1747_vm11 = vcmp.eq.f32.partialorder %v5985_v49, 0.0  ;;  %vm1766_vm8 = vcmp.eq.f32.partialorder %v6066_v19, inf  ;;  %vm1768_vm13 = vcmp.eq.f32.partialorder %v6066_v19, 0.0 }
 0x373   :  { %v4112_v6 = vpop.eup %4111  ;;  %v2338_v34 = vsel %vm1740_vm9, 0.0, %v6084_v50  ;;  %v1756_v10 = vsel %vm1754_vm5, %v1755_v32, %v1753_v44  ;;  %7489 = vst [vmem:[#allocation28_spill] sm:$0xff] %v6135_v12  ;;  %vm1759_vm14 = vcmp.eq.f32.partialorder %v6087_v16, inf  ;;  %vm1761_vm2 = vcmp.eq.f32.partialorder %v6087_v16, 0.0 }
 0x374   :  { %v6096_v23 = vmax.f32 %v2338_v34, 1e-15  ;;  %v4114_v52 = vpop.eup %4113  ;;  %v1844_v30 = vmax.f32 %v1756_v10, 1e-15  ;;  %v2205_v33 = vmul.f32 0.6931472, %v4112_v6 }
 0x375   :  { %v6114_v59 = vpop.eup %4115  ;;  %v2596_v34 = vshrl.u32 %v2595_v46, 7  ;;  %v1744_v44 = vmul.f32 %v4114_v52, %v5985_v49  ;;  %v1748_v6 = vand.u32 2147483648, %v5985_v49  ;;  %v1704_v46 = vsub.f32 %v1631_v47, %v1672_v22 }
 0x376   :  { %4131 = vrcp.f32 %v6096_v23  ;;  %v4118_v1 = vpop.eup %4117  ;;  %v2337_v32 = vsel %vm1733_vm12, 0.0, %v6114_v59  ;;  %v1896_v20 = vmul.f32 %v7488_v21, %v1844_v30  ;;  %v2211_v52 = vsel %vm6075_vm3, %v6027_v4, %v2205_v33  ;;  %v7490_v33 = vld [vmem:[#allocation35_spill] sm:$0xff] }
 0x377   :  { %v6131_v10 = vmax.f32 %v2337_v32, 1e-15  ;;  %v1746_v9 = vsel %vm1745_vm10, %v5985_v49, %v1744_v44  ;;  %v6144_v32 = vmul.f32 0.6931472, %v4118_v1  ;;  %v4120_v21 = vpop.eup %4119  ;;  %v2597_v30 = vsub.s32 0, %v2596_v34 }
 0x378   :  { %v2292_v38 = vmul.f32 %v5870_v42, %v1896_v20  ;;  %v1749_v44 = vsel %vm1747_vm11, %v1748_v6, %v1746_v9  ;;  %v6156_v47 = vsub.f32 %v2060_v41, %v2220_v61  ;;  %v1860_v4 = vmax.f32 %v5967_v62, 1e-30  ;;  %v4122_v42 = vpop.eup %4121 }
 0x379   :  { %4133 = vrcp.f32 %v6131_v10  ;;  %v1843_v54 = vmax.f32 %v1749_v44, 1e-15  ;;  %v6159_v22 = vmax.f32 %v1704_v46, 0.0  ;;  %v6162_v1 = vadd.f32 1.0, %v7490_v33 }
 0x37a   :  { %v2750_v20 = vmul.f32 %v2593_v29, %v2593_v29  ;;  %4135 = vtanh.f32 %v2292_v38  ;;  %v1859_v34 = vmax.f32 %v5985_v49, 1e-30  ;;  %v6170_v28 = vsub.f32 %v2051_v35, %v2211_v52  ;;  %v4124_v24 = vpop.eup %4123  ;;  %v6191_v38 = vpop.xlane.xlu1 %1634 }
 0x37b   :  { %v1894_v41 = vmul.f32 %v7491_v8, %v1843_v54  ;;  %4137 = vrsqrt.f32 %v6159_v22  ;;  %v6178_v9 = vmul.f32 0.6931472, %v4120_v21  ;;  %v6180_v6 = vpop.eup %4125  ;;  %v6182_v31 = vrot.slane %v170_v58, %v2597_v30 }
 0x37c   :  { %7493 = vst [vmem:[#allocation21_spill] sm:$0xff] %v6180_v6  ;;  %v6184_v46 = vrot.slane %v2593_v29, %v2597_v30  ;;  %v2370_v26 = vmul.f32 %v4122_v42, %v6084_v50  ;;  %v1765_v40 = vmul.f32 %v4124_v24, %v6066_v19  ;;  %4139 = vrsqrt.f32 %v1860_v4  ;;  %v4128_v21 = vpop.eup %4127  ;;  %v1669_v50 = vpop.xlane.xlu0 %1668 }
 0x37d   :  { %7492 = vst [vmem:[#allocation46_spill] sm:$0xff] %v6178_v9  ;;  %v2291_v35 = vmul.f32 %v5892_v37, %v1894_v41  ;;  %v1769_v52 = vand.u32 2147483648, %v6066_v19  ;;  %v6193_v44 = vrot.slane %v2750_v20, %v2597_v30  ;;  %4141 = vrsqrt.f32 %v1859_v34  ;;  %v4130_v29 = vpop.eup %4129 }
 0x37e   :  { %v1767_v58 = vsel %vm1766_vm8, %v6066_v19, %v1765_v40  ;;  %v2482_v4 = vmin.f32 %v6096_v23, 0.99999  ;;  %v1862_v54 = vmax.f32 %v6066_v19, 1e-30  ;;  %v2386_v30 = vsel %vm1740_vm9, 0.0, %v2370_v26  ;;  %v7494_v40 = vld [vmem:[#allocation24_spill] sm:$0xff] }
 0x37f   :  { %4143 = vtanh.f32 %v2291_v35  ;;  %v1770_v37 = vsel %vm1768_vm13, %v1769_v52, %v1767_v58  ;;  %v1758_v34 = vmul.f32 %v4130_v29, %v6087_v16  ;;  %v2369_v8 = vmul.f32 %v4128_v21, %v6114_v59  ;;  %v1678_v59 = vpop.xlane.xlu1 %1677 }
 0x380   :  { %v1846_v20 = vmax.f32 %v1770_v37, 1e-15  ;;  %v1762_v41 = vand.u32 2147483648, %v6087_v16  ;;  %vm2402_vm3 = vcmp.gt.f32.partialorder %v6096_v23, 0.99999  ;;  %v1703_v5 = vsub.f32 %v6149_v56, %v1669_v50 }
 0x381   :  { %v1760_v52 = vsel %vm1759_vm14, %v6087_v16, %v1758_v34  ;;  %v2498_v58 = vmul.f32 %v2482_v4, %v2482_v4  ;;  %v1861_v37 = vmax.f32 %v6087_v16, 1e-30  ;;  %v2481_v61 = vmin.f32 %v6131_v10, 0.99999  ;;  %v7495_v4 = vld [vmem:[#allocation23_spill] sm:$0xff] }
 0x382   :  { %v1900_v35 = vmul.f32 %v7494_v40, %v1846_v20  ;;  %v1763_v29 = vsel %vm1761_vm2, %v1762_v41, %v1760_v52  ;;  %v1633_v20 = vpop.xlane.xlu0 %1632  ;;  %v2385_v34 = vsel %vm1733_vm12, 0.0, %v2369_v8  ;;  %vm2401_vm9 = vcmp.gt.f32.partialorder %v6131_v10, 0.99999 }
 0x383   :  { %v4132_v42 = vpop.eup %4131  ;;  %v1845_v25 = vmax.f32 %v1763_v29, 1e-15  ;;  %4145 = vrsqrt.f32 %v1862_v54  ;;  %v6221_v41 = vmax.f32 %v1703_v5, 0.0  ;;  %v6226_v40 = vmul.f32 %v6182_v31, %v2498_v58 }
 0x384   :  { %v2420_v24 = vmul.f32 0.99999, %v4132_v42  ;;  %v2294_v23 = vmul.f32 %v5905_v18, %v1900_v35  ;;  %v6229_v18 = vmul.f32 %v6193_v44, %v2498_v58  ;;  %v1706_v8 = vsub.f32 %v6191_v38, %v1678_v59  ;;  %v7496_v35 = vld [vmem:[#allocation2_spill] sm:$0xff] }
 0x385   :  { %vm1780_vm12 = vcmp.eq.f32.partialorder %v6159_v22, inf  ;;  %vm1782_vm0 = vcmp.eq.f32.partialorder %v6159_v22, 0.0  ;;  %vm1773_vm10 = vcmp.eq.f32.partialorder %v6221_v41, inf  ;;  %vm1775_vm14 = vcmp.eq.f32.partialorder %v6221_v41, 0.0 }
 0x386   :  { %v2450_v26 = vsel %vm2402_vm3, %v2420_v24, 1.0  ;;  %v4134_v21 = vpop.eup %4133  ;;  %4147 = vtanh.f32 %v2294_v23  ;;  %v1898_v24 = vmul.f32 %v7495_v4, %v1845_v25 }
 0x387   :  { %v2466_v42 = vmul.f32 %v2450_v26, %v2386_v30  ;;  %v2418_v56 = vmul.f32 0.99999, %v4134_v21  ;;  %v6223_v30 = vpop.eup %4135  ;;  %v2497_v26 = vmul.f32 %v2481_v61, %v2481_v61  ;;  %4149 = vrsqrt.f32 %v6221_v41  ;;  %v1675_v61 = vpop.xlane.xlu0 %1674 }
 0x388   :  { %v4138_v10 = vpop.eup %4137  ;;  %v2340_v25 = vsel %vm1754_vm5, 0.0, %v6223_v30  ;;  %v2293_v29 = vmul.f32 %v5943_v63, %v1898_v24  ;;  %v6248_v63 = vmax.f32 %v1706_v8, 0.0  ;;  %v1705_v17 = vsub.f32 %v1633_v20, %v1675_v61 }
 0x389   :  { %v2514_v50 = vsub.f32 0.0, %v2466_v42  ;;  %v2449_v57 = vsel %vm2401_vm9, %v2418_v56, 1.0  ;;  %v6236_v5 = vmax.f32 %v2340_v25, 1e-15  ;;  %v1779_v21 = vmul.f32 %v4138_v10, %v6159_v22  ;;  %v1639_v42 = vpop.xlane.xlu1 %1638  ;;  %v4140_v23 = vpop.eup %4139 }
 0x38a   :  { %v2465_v52 = vmul.f32 %v2449_v57, %v2385_v34  ;;  %v1783_v56 = vand.u32 2147483648, %v6159_v22  ;;  %v6243_v34 = vpop.eup %4141  ;;  %v7497_v57 = vld [vmem:[#allocation4_spill] sm:$0xff]  ;;  %v1864_v8 = vmax.f32 %v6159_v22, 1e-30  ;;  %v2757_v20 = vmul.f32 %v6193_v44, %v2497_v26 }
 0x38b   :  { %v2530_v54 = vmul.f32 %v7496_v35, %v2514_v50  ;;  %4151 = vrcp.f32 %v6236_v5  ;;  %v1781_v50 = vsel %vm1780_vm12, %v6159_v22, %v1779_v21  ;;  %v1866_v61 = vmax.f32 %v6248_v63, 1e-30 }
 0x38c   :  { %v2513_v59 = vsub.f32 0.0, %v2465_v52  ;;  %v4144_v4 = vpop.eup %4143  ;;  %4153 = vrsqrt.f32 %v1861_v37  ;;  %v1784_v35 = vsel %vm1782_vm0, %v1783_v56, %v1781_v50  ;;  %v1863_v37 = vmax.f32 %v6221_v41, 1e-30 }
 0x38d   :  { %v2546_v38 = vmul.f32 2.0, %v2530_v54  ;;  %v2339_v52 = vsel %vm1747_vm11, 0.0, %v4144_v4  ;;  %4155 = vtanh.f32 %v2293_v29  ;;  %v1848_v25 = vmax.f32 %v1784_v35, 1e-15  ;;  %v1684_v56 = vpop.xlane.xlu1 %1683 }
 0x38e   :  { %v2529_v10 = vmul.f32 %v2513_v59, %v7497_v57  ;;  %v6255_v2 = vmax.f32 %v2339_v52, 1e-15  ;;  %4157 = vrsqrt.f32 %v6248_v63  ;;  %v6266_v35 = vmax.f32 %v1705_v17, 0.0 }
 0x38f   :  { %v2562_v24 = vadd.f32 1.0, %v2546_v38  ;;  %v2600_v38 = vmul.f32 %v6182_v31, %v2497_v26  ;;  %v1904_v59 = vmul.f32 %v7498_v53, %v1848_v25  ;;  %v1708_v6 = vsub.f32 %v1639_v42, %v1684_v56 }
 0x390   :  { %v2545_v21 = vmul.f32 2.0, %v2529_v10  ;;  %4159 = vrcp.f32 %v6255_v2  ;;  %v6268_v52 = vpop.eup %4145  ;;  %vm2404_vm8 = vcmp.gt.f32.partialorder %v6236_v5, 0.99999  ;;  %vm1794_vm3 = vcmp.eq.f32.partialorder %v6248_v63, inf }
 0x391   :  { %v2578_v3 = vadd.f32 %v2562_v24, %v2498_v58  ;;  %4161 = vrsqrt.f32 %v1864_v8  ;;  %v2296_v48 = vmul.f32 %v5988_v60, %v1904_v59  ;;  %v7536_v14 = vmax.f32 %v6266_v35, 1e-30 }
 0x392   :  { %v2561_v29 = vadd.f32 1.0, %v2545_v21  ;;  %v2484_v21 = vmin.f32 %v6236_v5, 0.99999  ;;  %4163 = vrsqrt.f32 %v1863_v37  ;;  %v2617_v37 = vadd.f32 %v6226_v40, %v2562_v24 }
 0x393   :  { %v2649_v50 = vmul.f32 %v2578_v3, %v2578_v3  ;;  %v2681_v57 = vmul.f32 2.0, %v2578_v3  ;;  %v6271_v12 = vpop.eup %4147  ;;  %4165 = vrsqrt.f32 %v1866_v61  ;;  %v2483_v40 = vmin.f32 %v6255_v2, 0.99999 }
 0x394   :  { %v2577_v25 = vadd.f32 %v2561_v29, %v2497_v26  ;;  %v2342_v15 = vsel %vm1768_vm13, 0.0, %v6271_v12  ;;  %v1797_v26 = vand.u32 2147483648, %v6248_v63  ;;  %4167 = vrsqrt.f32 %v6266_v35  ;;  %v4150_v59 = vpop.eup %4149 }
 0x395   :  { %v2703_v53 = vmul.f32 %v6184_v46, %v2681_v57  ;;  %v2665_v3 = vmul.f32 %v2649_v50, %v6182_v31  ;;  %v6279_v57 = vmax.f32 %v2342_v15, 1e-15  ;;  %v2372_v15 = vmul.f32 %v4140_v23, %v6223_v30 }
 0x396   :  { %v2648_v33 = vmul.f32 %v2577_v25, %v2577_v25  ;;  %v2680_v17 = vmul.f32 2.0, %v2577_v25  ;;  %v6290_v56 = vmul.f32 %v2484_v21, %v2484_v21  ;;  %4169 = vtanh.f32 %v2296_v48 }
 0x397   :  { %v2719_v58 = vmul.f32 %v2703_v53, %v2530_v54  ;;  %v6286_v54 = vmax.f32 %v1708_v6, 0.0  ;;  %4171 = vrcp.f32 %v6279_v57  ;;  %v2616_v23 = vadd.f32 %v2600_v38, %v2561_v29 }
 0x398   :  { %v2702_v60 = vmul.f32 %v6184_v46, %v2680_v17  ;;  %v4152_v50 = vpop.eup %4151  ;;  %v2664_v53 = vmul.f32 %v2648_v33, %v6182_v31  ;;  %v1772_v33 = vmul.f32 %v4150_v59, %v6221_v41  ;;  %v2388_v24 = vsel %vm1754_vm5, 0.0, %v2372_v15 }
 0x399   :  { %v2735_v8 = vadd.f32 %v2719_v58, %v2665_v3  ;;  %v4154_v25 = vpop.eup %4153  ;;  %v2424_v6 = vmul.f32 0.99999, %v4152_v50  ;;  %v2371_v3 = vmul.f32 %v4144_v4, %v6243_v34  ;;  %4173 = vrsqrt.f32 %v6286_v54 }
 0x39a   :  { %v2718_v58 = vmul.f32 %v2702_v60, %v2529_v10  ;;  %v4156_v30 = vpop.eup %4155  ;;  %v2633_v4 = vmax.f32 %v2617_v37, 1e-15  ;;  %v6310_v38 = vmul.f32 %v6182_v31, %v6290_v56  ;;  %v2486_v29 = vmin.f32 %v6279_v57, 0.99999 }
 0x39b   :  { %v2774_v61 = vadd.f32 %v6229_v18, %v2735_v8  ;;  %v2452_v5 = vsel %vm2404_vm8, %v2424_v6, 1.0  ;;  %v4158_v34 = vpop.eup %4157  ;;  %v6313_v8 = vmul.f32 %v2483_v40, %v2483_v40  ;;  %v2341_v62 = vsel %vm1761_vm2, 0.0, %v4156_v30 }
 0x39c   :  { %v2734_v18 = vadd.f32 %v2718_v58, %v2664_v53  ;;  %v2468_v17 = vmul.f32 %v2452_v5, %v2388_v24  ;;  %vm1796_vm5 = vcmp.eq.f32.partialorder %v6248_v63, 0.0  ;;  %v2632_v59 = vmax.f32 %v2616_v23, 1e-15 }
 0x39d   :  { %v6299_v48 = vmax.f32 %v2774_v61, 0.0  ;;  %v4160_v60 = vpop.eup %4159  ;;  %v6320_v37 = vmul.f32 %v6193_v44, %v6290_v56  ;;  %v2387_v15 = vsel %vm1747_vm11, 0.0, %v2371_v3  ;;  %v1793_v6 = vmul.f32 %v4158_v34, %v6248_v63 }
 0x39e   :  { %v2773_v21 = vadd.f32 %v2757_v20, %v2734_v18  ;;  %v1774_v20 = vsel %vm1773_vm10, %v6221_v41, %v1772_v33  ;;  %v6327_v50 = vpop.eup %4161  ;;  %v2516_v53 = vsub.f32 0.0, %v2468_v17  ;;  %v2422_v58 = vmul.f32 0.99999, %v4160_v60 }
 0x39f   :  { %4175 = vrsqrt.f32 %v6299_v48  ;;  %v6332_v40 = vpop.eup %4163  ;;  %v2374_v23 = vmul.f32 %v6271_v12, %v6268_v52  ;;  %v6336_v49 = vmul.f32 %v2486_v29, %v2486_v29  ;;  %v6338_v3 = vmax.f32 %v2341_v62, 1e-15  ;;  %v7499_v12 = vld [vmem:[#allocation3_spill] sm:$0xff] }
 0x3a0   :  { %v6329_v61 = vmax.f32 %v2773_v21, 0.0  ;;  %4177 = vrcp.f32 %v2633_v4  ;;  %vm2403_vm11 = vcmp.gt.f32.partialorder %v6255_v2, 0.99999  ;;  %v6344_v18 = vmul.f32 %v6182_v31, %v6313_v8  ;;  %v6350_v24 = vpop.eup %4165 }
 0x3a1   :  { %v6348_v33 = vmul.f32 %v6193_v44, %v6313_v8  ;;  %v2532_v52 = vmul.f32 %v7499_v12, %v2516_v53  ;;  %v2451_v5 = vsel %vm2403_vm11, %v2422_v58, 1.0  ;;  %v7500_v34 = vand.u32 2147483648, %v6221_v41  ;;  %v4168_v2 = vpop.eup %4167 }
 0x3a2   :  { %4179 = vrsqrt.f32 %v6329_v61  ;;  %v2467_v29 = vmul.f32 %v2451_v5, %v2387_v15  ;;  %vm2406_vm9 = vcmp.gt.f32.partialorder %v6279_v57, 0.99999  ;;  %v2373_v21 = vmul.f32 %v4156_v30, %v4154_v25  ;;  %v7501_v5 = vld [vmem:[#allocation5_spill] sm:$0xff] }
 0x3a3   :  { %4181 = vrcp.f32 %v2632_v59  ;;  %v1777_v4 = vsel %vm1775_vm14, %v7500_v34, %v1774_v20  ;;  %v1795_v17 = vsel %vm1794_vm3, %v6248_v63, %v1793_v6  ;;  %v6361_v62 = vpop.eup %4169  ;;  %v2548_v60 = vmul.f32 2.0, %v2532_v52 }
 0x3a4   :  { %v2390_v59 = vsel %vm1768_vm13, 0.0, %v2374_v23  ;;  %v6367_v53 = vmul.f32 %v6182_v31, %v6336_v49  ;;  %v2485_v20 = vmin.f32 %v6338_v3, 0.99999  ;;  %v4172_v15 = vpop.eup %4171  ;;  %vm2814_vm12 = vcmp.eq.f32.partialorder %v6299_v48, inf }
 0x3a5   :  { %v2515_v25 = vsub.f32 0.0, %v2467_v29  ;;  %v6373_v30 = vmul.f32 %v6193_v44, %v6336_v49  ;;  %v1847_v58 = vmax.f32 %v1777_v4, 1e-15  ;;  %vm2816_vm10 = vcmp.eq.f32.partialorder %v6299_v48, 0.0 }
 0x3a6   :  { %v2564_v6 = vadd.f32 1.0, %v2548_v60  ;;  %v2428_v19 = vmul.f32 0.99999, %v4172_v15  ;;  %v1798_v23 = vsel %vm1796_vm5, %v1797_v26, %v1795_v17  ;;  %v2817_v12 = vand.u32 2147483648, %v6299_v48  ;;  %v6387_v4 = vpop.eup %4173 }
 0x3a7   :  { %v2531_v34 = vmul.f32 %v2515_v25, %v7501_v5  ;;  %v6384_v29 = vsel %vm1761_vm2, 0.0, %v2373_v21  ;;  %4183 = vrcp.f32 %v6338_v3  ;;  %v6392_v10 = vmul.f32 %v2485_v20, %v2485_v20  ;;  %v7502_v21 = vld [vmem:[#allocation26_spill] sm:$0xff] }
 0x3a8   :  { %v2580_v60 = vadd.f32 %v2564_v6, %v6290_v56  ;;  %v2454_v15 = vsel %vm2406_vm9, %v2428_v19, 1.0  ;;  %v2344_v26 = vsel %vm1782_vm0, 0.0, %v6361_v62  ;;  %v1902_v5 = vmul.f32 %v7502_v21, %v1847_v58 }
 0x3a9   :  { %v2547_v25 = vmul.f32 2.0, %v2531_v34  ;;  %v2470_v16 = vmul.f32 %v2454_v15, %v2390_v59  ;;  %v1850_v42 = vmax.f32 %v1798_v23, 1e-15  ;;  %vm1787_vm13 = vcmp.eq.f32.partialorder %v6266_v35, inf }
 0x3aa   :  { %v2651_v56 = vmul.f32 %v2580_v60, %v2580_v60  ;;  %v2683_v11 = vmul.f32 2.0, %v2580_v60  ;;  %v1786_v57 = vmul.f32 %v4168_v2, %v6266_v35  ;;  %vm2807_vm2 = vcmp.eq.f32.partialorder %v6329_v61, inf }
 0x3ab   :  { %v2563_v20 = vadd.f32 1.0, %v2547_v25  ;;  %v2518_v19 = vsub.f32 0.0, %v2470_v16  ;;  %v6402_v45 = vmax.f32 %v2344_v26, 1e-15  ;;  %vm2809_vm8 = vcmp.eq.f32.partialorder %v6329_v61, 0.0 }
 0x3ac   :  { %v4176_v17 = vpop.eup %4175  ;;  %v2810_v58 = vand.u32 2147483648, %v6329_v61  ;;  %v2705_v23 = vmul.f32 %v6184_v46, %v2683_v11  ;;  %v6418_v26 = vmul.f32 %v6182_v31, %v6392_v10  ;;  %v2667_v21 = vmul.f32 %v2651_v56, %v6182_v31 }
 0x3ad   :  { %v2813_v13 = vmul.f32 %v4176_v17, %v6299_v48  ;;  %v4178_v15 = vpop.eup %4177  ;;  %v2579_v60 = vadd.f32 %v2563_v20, %v6313_v8  ;;  %v7503_v17 = vld [vmem:[#allocation6_spill] sm:$0xff]  ;;  %v2295_v11 = vmul.f32 %v6035_v55, %v1902_v5  ;;  %4185 = vrcp.f32 %v6402_v45  ;;  %v7504_v8 = vld [vmem:[#allocation36_spill] sm:$0xff] }
 0x3ae   :  { %v6414_v25 = vmul.f32 %v7503_v17, %v2518_v19  ;;  %v2721_v9 = vmul.f32 %v2705_v23, %v2532_v52  ;;  %v1908_v19 = vmul.f32 %v7504_v8, %v1850_v42  ;;  %vm1789_vm3 = vcmp.eq.f32.partialorder %v6266_v35, 0.0 }
 0x3af   :  { %v2815_v59 = vsel %vm2814_vm12, %v6299_v48, %v2813_v13  ;;  %v4180_v13 = vpop.eup %4179  ;;  %v2650_v51 = vmul.f32 %v2579_v60, %v2579_v60  ;;  %v2619_v55 = vadd.f32 %v6310_v38, %v2564_v6  ;;  %v2376_v56 = vmul.f32 %v6361_v62, %v6327_v50 }
 0x3b0   :  { %v2818_v2 = vsel %vm2816_vm10, %v2817_v12, %v2815_v59  ;;  %v4182_v7 = vpop.eup %4181  ;;  %v2806_v48 = vmul.f32 %v4180_v13, %v6329_v61  ;;  %v2682_v12 = vmul.f32 2.0, %v2579_v60  ;;  %v2737_v17 = vadd.f32 %v2721_v9, %v2667_v21 }
 0x3b1   :  { %v2920_v16 = vmul.f32 %v4178_v15, %v2818_v2  ;;  %v2550_v15 = vmul.f32 2.0, %v6414_v25  ;;  %4187 = vtanh.f32 %v2295_v11  ;;  %v1788_v9 = vsel %vm1787_vm13, %v6266_v35, %v1786_v57 }
 0x3b2   :  { %v2808_v52 = vsel %vm2807_vm2, %v6329_v61, %v2806_v48  ;;  %v2704_v5 = vmul.f32 %v6184_v46, %v2682_v12  ;;  %v2776_v60 = vadd.f32 %v6320_v37, %v2737_v17  ;;  %vm2405_vm11 = vcmp.gt.f32.partialorder %v6338_v3, 0.99999 }
 0x3b3   :  { %v3482_v59 = vclamps-f32 %v2920_v16, 0.9999999  ;;  %v2811_v2 = vsel %vm2809_vm8, %v2810_v58, %v2808_v52  ;;  %v6442_v38 = vadd.f32 1.0, %v2550_v15  ;;  %v2666_v62 = vmul.f32 %v2650_v51, %v6182_v31 }
 0x3b4   :  { %v2720_v13 = vmul.f32 %v2704_v5, %v2531_v34  ;;  %v4184_v6 = vpop.eup %4183  ;;  %v2298_v16 = vmul.f32 %v6045_v36, %v1908_v19  ;;  %v2918_v21 = vmul.f32 %v4182_v7, %v2811_v2  ;;  %v2635_v57 = vmax.f32 %v2619_v55, 1e-15 }
 0x3b5   :  { %v2990_v23 = vadd.f32 1.0, %v3482_v59  ;;  %v6434_v42 = vsub.f32 0.0, %v3482_v59  ;;  %v6448_v11 = vmax.f32 %v2776_v60, 0.0  ;;  %v2618_v61 = vadd.f32 %v6344_v18, %v2563_v20 }
 0x3b6   :  { %v2993_v37 = vmul.f32 -0.5, %v3482_v59  ;;  %v2736_v34 = vadd.f32 %v2720_v13, %v2666_v62  ;;  %v6453_v58 = vmul.f32 %v6193_v44, %v6392_v10  ;;  %v6455_v48 = vclamps-f32 %v2918_v21, 0.9999999 }
 0x3b7   :  { %4189 = vlog2.f32 %v2990_v23  ;;  %v3150_v50 = vadd.f32 1.0, %v6434_v42  ;;  %v2582_v51 = vadd.f32 %v6442_v38, %v6336_v49  ;;  %v2392_v7 = vsel %vm1782_vm0, 0.0, %v2376_v56 }
 0x3b8   :  { %v2775_v36 = vadd.f32 %v6348_v33, %v2736_v34  ;;  %v2426_v18 = vmul.f32 0.99999, %v4184_v6  ;;  %v7505_v20 = vand.u32 2147483648, %v6266_v35  ;;  %v2981_v8 = vadd.f32 1.0, %v6455_v48 }
 0x3b9   :  { %4191 = vlog2.f32 %v3150_v50  ;;  %v2634_v19 = vmax.f32 %v2618_v61, 1e-15  ;;  %v2488_v17 = vmin.f32 %v6402_v45, 0.99999  ;;  %v2994_v49 = vadd.f32 1.0, %v2993_v37 }
 0x3ba   :  { %4193 = vrsqrt.f32 %v6448_v11  ;;  %v6467_v12 = vsel %vm1789_vm3, %v7505_v20, %v1788_v9  ;;  %v2996_v15 = vand.u32 2147483647, %v3482_v59  ;;  %v6472_v22 = vsub.f32 0.0, %v6455_v48  ;;  %v4186_v5 = vpop.eup %4185 }
 0x3bb   :  { %4195 = vtanh.f32 %v2298_v16  ;;  %v6474_v33 = vmax.f32 %v2775_v36, 0.0  ;;  %v3153_v52 = vmul.f32 -0.5, %v6434_v42  ;;  %v2685_v55 = vmul.f32 2.0, %v2582_v51 }
 0x3bc   :  { %4197 = vrcp.f32 %v2635_v57  ;;  %vm2408_vm0 = vcmp.gt.f32.partialorder %v6402_v45, 0.99999  ;;  %v3156_v56 = vand.u32 2147483647, %v6434_v42  ;;  %v3141_v23 = vadd.f32 1.0, %v6472_v22 }
 0x3bd   :  { %4199 = vlog2.f32 %v2981_v8  ;;  %v2453_v9 = vsel %vm2405_vm11, %v2426_v18, 1.0  ;;  %v2653_v2 = vmul.f32 %v2582_v51, %v2582_v51  ;;  %v6483_v60 = vmul.f32 %v2488_v17, %v2488_v17 }
 0x3be   :  { %4201 = vrsqrt.f32 %v6474_v33  ;;  %v1849_v13 = vmax.f32 %v6467_v12, 1e-15  ;;  %v2995_v6 = vmul.f32 %v3482_v59, %v2994_v49  ;;  %vm6486_vm9 = vcmp.lt.f32.partialorder %v2996_v15, 0.0004427343  ;;  %v6491_v16 = vpop.eup %4187 }
 0x3bf   :  { %4203 = vrcp.f32 %v2634_v19  ;;  %v2984_v62 = vmul.f32 -0.5, %v6455_v48  ;;  %v3154_v21 = vadd.f32 1.0, %v3153_v52  ;;  %v2707_v3 = vmul.f32 %v6184_v46, %v2685_v55  ;;  %v7510_v55 = vld [vmem:[#allocation7_spill] sm:$0xff] }
 0x3c0   :  { %4205 = vlog2.f32 %v3141_v23  ;;  %v2469_v57 = vmul.f32 %v2453_v9, %v6384_v29  ;;  %v2432_v61 = vmul.f32 0.99999, %v4186_v5  ;;  %vm6495_vm12 = vcmp.lt.f32.partialorder %v3156_v56, 0.0004427343 }
 0x3c1   :  { %v2987_v59 = vand.u32 2147483647, %v6455_v48  ;;  %vm2828_vm10 = vcmp.eq.f32.partialorder %v6448_v11, inf  ;;  %vm2830_vm13 = vcmp.eq.f32.partialorder %v6448_v11, 0.0  ;;  %v2669_v51 = vmul.f32 %v2653_v2, %v6182_v31 }
 0x3c2   :  { %v2723_v36 = vmul.f32 %v2707_v3, %v6414_v25  ;;  %v2517_v18 = vsub.f32 0.0, %v2469_v57  ;;  %v2456_v29 = vsel %vm2408_vm0, %v2432_v61, 1.0  ;;  %v2985_v8 = vadd.f32 1.0, %v2984_v62 }
 0x3c3   :  { %v2831_v19 = vand.u32 2147483648, %v6448_v11  ;;  %v2472_v17 = vmul.f32 %v2456_v29, %v2392_v7  ;;  %v3155_v15 = vmul.f32 %v3154_v21, %v6434_v42  ;;  %v2343_v25 = vsel %vm1775_vm14, 0.0, %v6491_v16 }
 0x3c4   :  { %v4190_v34 = vpop.eup %4189  ;;  %v2739_v52 = vadd.f32 %v2723_v36, %v2669_v51  ;;  %v6509_v5 = vmul.f32 %v2517_v18, %v7510_v55  ;;  %v3144_v45 = vmul.f32 -0.5, %v6472_v22  ;;  %v2621_v9 = vadd.f32 %v6367_v53, %v6442_v38 }
 0x3c5   :  { %v2992_v20 = vmul.f32 0.6931472, %v4190_v34  ;;  %v2520_v2 = vsub.f32 0.0, %v2472_v17  ;;  %vm6519_vm2 = vcmp.lt.f32.partialorder %v2987_v59, 0.0004427343  ;;  %v2986_v38 = vmul.f32 %v6455_v48, %v2985_v8 }
 0x3c6   :  { %v4192_v49 = vpop.eup %4191  ;;  %v3147_v62 = vand.u32 2147483647, %v6472_v22  ;;  %v2778_v3 = vadd.f32 %v6373_v30, %v2739_v52  ;;  %v2549_v57 = vmul.f32 2.0, %v6509_v5  ;;  %v6532_v59 = vmax.f32 %v2343_v25, 1e-15  ;;  %v7513_v30 = vld [vmem:[#allocation9_spill] sm:$0xff] }
 0x3c7   :  { %v4194_v56 = vpop.eup %4193  ;;  %v3152_v23 = vmul.f32 0.6931472, %v4192_v49  ;;  %v2998_v34 = vsel %vm6486_vm9, %v2995_v6, %v2992_v20  ;;  %v6540_v29 = vmul.f32 %v7513_v30, %v2520_v2  ;;  %v3145_v50 = vadd.f32 1.0, %v3144_v45 }
 0x3c8   :  { %v6517_v7 = vpop.eup %4195  ;;  %v2827_v21 = vmul.f32 %v4194_v56, %v6448_v11  ;;  %v6537_v18 = vmax.f32 %v2778_v3, 0.0  ;;  %vm2821_vm8 = vcmp.eq.f32.partialorder %v6474_v33, inf  ;;  %v2637_v48 = vmax.f32 %v2621_v9, 1e-15 }
 0x3c9   :  { %v4198_v61 = vpop.eup %4197  ;;  %v3158_v53 = vsel %vm6495_vm12, %v3155_v15, %v3152_v23  ;;  %v2565_v49 = vadd.f32 1.0, %v2549_v57  ;;  %vm2823_vm11 = vcmp.eq.f32.partialorder %v6474_v33, 0.0  ;;  %v2824_v25 = vand.u32 2147483648, %v6474_v33 }
 0x3ca   :  { %v3286_v51 = vsub.f32 %v2998_v34, %v3158_v53  ;;  %v2829_v36 = vsel %vm2828_vm10, %v6448_v11, %v2827_v21  ;;  %v4200_v17 = vpop.eup %4199  ;;  %4207 = vrsqrt.f32 %v6537_v18  ;;  %v2552_v23 = vmul.f32 2.0, %v6540_v29 }
 0x3cb   :  { %v2832_v6 = vsel %vm2830_vm13, %v2831_v19, %v2829_v36  ;;  %v4202_v37 = vpop.eup %4201  ;;  %v2983_v52 = vmul.f32 0.6931472, %v4200_v17  ;;  %4209 = vrcp.f32 %v6532_v59  ;;  %v3146_v9 = vmul.f32 %v3145_v50, %v6472_v22 }
 0x3cc   :  { %v3302_v20 = vmul.f32 0.5, %v3286_v51  ;;  %v2924_v8 = vmul.f32 %v4198_v61, %v2832_v6  ;;  %v4204_v15 = vpop.eup %4203  ;;  %v2820_v55 = vmul.f32 %v4202_v37, %v6474_v33  ;;  %vm3148_vm0 = vcmp.lt.f32.partialorder %v3147_v62, 0.0004427343  ;;  %v7514_v6 = vld [vmem:[#allocation31_spill] sm:$0xff] }
 0x3cd   :  { %v4206_v56 = vpop.eup %4205  ;;  %4211 = vrcp.f32 %v2637_v48  ;;  %v2581_v57 = vadd.f32 %v2565_v49, %v6392_v10  ;;  %v2989_v22 = vsel %vm6519_vm2, %v2986_v38, %v2983_v52  ;;  %v6572_v34 = vmul.f32 %v6387_v4, %v6286_v54 }
 0x3ce   :  { %v3318_v11 = vmul.f32 2.0, %v3302_v20  ;;  %v6549_v19 = vclamps-f32 %v2924_v8, 0.9999999  ;;  %v3143_v45 = vmul.f32 0.6931472, %v4206_v56  ;;  %v2822_v2 = vsel %vm2821_vm8, %v6474_v33, %v2820_v55 }
 0x3cf   :  { %v2825_v61 = vsel %vm2823_vm11, %v2824_v25, %v2822_v2  ;;  %v6574_v51 = vadd.f32 1.0, %v2552_v23  ;;  %v2375_v36 = vmul.f32 %v6491_v16, %v6332_v40  ;;  %v6581_v42 = vmul.f32 %v6182_v31, %v6483_v60 }
 0x3d0   :  { %3334 = vst.msk [vmem:[%s7309_s4 + $0x8] sm:$0xff] %vm1648_vm4, %v3318_v11  ;;  %v3008_v21 = vadd.f32 1.0, %v6549_v19  ;;  %v6563_v3 = vsub.f32 0.0, %v6549_v19  ;;  %v3149_v62 = vsel %vm3148_vm0, %v3146_v9, %v3143_v45  ;;  %v2922_v30 = vmul.f32 %v4204_v15, %v2825_v61 }
 0x3d1   :  { %v3285_v53 = vsub.f32 %v2989_v22, %v3149_v62  ;;  %v2487_v33 = vmin.f32 %v6532_v59, 0.99999  ;;  %v2684_v17 = vmul.f32 2.0, %v2581_v57  ;;  %v6586_v4 = vmul.f32 %v6193_v44, %v6483_v60 }
 0x3d2   :  { %4213 = vlog2.f32 %v3008_v21  ;;  %v3168_v10 = vadd.f32 1.0, %v6563_v3  ;;  %v2346_v50 = vsel %vm1796_vm5, 0.0, %v6517_v7  ;;  %v6591_v40 = vclamps-f32 %v2922_v30, 0.9999999 }
 0x3d3   :  { %v3301_v38 = vmul.f32 0.5, %v3285_v53  ;;  %v2652_v16 = vmul.f32 %v2581_v57, %v2581_v57  ;;  %v6596_v48 = vmul.f32 %v7514_v6, %v1849_v13  ;;  %v2706_v20 = vmul.f32 %v6184_v46, %v2684_v17 }
 0x3d4   :  { %4215 = vlog2.f32 %v3168_v10  ;;  %v2584_v8 = vadd.f32 %v6574_v51, %v6483_v60  ;;  %v2391_v15 = vsel %vm1775_vm14, 0.0, %v2375_v36  ;;  %v3011_v52 = vmul.f32 -0.5, %v6549_v19 }
 0x3d5   :  { %v3317_v37 = vmul.f32 2.0, %v3301_v38  ;;  %v2999_v55 = vadd.f32 1.0, %v6591_v40  ;;  %vm2407_vm9 = vcmp.gt.f32.partialorder %v6532_v59, 0.99999  ;;  %v6606_v25 = vmul.f32 %v2487_v33, %v2487_v33 }
 0x3d6   :  { %v6608_v12 = vmax.f32 %v2346_v50, 1e-15  ;;  %v3014_v60 = vand.u32 2147483647, %v6549_v19  ;;  %v6616_v41 = vsub.f32 0.0, %v6591_v40  ;;  %v2620_v13 = vadd.f32 %v6418_v26, %v2565_v49 }
 0x3d7   :  { %3333 = vst.msk [vmem:[%s7309_s4] sm:$0xff] %vm1648_vm4, %v3317_v37  ;;  %v2722_v56 = vmul.f32 %v2706_v20, %v6509_v5  ;;  %v4208_v11 = vpop.eup %4207  ;;  %4217 = vlog2.f32 %v2999_v55  ;;  %v2668_v23 = vmul.f32 %v2652_v16, %v6182_v31  ;;  %v2687_v45 = vmul.f32 2.0, %v2584_v8 }
 0x3d8   :  { %v6623_v9 = vmul.f32 %v6517_v7, %v6350_v24  ;;  %v3171_v2 = vmul.f32 -0.5, %v6563_v3  ;;  %v3159_v21 = vadd.f32 1.0, %v6616_v41  ;;  %v2841_v57 = vmul.f32 %v4208_v11, %v6537_v18  ;;  %v4210_v26 = vpop.eup %4209 }
 0x3d9   :  { %vm2842_vm14 = vcmp.eq.f32.partialorder %v6537_v18, inf  ;;  %v3012_v49 = vadd.f32 1.0, %v3011_v52  ;;  %vm2844_vm12 = vcmp.eq.f32.partialorder %v6537_v18, 0.0  ;;  %v2845_v5 = vand.u32 2147483648, %v6537_v18 }
 0x3da   :  { %v2738_v22 = vadd.f32 %v2722_v56, %v2668_v23  ;;  %vm6631_vm10 = vcmp.lt.f32.partialorder %v3014_v60, 0.0004427343  ;;  %4219 = vlog2.f32 %v3159_v21  ;;  %v2843_v24 = vsel %vm2842_vm14, %v6537_v18, %v2841_v57  ;;  %v4212_v61 = vpop.eup %4211 }
 0x3db   :  { %v2636_v7 = vmax.f32 %v2620_v13, 1e-15  ;;  %v2846_v53 = vsel %vm2844_vm12, %v2845_v5, %v2843_v24  ;;  %v2655_v10 = vmul.f32 %v2584_v8, %v2584_v8  ;;  %v2709_v30 = vmul.f32 %v6184_v46, %v2687_v45 }
 0x3dc   :  { %v2777_v36 = vadd.f32 %v6453_v58, %v2738_v22  ;;  %v3172_v33 = vadd.f32 1.0, %v3171_v2  ;;  %v3174_v38 = vand.u32 2147483647, %v6563_v3  ;;  %v2928_v17 = vmul.f32 %v4212_v61, %v2846_v53  ;;  %v1637_v22 = vpop.xlane.xlu0 %1636 }
 0x3dd   :  { %v2430_v50 = vmul.f32 0.99999, %v4210_v26  ;;  %v3013_v6 = vmul.f32 %v6549_v19, %v3012_v49  ;;  %v2725_v18 = vmul.f32 %v2709_v30, %v6540_v29  ;;  %4221 = vrcp.f32 %v6608_v12 }
 0x3de   :  { %v6640_v37 = vmax.f32 %v2777_v36, 0.0  ;;  %v3002_v20 = vmul.f32 -0.5, %v6591_v40  ;;  %v6645_v58 = vclamps-f32 %v2928_v17, 0.9999999  ;;  %4223 = vrcp.f32 %v2636_v7 }
 0x3df   :  { %v4214_v16 = vpop.eup %4213  ;;  %v2455_v8 = vsel %vm2407_vm9, %v2430_v50, 1.0  ;;  %v3162_v55 = vmul.f32 -0.5, %v6616_v41  ;;  %v2671_v19 = vmul.f32 %v2655_v10, %v6182_v31  ;;  %v3173_v29 = vmul.f32 %v3172_v33, %v6563_v3 }
 0x3e0   :  { %v3010_v52 = vmul.f32 0.6931472, %v4214_v16  ;;  %4225 = vrsqrt.f32 %v6640_v37  ;;  %v3005_v13 = vand.u32 2147483647, %v6591_v40  ;;  %v3026_v56 = vadd.f32 1.0, %v6645_v58 }
 0x3e1   :  { %v4216_v60 = vpop.eup %4215  ;;  %v2623_v11 = vadd.f32 %v6581_v42, %v6574_v51  ;;  %v6658_v59 = vsub.f32 0.0, %v6645_v58  ;;  %v2741_v45 = vadd.f32 %v2725_v18, %v2671_v19  ;;  %v2471_v2 = vmul.f32 %v2455_v8, %v2391_v15 }
 0x3e2   :  { %v3170_v23 = vmul.f32 0.6931472, %v4216_v60  ;;  %vm3175_vm13 = vcmp.lt.f32.partialorder %v3174_v38, 0.0004427343  ;;  %v3003_v21 = vadd.f32 1.0, %v3002_v20  ;;  %4227 = vlog2.f32 %v3026_v56 }
 0x3e3   :  { %v3165_v57 = vand.u32 2147483647, %v6616_v41  ;;  %v3016_v3 = vsel %vm6631_vm10, %v3013_v6, %v3010_v52  ;;  %v3163_v49 = vadd.f32 1.0, %v3162_v55  ;;  %v3186_v5 = vadd.f32 1.0, %v6658_v59 }
 0x3e4   :  { %v3176_v26 = vsel %vm3175_vm13, %v3173_v29, %v3170_v23  ;;  %v4218_v51 = vpop.eup %4217  ;;  %v2780_v24 = vadd.f32 %v6586_v4, %v2741_v45  ;;  %v2519_v7 = vsub.f32 0.0, %v2471_v2  ;;  %v6667_v15 = vmul.f32 %v6182_v31, %v6606_v25  ;;  %v7519_v4 = vld [vmem:[#allocation8_spill] sm:$0xff] }
 0x3e5   :  { %v3288_v42 = vsub.f32 %v3016_v3, %v3176_v26  ;;  %vm6669_vm2 = vcmp.lt.f32.partialorder %v3005_v13, 0.0004427343  ;;  %4229 = vlog2.f32 %v3186_v5  ;;  %v2639_v62 = vmax.f32 %v2623_v11, 1e-15 }
 0x3e6   :  { %v6675_v53 = vmul.f32 %v6193_v44, %v6606_v25  ;;  %v3001_v10 = vmul.f32 0.6931472, %v4218_v51  ;;  %v6677_v30 = vmax.f32 %v2780_v24, 0.0  ;;  %v6680_v33 = vmul.f32 %v2519_v7, %v7519_v4 }
 0x3e7   :  { %v3304_v36 = vmul.f32 0.5, %v3288_v42  ;;  %v4220_v38 = vpop.eup %4219  ;;  %v3004_v17 = vmul.f32 %v6591_v40, %v3003_v21  ;;  %v3164_v50 = vmul.f32 %v3163_v49, %v6616_v41  ;;  %vm6684_vm8 = vcmp.lt.f32.partialorder %v3165_v57, 0.0004427343  ;;  %v1681_v41 = vpop.xlane.xlu0 %1680 }
 0x3e8   :  { %v2297_v6 = vmul.f32 %v6089_v27, %v6596_v48  ;;  %v3161_v20 = vmul.f32 0.6931472, %v4220_v38  ;;  %v3029_v8 = vmul.f32 -0.5, %v6645_v58  ;;  %4231 = vrsqrt.f32 %v6677_v30  ;;  %v7534_v38 = vld [vmem:[#allocation46_spill] sm:$0xff] }
 0x3e9   :  { %v3320_v18 = vmul.f32 2.0, %v3304_v36  ;;  %4233 = vrcp.f32 %v2639_v62  ;;  %v2551_v52 = vmul.f32 2.0, %v6680_v33  ;;  %v2394_v40 = vsel %vm1796_vm5, 0.0, %v6623_v9 }
 0x3ea   :  { %vm2410_vm11 = vcmp.gt.f32.partialorder %v6608_v12, 0.99999  ;;  %v4222_v55 = vpop.eup %4221  ;;  %v3007_v27 = vsel %vm6669_vm2, %v3004_v17, %v3001_v10  ;;  %v3167_v48 = vsel %vm6684_vm8, %v3164_v50, %v3161_v20  ;;  %v3032_v19 = vand.u32 2147483647, %v6645_v58 }
 0x3eb   :  { %3336 = vst.msk [vmem:[%s7309_s4 + $0x18] sm:$0xff] %vm1648_vm4, %v3320_v18  ;;  %v3189_v63 = vmul.f32 -0.5, %v6658_v59  ;;  %v4224_v9 = vpop.eup %4223  ;;  %v3287_v60 = vsub.f32 %v3007_v27, %v3167_v48  ;;  %vm2835_vm5 = vcmp.eq.f32.partialorder %v6640_v37, inf  ;;  %v6708_v29 = vadd.f32 1.0, %v2551_v52  ;;  %v7526_v52 = vld [vmem:[#allocation10_spill] sm:$0xff] }
 0x3ec   :  { %v2436_v13 = vmul.f32 0.99999, %v4222_v55  ;;  %v3030_v11 = vadd.f32 1.0, %v3029_v8  ;;  %vm2837_vm0 = vcmp.eq.f32.partialorder %v6640_v37, 0.0  ;;  %4235 = vtanh.f32 %v2297_v6 }
 0x3ed   :  { %v4226_v56 = vpop.eup %4225  ;;  %v1707_v23 = vsub.f32 %v1637_v22, %v1681_v41  ;;  %v3303_v45 = vmul.f32 0.5, %v3287_v60  ;;  %v3192_v2 = vand.u32 2147483647, %v6658_v59  ;;  %v2583_v57 = vadd.f32 %v6708_v29, %v6606_v25 }
 0x3ee   :  { %v2834_v21 = vmul.f32 %v4226_v56, %v6640_v37  ;;  %vm6715_vm9 = vcmp.lt.f32.partialorder %v3032_v19, 0.0004427343  ;;  %v3190_v26 = vadd.f32 1.0, %v3189_v63  ;;  %v2838_v49 = vand.u32 2147483648, %v6640_v37 }
 0x3ef   :  { %v2458_v5 = vsel %vm2410_vm11, %v2436_v13, 1.0  ;;  %v4228_v51 = vpop.eup %4227  ;;  %v3319_v22 = vmul.f32 2.0, %v3303_v45  ;;  %v2490_v24 = vmin.f32 %v6608_v12, 0.99999  ;;  %v6726_v7 = vmax.f32 %v1707_v23, 0.0 }
 0x3f0   :  { %v2836_v42 = vsel %vm2835_vm5, %v6640_v37, %v2834_v21  ;;  %v2654_v61 = vmul.f32 %v2583_v57, %v2583_v57  ;;  %v2686_v62 = vmul.f32 2.0, %v2583_v57  ;;  %v2474_v36 = vmul.f32 %v2458_v5, %v2394_v40  ;;  %v6775_v21 = vpop.xlane.xlu1 %1642 }
 0x3f1   :  { %v2839_v25 = vsel %vm2837_vm0, %v2838_v49, %v2836_v42  ;;  %3335 = vst.msk [vmem:[%s7309_s4 + $0x10] sm:$0xff] %vm1648_vm4, %v3319_v22  ;;  %v3028_v10 = vmul.f32 0.6931472, %v4228_v51  ;;  %v3031_v4 = vmul.f32 %v6645_v58, %v3030_v11  ;;  %vm6735_vm14 = vcmp.lt.f32.partialorder %v3192_v2, 0.0004427343 }
 0x3f2   :  { %v2926_v12 = vmul.f32 %v4224_v9, %v2839_v25  ;;  %v4230_v17 = vpop.eup %4229  ;;  %v3191_v37 = vmul.f32 %v3190_v26, %v6658_v59  ;;  %v2708_v50 = vmul.f32 %v6184_v46, %v2686_v62  ;;  %v2522_v16 = vsub.f32 0.0, %v2474_v36  ;;  %v7531_v62 = vld [vmem:[#allocation37_spill] sm:$0xff]  ;;  %v7532_v36 = vld [vmem:[#allocation18_spill] sm:$0xff] }
 0x3f3   :  { %vm1808_vm12 = vcmp.eq.f32.partialorder %v6286_v54, inf  ;;  %v3188_v6 = vmul.f32 0.6931472, %v4230_v17  ;;  %vm1810_vm10 = vcmp.eq.f32.partialorder %v6286_v54, 0.0  ;;  %v2670_v58 = vmul.f32 %v2654_v61, %v6182_v31 }
 0x3f4   :  { %v6742_v18 = vclamps-f32 %v2926_v12, 0.9999999  ;;  %v1809_v20 = vsel %vm1808_vm12, %v6286_v54, %v6572_v34  ;;  %v2724_v8 = vmul.f32 %v2708_v50, %v6680_v33  ;;  %v6750_v40 = vmul.f32 %v7526_v52, %v2522_v16 }
 0x3f5   :  { %4237 = vrsqrt.f32 %v6726_v7  ;;  %v7527_v59 = vand.u32 2147483647, %v7463_v0  ;;  %v4232_v55 = vpop.eup %4231  ;;  %v3034_v34 = vsel %vm6715_vm9, %v3031_v4, %v3028_v10  ;;  %v3194_v27 = vsel %vm6735_vm14, %v3191_v37, %v3188_v6  ;;  %v7537_v37 = vld [vmem:[#allocation41_spill] sm:$0xff] }
 0x3f6   :  { %v3017_v33 = vadd.f32 1.0, %v6742_v18  ;;  %v1811_v48 = vand.u32 2147483648, %v6286_v54  ;;  %v4234_v19 = vpop.eup %4233  ;;  %v3290_v63 = vsub.f32 %v3034_v34, %v3194_v27  ;;  %v6766_v9 = vsub.f32 0.0, %v6742_v18 }
 0x3f7   :  { %vm6755_vm13 = vcmp.lt.f32.partialorder %v7527_v59, 0.0004427343  ;;  %v2855_v0 = vmul.f32 %v4232_v55, %v6677_v30  ;;  %v2740_v60 = vadd.f32 %v2724_v8, %v2670_v58  ;;  %v2506_v13 = vmul.f32 %v2490_v24, %v2490_v24 }
 0x3f8   :  { %4239 = vlog2.f32 %v3017_v33  ;;  %v2554_v56 = vmul.f32 2.0, %v6750_v40  ;;  %v1812_v11 = vsel %vm1810_vm10, %v1811_v48, %v1809_v20  ;;  %v3306_v23 = vmul.f32 0.5, %v3290_v63 }
 0x3f9   :  { %v3177_v45 = vadd.f32 1.0, %v6766_v9  ;;  %vm2856_vm2 = vcmp.eq.f32.partialorder %v6677_v30, inf  ;;  %v2859_v2 = vand.u32 2147483648, %v6677_v30  ;;  %v6777_v57 = vpop.eup %4235  ;;  %v2622_v26 = vadd.f32 %v6667_v15, %v6708_v29 }
 0x3fa   :  { %v2857_v3 = vsel %vm2856_vm2, %v6677_v30, %v2855_v0  ;;  %v2779_v49 = vadd.f32 %v6675_v53, %v2740_v60  ;;  %v2570_v5 = vadd.f32 1.0, %v2554_v56  ;;  %v3322_v51 = vmul.f32 2.0, %v3306_v23  ;;  %v6839_v60 = vpop.xlane.xlu0 %1640 }
 0x3fb   :  { %4241 = vlog2.f32 %v3177_v45  ;;  %vm2858_vm8 = vcmp.eq.f32.partialorder %v6677_v30, 0.0  ;;  %v1852_v22 = vmax.f32 %v1812_v11, 1e-15  ;;  %v2284_v61 = vmul.f32 0.5, %v6156_v47 }
 0x3fc   :  { %v2860_v42 = vsel %vm2858_vm8, %v2859_v2, %v2857_v3  ;;  %v6784_v24 = vmax.f32 %v2779_v49, 0.0  ;;  %v2586_v25 = vadd.f32 %v2570_v5, %v2506_v13  ;;  %3338 = vst.msk [vmem:[%s7309_s4 + $0x28] sm:$0xff] %vm1648_vm4, %v3322_v51  ;;  %v2345_v53 = vsel %vm1789_vm3, 0.0, %v6777_v57 }
 0x3fd   :  { %v2932_v15 = vmul.f32 %v4234_v19, %v2860_v42  ;;  %v6795_v29 = vmul.f32 0.5, %v6170_v28  ;;  %4243 = vlog2.f32 %v6162_v1  ;;  %v2638_v30 = vmax.f32 %v2622_v26, 1e-15  ;;  %v7535_v28 = vld [vmem:[#allocation22_spill] sm:$0xff] }
 0x3fe   :  { %4245 = vrsqrt.f32 %v6784_v24  ;;  %v7530_v47 = vsel %vm6103_vm6, %v6054_v39, %v6144_v32  ;;  %v7533_v10 = vsel %vm6029_vm15, %v7531_v62, %v7532_v36  ;;  %v2229_v1 = vsel %vm6755_vm13, %v7535_v28, %v7534_v38  ;;  %v1690_v32 = vpop.xlane.xlu1 %1689 }
 0x3ff   :  { %v6809_v4 = vsub.f32 %v7533_v10, %v7530_v47  ;;  %v6815_v12 = vclamps-f32 %v2932_v15, 0.9999999  ;;  %v2689_v17 = vmul.f32 2.0, %v2586_v25  ;;  %4247 = vrsqrt.f32 %v7536_v14 }
 0x400   :  { %v1912_v39 = vmul.f32 %v7537_v37, %v1852_v22  ;;  %v2609_v43 = vmul.f32 %v6182_v31, %v2506_v13  ;;  %v2657_v50 = vmul.f32 %v2586_v25, %v2586_v25  ;;  %v2766_v16 = vmul.f32 %v6193_v44, %v2506_v13 }
 0x401   :  { %v6822_v6 = vmax.f32 %v2345_v53, 1e-15  ;;  %v3020_v20 = vmul.f32 -0.5, %v6742_v18  ;;  %v3180_v58 = vmul.f32 -0.5, %v6766_v9  ;;  %v3044_v8 = vadd.f32 1.0, %v6815_v12 }
 0x402   :  { %v6828_v52 = vsub.f32 0.0, %v6815_v12  ;;  %v4238_v59 = vpop.eup %4237  ;;  %4249 = vrcp.f32 %v2638_v30  ;;  %v2711_v55 = vmul.f32 %v6184_v46, %v2689_v17  ;;  %v1868_v34 = vmax.f32 %v6286_v54, 1e-30  ;;  %v7554_v54 = vld [vmem:[#allocation44_spill] sm:$0xff] }
 0x403   :  { %v1710_v27 = vsub.f32 %v6775_v21, %v1690_v32  ;;  %4251 = vlog2.f32 %v3044_v8  ;;  %v2300_v48 = vmul.f32 %v2284_v61, %v1912_v39  ;;  %vm1801_vm15 = vcmp.eq.f32.partialorder %v6726_v7, inf }
 0x404   :  { %v3204_v33 = vadd.f32 1.0, %v6828_v52  ;;  %v3023_v19 = vand.u32 2147483647, %v6742_v18  ;;  %v2673_v63 = vmul.f32 %v2657_v50, %v6182_v31  ;;  %v2727_v0 = vmul.f32 %v2711_v55, %v6750_v40 }
 0x405   :  { %4253 = vrcp.f32 %v6822_v6  ;;  %v4240_v13 = vpop.eup %4239  ;;  %v3021_v56 = vadd.f32 1.0, %v3020_v20  ;;  %v3181_v11 = vadd.f32 1.0, %v3180_v58  ;;  %v1800_v23 = vmul.f32 %v4238_v59, %v6726_v7 }
 0x406   :  { %4255 = vlog2.f32 %v3204_v33  ;;  %v3183_v45 = vand.u32 2147483647, %v6766_v9  ;;  %v2743_v2 = vadd.f32 %v2727_v0, %v2673_v63  ;;  %vm1803_vm6 = vcmp.eq.f32.partialorder %v6726_v7, 0.0 }
 0x407   :  { %v1804_v21 = vand.u32 2147483648, %v6726_v7  ;;  %v3019_v3 = vmul.f32 0.6931472, %v4240_v13  ;;  %4257 = vtanh.f32 %v2300_v48  ;;  %v1802_v40 = vsel %vm1801_vm15, %v6726_v7, %v1800_v23 }
 0x408   :  { %v6848_v26 = vmax.f32 %v1710_v27, 0.0  ;;  %v4242_v49 = vpop.eup %4241  ;;  %vm6850_vm11 = vcmp.lt.f32.partialorder %v3023_v19, 0.0004427343  ;;  %v2625_v22 = vadd.f32 %v2609_v43, %v2570_v5  ;;  %v2782_v42 = vadd.f32 %v2766_v16, %v2743_v2  ;;  %v1687_v5 = vpop.xlane.xlu0 %1686 }
 0x409   :  { %v1805_v25 = vsel %vm1803_vm6, %v1804_v21, %v1802_v40  ;;  %v3022_v61 = vmul.f32 %v6742_v18, %v3021_v56  ;;  %v3179_v15 = vmul.f32 0.6931472, %v4242_v49  ;;  %v3182_v53 = vmul.f32 %v3181_v11, %v6766_v9  ;;  %v7540_v18 = vld [vmem:[#allocation38_spill] sm:$0xff] }
 0x40a   :  { %v1851_v30 = vmax.f32 %v1805_v25, 1e-15  ;;  %v6858_v47 = vpop.eup %4243  ;;  %vm3184_vm5 = vcmp.lt.f32.partialorder %v3183_v45, 0.0004427343  ;;  %v3047_v62 = vmul.f32 -0.5, %v6815_v12  ;;  %v3207_v36 = vmul.f32 -0.5, %v6828_v52 }
 0x40b   :  { %v6862_v10 = vmax.f32 %v2782_v42, 0.0  ;;  %v4246_v17 = vpop.eup %4245  ;;  %v3025_v14 = vsel %vm6850_vm11, %v3022_v61, %v3019_v3  ;;  %v3185_v37 = vsel %vm3184_vm5, %v3182_v53, %v3179_v15  ;;  %4259 = vrsqrt.f32 %v6848_v26 }
 0x40c   :  { %v1910_v39 = vmul.f32 %v7540_v18, %v1851_v30  ;;  %v4248_v9 = vpop.eup %4247  ;;  %v3289_v32 = vsub.f32 %v3025_v14, %v3185_v37  ;;  %v2848_v43 = vmul.f32 %v4246_v17, %v6784_v24  ;;  %v2641_v50 = vmax.f32 %v2625_v22, 1e-15  ;;  %v6924_v37 = vpop.xlane.xlu1 %1646  ;;  %v7547_v18 = vld [vmem:[#allocation25_spill] sm:$0xff] }
 0x40d   :  { %4261 = vrsqrt.f32 %v6862_v10  ;;  %vm2849_vm0 = vcmp.eq.f32.partialorder %v6784_v24, inf  ;;  %v2852_v16 = vand.u32 2147483648, %v6784_v24  ;;  %v1709_v58 = vsub.f32 %v6839_v60, %v1687_v5  ;;  %v6930_v38 = vpop.xlane.xlu0 %1644 }
 0x40e   :  { %v2299_v20 = vmul.f32 %v6795_v29, %v1910_v39  ;;  %v3305_v8 = vmul.f32 0.5, %v3289_v32  ;;  %v3050_v59 = vand.u32 2147483647, %v6815_v12  ;;  %v2850_v55 = vsel %vm2849_vm0, %v6784_v24, %v2848_v43 }
 0x40f   :  { %vm2851_vm9 = vcmp.eq.f32.partialorder %v6784_v24, 0.0  ;;  %v4250_v27 = vpop.eup %4249  ;;  %v3048_v33 = vadd.f32 1.0, %v3047_v62  ;;  %v3208_v48 = vadd.f32 1.0, %v3207_v36  ;;  %v3210_v13 = vand.u32 2147483647, %v6828_v52  ;;  %v7544_v62 = vld [vmem:[#allocation34_spill] sm:$0xff] }
 0x410   :  { %v2853_v19 = vsel %vm2851_vm9, %v2852_v16, %v2850_v55  ;;  %4263 = vtanh.f32 %v2299_v20  ;;  %v4252_v63 = vpop.eup %4251  ;;  %v3321_v0 = vmul.f32 2.0, %v3305_v8  ;;  %vm2409_vm14 = vcmp.gt.f32.partialorder %v6822_v6, 0.99999  ;;  %v7545_v36 = vld [vmem:[#allocation27_spill] sm:$0xff] }
 0x411   :  { %v2930_v56 = vmul.f32 %v4250_v27, %v2853_v19  ;;  %4265 = vrcp.f32 %v2641_v50  ;;  %v3046_v60 = vmul.f32 0.6931472, %v4252_v63  ;;  %v1867_v24 = vmax.f32 %v6726_v7, 1e-30  ;;  %v7548_v50 = vld [vmem:[#allocation35_spill] sm:$0xff] }
 0x412   :  { %v4254_v29 = vpop.eup %4253  ;;  %4267 = vrsqrt.f32 %v1868_v34  ;;  %3337 = vst.msk [vmem:[%s7309_s4 + $0x20] sm:$0xff] %vm1648_vm4, %v3321_v0  ;;  %vm6886_vm12 = vcmp.lt.f32.partialorder %v3050_v59, 0.0004427343  ;;  %v2377_v2 = vmul.f32 %v4248_v9, %v6777_v57  ;;  %v3049_v3 = vmul.f32 %v6815_v12, %v3048_v33  ;;  %v7549_v55 = vld [vmem:[#allocation11_spill] sm:$0xff] }
 0x413   :  { %v4256_v11 = vpop.eup %4255  ;;  %v6890_v45 = vclamps-f32 %v2930_v56, 0.9999999  ;;  %v2434_v21 = vmul.f32 0.99999, %v4254_v29  ;;  %v3209_v40 = vmul.f32 %v3208_v48, %v6828_v52  ;;  %v2489_v49 = vmin.f32 %v6822_v6, 0.99999 }
 0x414   :  { %v3206_v34 = vmul.f32 0.6931472, %v4256_v11  ;;  %v6896_v51 = vpop.eup %4257  ;;  %vm3211_vm2 = vcmp.lt.f32.partialorder %v3210_v13, 0.0004427343  ;;  %v6902_v25 = vmax.f32 %v1709_v58, 0.0  ;;  %v3052_v57 = vsel %vm6886_vm12, %v3049_v3, %v3046_v60 }
 0x415   :  { %v3035_v22 = vadd.f32 1.0, %v6890_v45  ;;  %v6900_v42 = vsub.f32 0.0, %v6890_v45  ;;  %v2457_v12 = vsel %vm2409_vm14, %v2434_v21, 1.0  ;;  %v2348_v52 = vsel %vm1810_vm10, 0.0, %v6896_v51 }
 0x416   :  { %v3212_v61 = vsel %vm3211_vm2, %v3209_v40, %v3206_v34  ;;  %v2393_v53 = vsel %vm1789_vm3, 0.0, %v2377_v2  ;;  %v7546_v6 = vsel %vm6041_vm1, %v7544_v62, %v7545_v36  ;;  %v2085_v35 = vand.u32 2147483647, %v7547_v18 }
 0x417   :  { %v3292_v15 = vsub.f32 %v3052_v57, %v3212_v61  ;;  %4269 = vlog2.f32 %v3035_v22  ;;  %v2269_v5 = vsub.f32 %v7546_v6, %v2229_v1  ;;  %v3195_v17 = vadd.f32 1.0, %v6900_v42 }
 0x418   :  { %v2473_v14 = vmul.f32 %v2457_v12, %v2393_v53  ;;  %4271 = vrsqrt.f32 %v1867_v24  ;;  %v4260_v39 = vpop.eup %4259  ;;  %v2505_v41 = vmul.f32 %v2489_v49, %v2489_v49  ;;  %v6927_v32 = vmax.f32 %v2348_v52, 1e-15  ;;  %v1696_v24 = vpop.xlane.xlu1 %1695 }
 0x419   :  { %v3308_v9 = vmul.f32 0.5, %v3292_v15  ;;  %4273 = vrsqrt.f32 %v6902_v25  ;;  %v6933_v43 = vmul.f32 0.5, %v6809_v4  ;;  %v6936_v16 = vmul.f32 -0.5, %v7548_v50 }
 0x41a   :  { %v4262_v28 = vpop.eup %4261  ;;  %4275 = vlog2.f32 %v3195_v17  ;;  %v2521_v1 = vsub.f32 0.0, %v2473_v14  ;;  %v6940_v8 = vmul.f32 0.5, %v2269_v5  ;;  %vm2870_vm1 = vcmp.eq.f32.partialorder %v6862_v10, inf }
 0x41b   :  { %v3324_v20 = vmul.f32 2.0, %v3308_v9  ;;  %v2869_v58 = vmul.f32 %v4262_v28, %v6862_v10  ;;  %4277 = vrcp.f32 %v6927_v32  ;;  %v2873_v59 = vand.u32 2147483648, %v6862_v10 }
 0x41c   :  { %v2537_v27 = vmul.f32 %v2521_v1, %v7549_v55  ;;  %v1821_v33 = vmul.f32 %v4260_v39, %v6848_v26  ;;  %vm2872_vm3 = vcmp.eq.f32.partialorder %v6862_v10, 0.0  ;;  %v6953_v19 = vmul.f32 %v6182_v31, %v2505_v41 }
 0x41d   :  { %v4264_v4 = vpop.eup %4263  ;;  %3340 = vst.msk [vmem:[%s7309_s4 + $0x38] sm:$0xff] %vm1648_vm4, %v3324_v20  ;;  %v2871_v48 = vsel %vm2870_vm1, %v6862_v10, %v2869_v58  ;;  %v6956_v63 = vmul.f32 %v6193_v44, %v2505_v41  ;;  %v3038_v13 = vmul.f32 -0.5, %v6890_v45  ;;  %vm1822_vm13 = vcmp.eq.f32.partialorder %v6848_v26, inf  ;;  %v6965_v10 = vpop.xlane.xlu0 %1692 }
 0x41e   :  { %v4266_v0 = vpop.eup %4265  ;;  %v2874_v56 = vsel %vm2872_vm3, %v2873_v59, %v2871_v48  ;;  %v2553_v29 = vmul.f32 2.0, %v2537_v27  ;;  %v2347_v60 = vsel %vm1803_vm6, 0.0, %v4264_v4  ;;  %vm1824_vm8 = vcmp.eq.f32.partialorder %v6848_v26, 0.0 }
 0x41f   :  { %v4268_v11 = vpop.eup %4267  ;;  %v2936_v23 = vmul.f32 %v4266_v0, %v2874_v56  ;;  %v6961_v2 = vmax.f32 %v2347_v60, 1e-15  ;;  %v3198_v21 = vmul.f32 -0.5, %v6900_v42  ;;  %v1823_v34 = vsel %vm1822_vm13, %v6848_v26, %v1821_v33 }
 0x420   :  { %v2569_v3 = vadd.f32 1.0, %v2553_v29  ;;  %v1825_v40 = vand.u32 2147483648, %v6848_v26  ;;  %v3041_v49 = vand.u32 2147483647, %v6890_v45  ;;  %v1712_v57 = vsub.f32 %v6924_v37, %v1696_v24 }
 0x421   :  { %v6971_v22 = vclamps-f32 %v2936_v23, 0.9999999  ;;  %4279 = vrcp.f32 %v6961_v2  ;;  %v3039_v61 = vadd.f32 1.0, %v3038_v13  ;;  %v2380_v52 = vmul.f32 %v4268_v11, %v6896_v51 }
 0x422   :  { %v2585_v12 = vadd.f32 %v2569_v3, %v2505_v41  ;;  %v1711_v15 = vsub.f32 %v6930_v38, %v6965_v10  ;;  %v3201_v53 = vand.u32 2147483647, %v6900_v42  ;;  %v1826_v36 = vsel %vm1824_vm8, %v1825_v40, %v1823_v34 }
 0x423   :  { %v3062_v30 = vadd.f32 1.0, %v6971_v22  ;;  %v6981_v62 = vsub.f32 0.0, %v6971_v22  ;;  %v3199_v5 = vadd.f32 1.0, %v3198_v21  ;;  %vm1815_vm15 = vcmp.eq.f32.partialorder %v6902_v25, inf }
 0x424   :  { %v4270_v6 = vpop.eup %4269  ;;  %v2688_v17 = vmul.f32 2.0, %v2585_v12  ;;  %vm1817_vm11 = vcmp.eq.f32.partialorder %v6902_v25, 0.0  ;;  %vm6987_vm5 = vcmp.lt.f32.partialorder %v3041_v49, 0.0004427343  ;;  %v2656_v37 = vmul.f32 %v2585_v12, %v2585_v12 }
 0x425   :  { %v4272_v51 = vpop.eup %4271  ;;  %4281 = vlog2.f32 %v3062_v30  ;;  %v1818_v39 = vand.u32 2147483648, %v6902_v25  ;;  %v3037_v41 = vmul.f32 0.6931472, %v4270_v6  ;;  %v3222_v38 = vadd.f32 1.0, %v6981_v62 }
 0x426   :  { %v4274_v9 = vpop.eup %4273  ;;  %v1854_v28 = vmax.f32 %v1826_v36, 1e-15  ;;  %v6993_v1 = vmax.f32 %v1712_v57, 0.0  ;;  %v3040_v58 = vmul.f32 %v6890_v45, %v3039_v61  ;;  %vm6996_vm0 = vcmp.lt.f32.partialorder %v3201_v53, 0.0004427343 }
 0x427   :  { %v4276_v20 = vpop.eup %4275  ;;  %v2710_v55 = vmul.f32 %v6184_v46, %v2688_v17  ;;  %v2396_v33 = vsel %vm1810_vm10, 0.0, %v2380_v52  ;;  %v3200_v13 = vmul.f32 %v3199_v5, %v6900_v42  ;;  %4283 = vlog2.f32 %v3222_v38 }
 0x428   :  { %v4278_v48 = vpop.eup %4277  ;;  %v3197_v0 = vmul.f32 0.6931472, %v4276_v20  ;;  %vm2412_vm9 = vcmp.gt.f32.partialorder %v6927_v32, 0.99999  ;;  %v2672_v56 = vmul.f32 %v2656_v37, %v6182_v31  ;;  %v2379_v60 = vmul.f32 %v4272_v51, %v4264_v4  ;;  %v7555_v51 = vld [vmem:[#allocation12_spill] sm:$0xff]  ;;  %v7556_v37 = vld [vmem:[#allocation43_spill] sm:$0xff] }
 0x429   :  { %v2726_v29 = vmul.f32 %v2710_v55, %v2537_v27  ;;  %v2440_v45 = vmul.f32 0.99999, %v4278_v48  ;;  %v3043_v24 = vsel %vm6987_vm5, %v3040_v58, %v3037_v41  ;;  %v1916_v23 = vmul.f32 %v7554_v54, %v1854_v28  ;;  %v7557_v54 = vld [vmem:[#allocation13_spill] sm:$0xff] }
 0x42a   :  { %v3203_v11 = vsel %vm6996_vm0, %v3200_v13, %v3197_v0  ;;  %v1814_v10 = vmul.f32 %v4274_v9, %v6902_v25  ;;  %4285 = vrsqrt.f32 %v6993_v1  ;;  %v2624_v40 = vadd.f32 %v6953_v19, %v2569_v3 }
 0x42b   :  { %v3291_v21 = vsub.f32 %v3043_v24, %v3203_v11  ;;  %v2742_v42 = vadd.f32 %v2726_v29, %v2672_v56  ;;  %v2460_v34 = vsel %vm2412_vm9, %v2440_v45, 1.0  ;;  %v2302_v4 = vmul.f32 %v6933_v43, %v1916_v23 }
 0x42c   :  { %v2476_v27 = vmul.f32 %v2460_v34, %v2396_v33  ;;  %v1816_v49 = vsel %vm1815_vm15, %v6902_v25, %v1814_v10  ;;  %v3065_v61 = vmul.f32 -0.5, %v6971_v22  ;;  %v3225_v30 = vmul.f32 -0.5, %v6981_v62 }
 0x42d   :  { %v3307_v57 = vmul.f32 0.5, %v3291_v21  ;;  %v2781_v12 = vadd.f32 %v6956_v63, %v2742_v42  ;;  %v1819_v52 = vsel %vm1817_vm11, %v1818_v39, %v1816_v49  ;;  %4287 = vtanh.f32 %v2302_v4  ;;  %v7558_v4 = vld [vmem:[#allocation40_spill] sm:$0xff] }
 0x42e   :  { %v4280_v53 = vpop.eup %4279  ;;  %v2524_v36 = vsub.f32 0.0, %v2476_v27  ;;  %v1853_v19 = vmax.f32 %v1819_v52, 1e-15  ;;  %v7025_v5 = vmax.f32 %v1711_v15, 0.0  ;;  %v2492_v17 = vmin.f32 %v6927_v32, 0.99999 }
 0x42f   :  { %v3323_v3 = vmul.f32 2.0, %v3307_v57  ;;  %v7023_v43 = vmax.f32 %v2781_v12, 0.0  ;;  %v2438_v6 = vmul.f32 0.99999, %v4280_v53  ;;  %v2395_v63 = vsel %vm1803_vm6, 0.0, %v2379_v60  ;;  %v7559_v49 = vld [vmem:[#allocation28_spill] sm:$0xff] }
 0x430   :  { %v2540_v14 = vmul.f32 %v7555_v51, %v2524_v36  ;;  %v1914_v39 = vmul.f32 %v7556_v37, %v1853_v19  ;;  %v3066_v9 = vadd.f32 1.0, %v3065_v61  ;;  %v2640_v41 = vmax.f32 %v2624_v40, 1e-15  ;;  %v7560_v61 = vld [vmem:[#allocation21_spill] sm:$0xff] }
 0x431   :  { %3339 = vst.msk [vmem:[%s7309_s4 + $0x30] sm:$0xff] %vm1648_vm4, %v3323_v3  ;;  %4289 = vrsqrt.f32 %v7023_v43  ;;  %vm2411_vm10 = vcmp.gt.f32.partialorder %v6961_v2, 0.99999  ;;  %v3226_v32 = vadd.f32 1.0, %v3225_v30  ;;  %v3068_v20 = vand.u32 2147483647, %v6971_v22 }
 0x432   :  { %v4282_v15 = vpop.eup %4281  ;;  %v2556_v38 = vmul.f32 2.0, %v2540_v14  ;;  %v2459_v28 = vsel %vm2411_vm10, %v2438_v6, 1.0  ;;  %v2301_v7 = vmul.f32 %v6940_v8, %v1914_v39  ;;  %v3228_v58 = vand.u32 2147483647, %v6981_v62 }
 0x433   :  { %v2475_v59 = vmul.f32 %v2459_v28, %v2395_v63  ;;  %v1870_v55 = vmax.f32 %v6848_v26, 1e-30  ;;  %v3064_v33 = vmul.f32 0.6931472, %v4282_v15  ;;  %v2508_v48 = vmul.f32 %v2492_v17, %v2492_v17 }
 0x434   :  { %v2572_v0 = vadd.f32 1.0, %v2556_v38  ;;  %4291 = vtanh.f32 %v2301_v7  ;;  %v4284_v13 = vpop.eup %4283  ;;  %v3067_v56 = vmul.f32 %v6971_v22, %v3066_v9  ;;  %v1869_v45 = vmax.f32 %v6902_v25, 1e-30 }
 0x435   :  { %4293 = vrcp.f32 %v2640_v41  ;;  %v2523_v29 = vsub.f32 0.0, %v2475_v59  ;;  %v3224_v60 = vmul.f32 0.6931472, %v4284_v13  ;;  %v3227_v8 = vmul.f32 %v3226_v32, %v6981_v62 }
 0x436   :  { %v2588_v24 = vadd.f32 %v2572_v0, %v2508_v48  ;;  %4295 = vrsqrt.f32 %v7025_v5  ;;  %vm3069_vm6 = vcmp.lt.f32.partialorder %v3068_v20, 0.0004427343  ;;  %vm3229_vm14 = vcmp.lt.f32.partialorder %v3228_v58, 0.0004427343 }
 0x437   :  { %v2491_v11 = vmin.f32 %v6961_v2, 0.99999  ;;  %v2539_v23 = vmul.f32 %v2523_v29, %v7557_v54  ;;  %v4286_v10 = vpop.eup %4285  ;;  %v3070_v21 = vsel %vm3069_vm6, %v3067_v56, %v3064_v33  ;;  %v3230_v42 = vsel %vm3229_vm14, %v3227_v8, %v3224_v60 }
 0x438   :  { %v2659_v22 = vmul.f32 %v2588_v24, %v2588_v24  ;;  %v2691_v34 = vmul.f32 2.0, %v2588_v24  ;;  %v3294_v40 = vsub.f32 %v3070_v21, %v3230_v42  ;;  %4297 = vrsqrt.f32 %v1870_v55 }
 0x439   :  { %v2555_v27 = vmul.f32 2.0, %v2539_v23  ;;  %v7050_v62 = vmul.f32 %v7559_v49, %v7558_v4  ;;  %4299 = vrsqrt.f32 %v1869_v45  ;;  %v7054_v12 = vmul.f32 0.6931472, %v7560_v61 }
 0x43a   :  { %v2713_v57 = vmul.f32 %v6184_v46, %v2691_v34  ;;  %v2245_v2 = vand.u32 2147483647, %v7548_v50  ;;  %v7057_v52 = vpop.eup %4287  ;;  %v3310_v53 = vmul.f32 0.5, %v3294_v40  ;;  %v2507_v30 = vmul.f32 %v2491_v11, %v2491_v11 }
 0x43b   :  { %v7059_v36 = vadd.f32 1.0, %v2555_v27  ;;  %v1835_v19 = vmul.f32 %v4286_v10, %v6993_v1  ;;  %v2675_v3 = vmul.f32 %v2659_v22, %v6182_v31  ;;  %v2350_v17 = vsel %vm1824_vm8, 0.0, %v7057_v52 }
 0x43c   :  { %v2729_v6 = vmul.f32 %v2713_v57, %v2540_v14  ;;  %v7561_v51 = vand.u32 2147483647, %v7558_v4  ;;  %vm1836_vm2 = vcmp.eq.f32.partialorder %v6993_v1, inf  ;;  %v3326_v37 = vmul.f32 2.0, %v3310_v53 }
 0x43d   :  { %v2611_v39 = vmul.f32 %v6182_v31, %v2508_v48  ;;  %v2587_v9 = vadd.f32 %v7059_v36, %v2507_v30  ;;  %v7075_v41 = vmax.f32 %v2350_v17, 1e-15  ;;  %vm2863_vm1 = vcmp.eq.f32.partialorder %v7023_v43, inf }
 0x43e   :  { %vm7068_vm12 = vcmp.lt.f32.partialorder %v7561_v51, 0.0004427343  ;;  %v4290_v14 = vpop.eup %4289  ;;  %v2745_v15 = vadd.f32 %v2729_v6, %v2675_v3  ;;  %v2768_v32 = vmul.f32 %v6193_v44, %v2508_v48  ;;  %v1839_v38 = vand.u32 2147483648, %v6993_v1  ;;  %3342 = vst.msk [vmem:[%s7309_s4 + $0x48] sm:$0xff] %vm1648_vm4, %v3326_v37  ;;  %v7570_v3 = vld [vmem:[#allocation19_spill] sm:$0xff] }
 0x43f   :  { %v2862_v28 = vmul.f32 %v4290_v14, %v7023_v43  ;;  %v2658_v7 = vmul.f32 %v2587_v9, %v2587_v9  ;;  %v2690_v20 = vmul.f32 2.0, %v2587_v9  ;;  %v1837_v58 = vsel %vm1836_vm2, %v6993_v1, %v1835_v19  ;;  %v7569_v19 = vld [vmem:[#allocation42_spill] sm:$0xff] }
 0x440   :  { %v2866_v59 = vand.u32 2147483648, %v7023_v43  ;;  %v2627_v55 = vadd.f32 %v2611_v39, %v2572_v0  ;;  %v2784_v33 = vadd.f32 %v2768_v32, %v2745_v15  ;;  %4301 = vrcp.f32 %v7075_v41  ;;  %v7573_v15 = vld [vmem:[#allocation30_spill] sm:$0xff]  ;;  %v7574_v32 = vld [vmem:[#allocation39_spill] sm:$0xff] }
 0x441   :  { %v7088_v48 = vpop.eup %4291  ;;  %v2864_v13 = vsel %vm2863_vm1, %v7023_v43, %v2862_v28  ;;  %vm2865_vm3 = vcmp.eq.f32.partialorder %v7023_v43, 0.0  ;;  %v2712_v56 = vmul.f32 %v6184_v46, %v2690_v20  ;;  %vm1838_vm13 = vcmp.eq.f32.partialorder %v6993_v1, 0.0 }
 0x442   :  { %v4294_v29 = vpop.eup %4293  ;;  %v2867_v45 = vsel %vm2865_vm3, %v2866_v59, %v2864_v13  ;;  %v7094_v60 = vmax.f32 %v2784_v33, 0.0  ;;  %v2349_v0 = vsel %vm1817_vm11, 0.0, %v7088_v48  ;;  %v1840_v8 = vsel %vm1838_vm13, %v1839_v38, %v1837_v58 }
 0x443   :  { %v4296_v24 = vpop.eup %4295  ;;  %v2934_v11 = vmul.f32 %v4294_v29, %v2867_v45  ;;  %v2674_v54 = vmul.f32 %v2658_v7, %v6182_v31  ;;  %v2728_v43 = vmul.f32 %v2712_v56, %v2539_v23  ;;  %v7102_v10 = vmax.f32 %v2349_v0, 1e-15  ;;  %v7575_v45 = vld [vmem:[#allocation45_spill] sm:$0xff] }
 0x444   :  { %v2643_v21 = vmax.f32 %v2627_v55, 1e-15  ;;  %4303 = vrsqrt.f32 %v7094_v60  ;;  %vm7107_vm15 = vcmp.lt.f32.partialorder %v2085_v35, 0.0004427343  ;;  %v2243_v22 = vadd.f32 1.0, %v6936_v16 }
 0x445   :  { %v7112_v34 = vclamps-f32 %v2934_v11, 0.9999999  ;;  %v2744_v40 = vadd.f32 %v2728_v43, %v2674_v54  ;;  %v2256_v23 = vsel %vm7068_vm12, %v7050_v62, %v7054_v12  ;;  %v2241_v27 = vmul.f32 0.6931472, %v6858_v47  ;;  %v4298_v4 = vpop.eup %4297 }
 0x446   :  { %v2767_v49 = vmul.f32 %v6193_v44, %v2507_v30  ;;  %4305 = vrcp.f32 %v7102_v10  ;;  %v1856_v18 = vmax.f32 %v1840_v8, 1e-15  ;;  %v1828_v35 = vmul.f32 %v4296_v24, %v7025_v5  ;;  %v4300_v57 = vpop.eup %4299 }
 0x447   :  { %v3053_v16 = vadd.f32 1.0, %v7112_v34  ;;  %v7124_v61 = vsub.f32 0.0, %v7112_v34  ;;  %v2610_v53 = vmul.f32 %v6182_v31, %v2507_v30  ;;  %vm7127_vm5 = vcmp.lt.f32.partialorder %v2245_v2, 0.0004427343  ;;  %v7572_v30 = vld [vmem:[#allocation47_spill] sm:$0xff] }
 0x448   :  { %4307 = vrcp.f32 %v2643_v21  ;;  %v2783_v47 = vadd.f32 %v2767_v49, %v2744_v40  ;;  %v7571_v6 = vsel %vm6107_vm7, %v7569_v19, %v7570_v3  ;;  %v2244_v51 = vmul.f32 %v2243_v22, %v7548_v50 }
 0x449   :  { %v2272_v17 = vsub.f32 %v7571_v6, %v2256_v23  ;;  %4309 = vlog2.f32 %v3053_v16  ;;  %v3213_v63 = vadd.f32 1.0, %v7124_v61  ;;  %v2626_v37 = vadd.f32 %v2610_v53, %v7059_v36 }
 0x44a   :  { %vm1829_vm0 = vcmp.eq.f32.partialorder %v7025_v5, inf  ;;  %v7140_v2 = vmax.f32 %v2783_v47, 0.0  ;;  %v1920_v39 = vmul.f32 %v7572_v30, %v1856_v18  ;;  %v2247_v9 = vsel %vm7127_vm5, %v2244_v51, %v2241_v27 }
 0x44b   :  { %v1830_v14 = vsel %vm1829_vm0, %v7025_v5, %v1828_v35  ;;  %4311 = vlog2.f32 %v3213_v63  ;;  %v2087_v50 = vsel %vm7107_vm15, %v7574_v32, %v7573_v15  ;;  %v1832_v38 = vand.u32 2147483648, %v7025_v5 }
 0x44c   :  { %4313 = vrsqrt.f32 %v7140_v2  ;;  %v2382_v36 = vmul.f32 %v4298_v4, %v7057_v52  ;;  %v2288_v28 = vmul.f32 0.5, %v2272_v17  ;;  %vm1831_vm7 = vcmp.eq.f32.partialorder %v7025_v5, 0.0 }
 0x44d   :  { %v4302_v7 = vpop.eup %4301  ;;  %v2642_v20 = vmax.f32 %v2626_v37, 1e-15  ;;  %v2271_v58 = vsub.f32 %v2087_v50, %v2247_v9  ;;  %v1833_v59 = vsel %vm1831_vm7, %v1832_v38, %v1830_v14  ;;  %vm2414_vm9 = vcmp.gt.f32.partialorder %v7075_v41, 0.99999 }
 0x44e   :  { %v2444_v55 = vmul.f32 0.99999, %v4302_v7  ;;  %v2304_v33 = vmul.f32 %v2288_v28, %v1920_v39  ;;  %v1855_v13 = vmax.f32 %v1833_v59, 1e-15  ;;  %v3056_v56 = vmul.f32 -0.5, %v7112_v34 }
 0x44f   :  { %v2398_v29 = vsel %vm1824_vm8, 0.0, %v2382_v36  ;;  %v3216_v24 = vmul.f32 -0.5, %v7124_v61  ;;  %4315 = vrcp.f32 %v2642_v20  ;;  %v2287_v54 = vmul.f32 0.5, %v2271_v58 }
 0x450   :  { %v2462_v52 = vsel %vm2414_vm9, %v2444_v55, 1.0  ;;  %v1918_v0 = vmul.f32 %v7575_v45, %v1855_v13  ;;  %v2494_v21 = vmin.f32 %v7075_v41, 0.99999  ;;  %v2381_v42 = vmul.f32 %v4300_v57, %v7088_v48  ;;  %v7576_v41 = vld [vmem:[#allocation14_spill] sm:$0xff] }
 0x451   :  { %v4304_v8 = vpop.eup %4303  ;;  %v2478_v11 = vmul.f32 %v2462_v52, %v2398_v29  ;;  %4317 = vtanh.f32 %v2304_v33  ;;  %vm2884_vm10 = vcmp.eq.f32.partialorder %v7094_v60, inf  ;;  %vm2886_vm8 = vcmp.eq.f32.partialorder %v7094_v60, 0.0 }
 0x452   :  { %v2883_v43 = vmul.f32 %v4304_v8, %v7094_v60  ;;  %v2887_v26 = vand.u32 2147483648, %v7094_v60  ;;  %v3057_v23 = vadd.f32 1.0, %v3056_v56  ;;  %v2303_v49 = vmul.f32 %v2287_v54, %v1918_v0  ;;  %v7577_v8 = vld [vmem:[#allocation15_spill] sm:$0xff] }
 0x453   :  { %v4306_v22 = vpop.eup %4305  ;;  %v2526_v40 = vsub.f32 0.0, %v2478_v11  ;;  %v3217_v35 = vadd.f32 1.0, %v3216_v24  ;;  %vm2413_vm6 = vcmp.gt.f32.partialorder %v7102_v10, 0.99999  ;;  %v3059_v57 = vand.u32 2147483647, %v7112_v34 }
 0x454   :  { %v2885_v27 = vsel %vm2884_vm10, %v7094_v60, %v2883_v43  ;;  %v2442_v4 = vmul.f32 0.99999, %v4306_v22  ;;  %v3219_v62 = vand.u32 2147483647, %v7124_v61  ;;  %v2510_v3 = vmul.f32 %v2494_v21, %v2494_v21 }
 0x455   :  { %v4308_v18 = vpop.eup %4307  ;;  %v2888_v16 = vsel %vm2886_vm8, %v2887_v26, %v2885_v27  ;;  %v2542_v53 = vmul.f32 %v7576_v41, %v2526_v40  ;;  %v3058_v17 = vmul.f32 %v7112_v34, %v3057_v23  ;;  %v2397_v63 = vsel %vm1817_vm11, 0.0, %v2381_v42 }
 0x456   :  { %v4310_v48 = vpop.eup %4309  ;;  %v2940_v47 = vmul.f32 %v4308_v18, %v2888_v16  ;;  %v2461_v12 = vsel %vm2413_vm6, %v2442_v4, 1.0  ;;  %4319 = vtanh.f32 %v2303_v49  ;;  %v3218_v39 = vmul.f32 %v3217_v35, %v7124_v61 }
 0x457   :  { %v3055_v19 = vmul.f32 0.6931472, %v4310_v48  ;;  %v2558_v6 = vmul.f32 2.0, %v2542_v53  ;;  %v2477_v14 = vmul.f32 %v2461_v12, %v2397_v63  ;;  %vm3060_vm14 = vcmp.lt.f32.partialorder %v3059_v57, 0.0004427343 }
 0x458   :  { %v4312_v60 = vpop.eup %4311  ;;  %v7174_v51 = vclamps-f32 %v2940_v47, 0.9999999  ;;  %vm3220_vm12 = vcmp.lt.f32.partialorder %v3219_v62, 0.0004427343  ;;  %vm2877_vm11 = vcmp.eq.f32.partialorder %v7140_v2, inf  ;;  %v2880_v36 = vand.u32 2147483648, %v7140_v2 }
 0x459   :  { %v4314_v37 = vpop.eup %4313  ;;  %v3215_v30 = vmul.f32 0.6931472, %v4312_v60  ;;  %v2574_v9 = vadd.f32 1.0, %v2558_v6  ;;  %v3061_v34 = vsel %vm3060_vm14, %v3058_v17, %v3055_v19  ;;  %vm2879_vm2 = vcmp.eq.f32.partialorder %v7140_v2, 0.0 }
 0x45a   :  { %v3080_v15 = vadd.f32 1.0, %v7174_v51  ;;  %v7181_v32 = vsub.f32 0.0, %v7174_v51  ;;  %v2876_v38 = vmul.f32 %v4314_v37, %v7140_v2  ;;  %v2525_v20 = vsub.f32 0.0, %v2477_v14 }
 0x45b   :  { %v3221_v50 = vsel %vm3220_vm12, %v3218_v39, %v3215_v30  ;;  %v2590_v61 = vadd.f32 %v2574_v9, %v2510_v3  ;;  %v1872_v33 = vmax.f32 %v6993_v1, 1e-30  ;;  %v2493_v11 = vmin.f32 %v7102_v10, 0.99999 }
 0x45c   :  { %v3293_v25 = vsub.f32 %v3061_v34, %v3221_v50  ;;  %4321 = vlog2.f32 %v3080_v15  ;;  %v3240_v28 = vadd.f32 1.0, %v7181_v32  ;;  %v2878_v7 = vsel %vm2877_vm11, %v7140_v2, %v2876_v38  ;;  %v4316_v58 = vpop.eup %4315 }
 0x45d   :  { %v2881_v55 = vsel %vm2879_vm2, %v2880_v36, %v2878_v7  ;;  %v2661_v52 = vmul.f32 %v2590_v61, %v2590_v61  ;;  %v2693_v45 = vmul.f32 2.0, %v2590_v61  ;;  %v2541_v24 = vmul.f32 %v2525_v20, %v7577_v8 }
 0x45e   :  { %v3309_v59 = vmul.f32 0.5, %v3293_v25  ;;  %v7190_v13 = vpop.eup %4317  ;;  %4323 = vlog2.f32 %v3240_v28  ;;  %v2938_v56 = vmul.f32 %v4316_v58, %v2881_v55  ;;  %v3083_v43 = vmul.f32 -0.5, %v7174_v51 }
 0x45f   :  { %v2715_v2 = vmul.f32 %v6184_v46, %v2693_v45  ;;  %4325 = vrsqrt.f32 %v1872_v33  ;;  %v2352_v54 = vsel %vm1838_vm13, 0.0, %v7190_v13  ;;  %v1871_v22 = vmax.f32 %v7025_v5, 1e-30 }
 0x460   :  { %v3325_v29 = vmul.f32 2.0, %v3309_v59  ;;  %v7192_v0 = vclamps-f32 %v2938_v56, 0.9999999  ;;  %v3243_v26 = vmul.f32 -0.5, %v7181_v32  ;;  %v2677_v40 = vmul.f32 %v2661_v52, %v6182_v31 }
 0x461   :  { %v2731_v23 = vmul.f32 %v2715_v2, %v2542_v53  ;;  %v2557_v10 = vmul.f32 2.0, %v2541_v24  ;;  %v2613_v49 = vmul.f32 %v6182_v31, %v2510_v3  ;;  %v7216_v18 = vmax.f32 %v2352_v54, 1e-15 }
 0x462   :  { %3341 = vst.msk [vmem:[%s7309_s4 + $0x40] sm:$0xff] %vm1648_vm4, %v3325_v29  ;;  %v3071_v21 = vadd.f32 1.0, %v7192_v0  ;;  %v7207_v42 = vsub.f32 0.0, %v7192_v0  ;;  %v2770_v16 = vmul.f32 %v6193_v44, %v2510_v3  ;;  %v2509_v41 = vmul.f32 %v2493_v11, %v2493_v11 }
 0x463   :  { %v7212_v27 = vpop.eup %4319  ;;  %v2747_v35 = vadd.f32 %v2731_v23, %v2677_v40  ;;  %v2573_v48 = vadd.f32 1.0, %v2557_v10  ;;  %v3084_v57 = vadd.f32 1.0, %v3083_v43  ;;  %v3086_v62 = vand.u32 2147483647, %v7174_v51 }
 0x464   :  { %4327 = vlog2.f32 %v3071_v21  ;;  %v3231_v4 = vadd.f32 1.0, %v7207_v42  ;;  %v2629_v53 = vadd.f32 %v2613_v49, %v2574_v9  ;;  %v3244_v47 = vadd.f32 1.0, %v3243_v26 }
 0x465   :  { %v2786_v12 = vadd.f32 %v2770_v16, %v2747_v35  ;;  %v2589_v19 = vadd.f32 %v2573_v48, %v2509_v41  ;;  %v2351_v6 = vsel %vm1831_vm7, 0.0, %v7212_v27  ;;  %v3246_v3 = vand.u32 2147483647, %v7181_v32 }
 0x466   :  { %4329 = vlog2.f32 %v3231_v4  ;;  %vm7227_vm1 = vcmp.lt.f32.partialorder %v3086_v62, 0.0004427343  ;;  %v7231_v9 = vmax.f32 %v2351_v6, 1e-15  ;;  %v3085_v15 = vmul.f32 %v7174_v51, %v3084_v57 }
 0x467   :  { %4331 = vrcp.f32 %v7216_v18  ;;  %v7225_v63 = vmax.f32 %v2786_v12, 0.0  ;;  %v2660_v30 = vmul.f32 %v2589_v19, %v2589_v19  ;;  %v2692_v39 = vmul.f32 2.0, %v2589_v19 }
 0x468   :  { %4333 = vrsqrt.f32 %v1871_v22  ;;  %v3245_v34 = vmul.f32 %v3244_v47, %v7181_v32  ;;  %v2645_v50 = vmax.f32 %v2629_v53, 1e-15  ;;  %v3074_v25 = vmul.f32 -0.5, %v7192_v0 }
 0x469   :  { %v4322_v60 = vpop.eup %4321  ;;  %4335 = vrsqrt.f32 %v7225_v63  ;;  %v3234_v36 = vmul.f32 -0.5, %v7207_v42  ;;  %v2714_v61 = vmul.f32 %v6184_v46, %v2692_v39  ;;  %vm3247_vm3 = vcmp.lt.f32.partialorder %v3246_v3, 0.0004427343 }
 0x46a   :  { %v3082_v17 = vmul.f32 0.6931472, %v4322_v60  ;;  %v2676_v51 = vmul.f32 %v2660_v30, %v6182_v31  ;;  %4337 = vrcp.f32 %v7231_v9  ;;  %v2612_v59 = vmul.f32 %v6182_v31, %v2509_v41 }
 0x46b   :  { %v4324_v14 = vpop.eup %4323  ;;  %v2730_v58 = vmul.f32 %v2714_v61, %v2541_v24  ;;  %4339 = vrcp.f32 %v2645_v50  ;;  %v3075_v55 = vadd.f32 1.0, %v3074_v25  ;;  %v3235_v33 = vadd.f32 1.0, %v3234_v36 }
 0x46c   :  { %v3242_v38 = vmul.f32 0.6931472, %v4324_v14  ;;  %v3088_v28 = vsel %vm7227_vm1, %v3085_v15, %v3082_v17  ;;  %v4326_v7 = vpop.eup %4325  ;;  %v2769_v29 = vmul.f32 %v6193_v44, %v2509_v41  ;;  %v3077_v8 = vand.u32 2147483647, %v7192_v0  ;;  %v7580_v14 = vld [vmem:[#allocation16_spill] sm:$0xff] }
 0x46d   :  { %v2746_v56 = vadd.f32 %v2730_v58, %v2676_v51  ;;  %v3237_v2 = vand.u32 2147483647, %v7207_v42  ;;  %v2628_v54 = vadd.f32 %v2612_v59, %v2573_v48  ;;  %v2384_v22 = vmul.f32 %v4326_v7, %v7190_v13 }
 0x46e   :  { %v3248_v20 = vsel %vm3247_vm3, %v3245_v34, %v3242_v38  ;;  %v3076_v26 = vmul.f32 %v7192_v0, %v3075_v55  ;;  %v3236_v23 = vmul.f32 %v3235_v33, %v7207_v42  ;;  %vm3078_vm15 = vcmp.lt.f32.partialorder %v3077_v8, 0.0004427343  ;;  %v7581_v55 = vld [vmem:[#allocation17_spill] sm:$0xff] }
 0x46f   :  { %v3296_v32 = vsub.f32 %v3088_v28, %v3248_v20  ;;  %v2785_v24 = vadd.f32 %v2769_v29, %v2746_v56  ;;  %vm3238_vm5 = vcmp.lt.f32.partialorder %v3237_v2, 0.0004427343  ;;  %v2644_v41 = vmax.f32 %v2628_v54, 1e-15 }
 0x470   :  { %v2400_v42 = vsel %vm1838_vm13, 0.0, %v2384_v22  ;;  %vm2416_vm0 = vcmp.gt.f32.partialorder %v7216_v18, 0.99999  ;;  %vm2898_vm9 = vcmp.eq.f32.partialorder %v7225_v63, inf  ;;  %v2901_v47 = vand.u32 2147483648, %v7225_v63 }
 0x471   :  { %v4328_v52 = vpop.eup %4327  ;;  %v3312_v45 = vmul.f32 0.5, %v3296_v32  ;;  %v2801_v10 = vmax.f32 %v2785_v24, 0.0  ;;  %vm2900_vm13 = vcmp.eq.f32.partialorder %v7225_v63, 0.0  ;;  %vm2415_vm10 = vcmp.gt.f32.partialorder %v7231_v9, 0.99999 }
 0x472   :  { %v3073_v11 = vmul.f32 0.6931472, %v4328_v52  ;;  %v2495_v5 = vmin.f32 %v7231_v9, 0.99999 }
 0x473   :  { %v4330_v43 = vpop.eup %4329  ;;  %v3328_v21 = vmul.f32 2.0, %v3312_v45  ;;  %4341 = vrsqrt.f32 %v2801_v10  ;;  %v2894_v59 = vand.u32 2147483648, %v2801_v10  ;;  %vm2893_vm8 = vcmp.eq.f32.partialorder %v2801_v10, 0.0 }
 0x474   :  { %v3233_v40 = vmul.f32 0.6931472, %v4330_v43  ;;  %v4332_v4 = vpop.eup %4331  ;;  %v3079_v35 = vsel %vm3078_vm15, %v3076_v26, %v3073_v11  ;;  %4343 = vrcp.f32 %v2644_v41  ;;  %v2511_v24 = vmul.f32 %v2495_v5, %v2495_v5 }
 0x475   :  { %3344 = vst.msk [vmem:[%s7309_s4 + $0x58] sm:$0xff] %vm1648_vm4, %v3328_v21  ;;  %v4334_v49 = vpop.eup %4333  ;;  %v2448_v48 = vmul.f32 0.99999, %v4332_v4 }
 0x476   :  { %v3239_v16 = vsel %vm3238_vm5, %v3236_v23, %v3233_v40  ;;  %v4336_v0 = vpop.eup %4335  ;;  %v2383_v19 = vmul.f32 %v4334_v49, %v7212_v27  ;;  %v2496_v27 = vmin.f32 %v7216_v18, 0.99999 }
 0x477   :  { %v3295_v13 = vsub.f32 %v3079_v35, %v3239_v16  ;;  %v2897_v62 = vmul.f32 %v4336_v0, %v7225_v63  ;;  %v2464_v53 = vsel %vm2416_vm0, %v2448_v48, 1.0  ;;  %v4338_v6 = vpop.eup %4337 }
 0x478   :  { %v2480_v12 = vmul.f32 %v2464_v53, %v2400_v42  ;;  %v4340_v1 = vpop.eup %4339  ;;  %v2446_v30 = vmul.f32 0.99999, %v4338_v6  ;;  %v2399_v34 = vsel %vm1831_vm7, 0.0, %v2383_v19  ;;  %v2512_v28 = vmul.f32 %v2496_v27, %v2496_v27 }
 0x479   :  { %v3311_v57 = vmul.f32 0.5, %v3295_v13  ;;  %v2899_v17 = vsel %vm2898_vm9, %v7225_v63, %v2897_v62  ;;  %vm2891_vm7 = vcmp.eq.f32.partialorder %v2801_v10, inf }
 0x47a   :  { %v2902_v3 = vsel %vm2900_vm13, %v2901_v47, %v2899_v17  ;;  %v2528_v37 = vsub.f32 0.0, %v2480_v12  ;;  %v2463_v63 = vsel %vm2415_vm10, %v2446_v30, 1.0  ;;  %v2615_v49 = vmul.f32 %v6182_v31, %v2512_v28 }
 0x47b   :  { %v3327_v60 = vmul.f32 2.0, %v3311_v57  ;;  %v2944_v39 = vmul.f32 %v4340_v1, %v2902_v3  ;;  %v2479_v38 = vmul.f32 %v2463_v63, %v2399_v34  ;;  %v2772_v16 = vmul.f32 %v6193_v44, %v2512_v28 }
 0x47c   :  { %v2544_v15 = vmul.f32 %v7580_v14, %v2528_v37 }
 0x47d   :  { %3343 = vst.msk [vmem:[%s7309_s4 + $0x50] sm:$0xff] %vm1648_vm4, %v3327_v60  ;;  %v7272_v50 = vclamps-f32 %v2944_v39, 0.9999999  ;;  %v2527_v20 = vsub.f32 0.0, %v2479_v38 }
 0x47e   :  { %v2560_v25 = vmul.f32 2.0, %v2544_v15 }
 0x47f   :  { %v3098_v36 = vadd.f32 1.0, %v7272_v50  ;;  %v3138_v61 = vsub.f32 0.0, %v7272_v50  ;;  %v2543_v33 = vmul.f32 %v2527_v20, %v7581_v55  ;;  %v3101_v21 = vmul.f32 -0.5, %v7272_v50 }
 0x480   :  { %v2576_v7 = vadd.f32 1.0, %v2560_v25  ;;  %v4342_v51 = vpop.eup %4341  ;;  %v3104_v47 = vand.u32 2147483647, %v7272_v50 }
 0x481   :  { %4345 = vlog2.f32 %v3098_v36  ;;  %v3258_v18 = vadd.f32 1.0, %v3138_v61  ;;  %v2890_v58 = vmul.f32 %v4342_v51, %v2801_v10  ;;  %v4344_v29 = vpop.eup %4343  ;;  %v2559_v2 = vmul.f32 2.0, %v2543_v33 }
 0x482   :  { %v2592_v32 = vadd.f32 %v2576_v7, %v2512_v28  ;;  %v3261_v22 = vmul.f32 -0.5, %v3138_v61  ;;  %v3102_v13 = vadd.f32 1.0, %v3101_v21  ;;  %v2631_v57 = vadd.f32 %v2615_v49, %v2576_v7 }
 0x483   :  { %4347 = vlog2.f32 %v3258_v18  ;;  %v2892_v56 = vsel %vm2891_vm7, %v2801_v10, %v2890_v58  ;;  %v2575_v43 = vadd.f32 1.0, %v2559_v2  ;;  %v3264_v12 = vand.u32 2147483647, %v3138_v61 }
 0x484   :  { %v2895_v52 = vsel %vm2893_vm8, %v2894_v59, %v2892_v56  ;;  %v2663_v45 = vmul.f32 %v2592_v32, %v2592_v32  ;;  %v2695_v8 = vmul.f32 2.0, %v2592_v32  ;;  %v3262_v42 = vadd.f32 1.0, %v3261_v22 }
 0x485   :  { %v2942_v11 = vmul.f32 %v4344_v29, %v2895_v52  ;;  %v2591_v23 = vadd.f32 %v2575_v43, %v2511_v24  ;;  %v3103_v1 = vmul.f32 %v7272_v50, %v3102_v13  ;;  %v2647_v27 = vmax.f32 %v2631_v57, 1e-15 }
 0x486   :  { %v2717_v54 = vmul.f32 %v6184_v46, %v2695_v8  ;;  %v2679_v26 = vmul.f32 %v2663_v45, %v6182_v31  ;;  %v3263_v39 = vmul.f32 %v3262_v42, %v3138_v61  ;;  %vm3105_vm6 = vcmp.lt.f32.partialorder %v3104_v47, 0.0004427343 }
 0x487   :  { %v3493_v9 = vclamps-f32 %v2942_v11, 0.9999999  ;;  %v2694_v41 = vmul.f32 2.0, %v2591_v23  ;;  %v2662_v0 = vmul.f32 %v2591_v23, %v2591_v23  ;;  %vm3265_vm14 = vcmp.lt.f32.partialorder %v3264_v12, 0.0004427343 }
 0x488   :  { %v2733_v40 = vmul.f32 %v2717_v54, %v2544_v15  ;;  %v2771_v15 = vmul.f32 %v6193_v44, %v2511_v24 }
 0x489   :  { %v3089_v4 = vadd.f32 1.0, %v3493_v9  ;;  %v3137_v10 = vsub.f32 0.0, %v3493_v9  ;;  %v2716_v19 = vmul.f32 %v6184_v46, %v2694_v41  ;;  %v2678_v3 = vmul.f32 %v2662_v0, %v6182_v31 }
 0x48a   :  { %v2749_v35 = vadd.f32 %v2733_v40, %v2679_v26  ;;  %v2614_v46 = vmul.f32 %v6182_v31, %v2511_v24  ;;  %v3092_v25 = vmul.f32 -0.5, %v3493_v9  ;;  %v3095_v32 = vand.u32 2147483647, %v3493_v9 }
 0x48b   :  { %4349 = vlog2.f32 %v3089_v4  ;;  %v3249_v48 = vadd.f32 1.0, %v3137_v10  ;;  %v2732_v37 = vmul.f32 %v2716_v19, %v2543_v33  ;;  %v3252_v36 = vmul.f32 -0.5, %v3137_v10 }
 0x48c   :  { %v2788_v62 = vadd.f32 %v2772_v16, %v2749_v35  ;;  %v2630_v28 = vadd.f32 %v2614_v46, %v2575_v43  ;;  %v3093_v51 = vadd.f32 1.0, %v3092_v25  ;;  %v3255_v5 = vand.u32 2147483647, %v3137_v10 }
 0x48d   :  { %4351 = vlog2.f32 %v3249_v48  ;;  %v2748_v14 = vadd.f32 %v2732_v37, %v2678_v3  ;;  %v3253_v18 = vadd.f32 1.0, %v3252_v36  ;;  %vm3096_vm12 = vcmp.lt.f32.partialorder %v3095_v32, 0.0004427343 }
 0x48e   :  { %v4346_v53 = vpop.eup %4345  ;;  %v2804_v60 = vmax.f32 %v2788_v62, 0.0  ;;  %v2646_v44 = vmax.f32 %v2630_v28, 1e-15  ;;  %v3094_v55 = vmul.f32 %v3493_v9, %v3093_v51  ;;  %vm3256_vm11 = vcmp.lt.f32.partialorder %v3255_v5, 0.0004427343 }
 0x48f   :  { %v3100_v6 = vmul.f32 0.6931472, %v4346_v53  ;;  %v2787_v50 = vadd.f32 %v2771_v15, %v2748_v14  ;;  %v3254_v56 = vmul.f32 %v3253_v18, %v3137_v10 }
 0x490   :  { %v4348_v17 = vpop.eup %4347  ;;  %4353 = vrsqrt.f32 %v2804_v60  ;;  %vm2912_vm2 = vcmp.eq.f32.partialorder %v2804_v60, inf  ;;  %v2915_v11 = vand.u32 2147483648, %v2804_v60  ;;  %vm2914_vm1 = vcmp.eq.f32.partialorder %v2804_v60, 0.0 }
 0x491   :  { %v3260_v30 = vmul.f32 0.6931472, %v4348_v17  ;;  %v3106_v34 = vsel %vm3105_vm6, %v3103_v1, %v3100_v6  ;;  %4355 = vrcp.f32 %v2647_v27  ;;  %v2803_v20 = vmax.f32 %v2787_v50, 0.0 }
 0x493   :  { %v3266_v63 = vsel %vm3265_vm14, %v3263_v39, %v3260_v30  ;;  %4357 = vrsqrt.f32 %v2803_v20  ;;  %vm2905_vm3 = vcmp.eq.f32.partialorder %v2803_v20, inf  ;;  %v2908_v35 = vand.u32 2147483648, %v2803_v20 }
 0x494   :  { %v3298_v38 = vsub.f32 %v3106_v34, %v3266_v63  ;;  %4359 = vrcp.f32 %v2646_v44  ;;  %vm2907_vm15 = vcmp.eq.f32.partialorder %v2803_v20, 0.0 }
 0x496   :  { %v3314_v7 = vmul.f32 0.5, %v3298_v38 }
 0x498   :  { %v3330_v61 = vmul.f32 2.0, %v3314_v7  ;;  %v4350_v58 = vpop.eup %4349 }
 0x499   :  { %v3091_v31 = vmul.f32 0.6931472, %v4350_v58 }
 0x49a   :  { %3346 = vst.msk [vmem:[%s7309_s4 + $0x68] sm:$0xff] %vm1648_vm4, %v3330_v61  ;;  %v4352_v59 = vpop.eup %4351 }
 0x49b   :  { %v3251_v33 = vmul.f32 0.6931472, %v4352_v59  ;;  %v3097_v52 = vsel %vm3096_vm12, %v3094_v55, %v3091_v31 }
 0x49d   :  { %v4354_v29 = vpop.eup %4353  ;;  %v3257_v45 = vsel %vm3256_vm11, %v3254_v56, %v3251_v33 }
 0x49e   :  { %v3297_v8 = vsub.f32 %v3097_v52, %v3257_v45  ;;  %v2911_v2 = vmul.f32 %v4354_v29, %v2804_v60  ;;  %v4356_v43 = vpop.eup %4355 }
 0x4a0   :  { %v3313_v54 = vmul.f32 0.5, %v3297_v8  ;;  %v2913_v24 = vsel %vm2912_vm2, %v2804_v60, %v2911_v2  ;;  %v4358_v9 = vpop.eup %4357 }
 0x4a1   :  { %v2916_v21 = vsel %vm2914_vm1, %v2915_v11, %v2913_v24  ;;  %v2904_v23 = vmul.f32 %v4358_v9, %v2803_v20  ;;  %v4360_v41 = vpop.eup %4359 }
 0x4a2   :  { %v3329_v22 = vmul.f32 2.0, %v3313_v54  ;;  %v2948_v26 = vmul.f32 %v4356_v43, %v2916_v21 }
 0x4a3   :  { %v2906_v49 = vsel %vm2905_vm3, %v2803_v20, %v2904_v23 }
 0x4a4   :  { %3345 = vst.msk [vmem:[%s7309_s4 + $0x60] sm:$0xff] %vm1648_vm4, %v3329_v22  ;;  %v3496_v40 = vclamps-f32 %v2948_v26, 0.9999999  ;;  %v2909_v13 = vsel %vm2907_vm15, %v2908_v35, %v2906_v49 }
 0x4a5   :  { %v2946_v48 = vmul.f32 %v4360_v41, %v2909_v13 }
 0x4a6   :  { %v3116_v4 = vadd.f32 1.0, %v3496_v40  ;;  %v3140_v10 = vsub.f32 0.0, %v3496_v40  ;;  %v3119_v62 = vmul.f32 -0.5, %v3496_v40  ;;  %v3122_v60 = vand.u32 2147483647, %v3496_v40 }
 0x4a7   :  { %v3495_v0 = vclamps-f32 %v2946_v48, 0.9999999 }
 0x4a8   :  { %4361 = vlog2.f32 %v3116_v4  ;;  %v3276_v16 = vadd.f32 1.0, %v3140_v10  ;;  %v3279_v53 = vmul.f32 -0.5, %v3140_v10  ;;  %v3120_v12 = vadd.f32 1.0, %v3119_v62 }
 0x4a9   :  { %v3107_v42 = vadd.f32 1.0, %v3495_v0  ;;  %v3139_v57 = vsub.f32 0.0, %v3495_v0  ;;  %v3282_v17 = vand.u32 2147483647, %v3140_v10  ;;  %v3110_v27 = vmul.f32 -0.5, %v3495_v0 }
 0x4aa   :  { %4363 = vlog2.f32 %v3276_v16  ;;  %v3280_v19 = vadd.f32 1.0, %v3279_v53  ;;  %v3121_v37 = vmul.f32 %v3496_v40, %v3120_v12  ;;  %vm3123_vm5 = vcmp.lt.f32.partialorder %v3122_v60, 0.0004427343 }
 0x4ab   :  { %4365 = vlog2.f32 %v3107_v42  ;;  %v3267_v47 = vadd.f32 1.0, %v3139_v57  ;;  %v3270_v14 = vmul.f32 -0.5, %v3139_v57  ;;  %vm3283_vm0 = vcmp.lt.f32.partialorder %v3282_v17, 0.0004427343 }
 0x4ac   :  { %v3281_v39 = vmul.f32 %v3280_v19, %v3140_v10  ;;  %v3111_v46 = vadd.f32 1.0, %v3110_v27  ;;  %v3113_v50 = vand.u32 2147483647, %v3495_v0  ;;  %v3273_v28 = vand.u32 2147483647, %v3139_v57 }
 0x4ad   :  { %4367 = vlog2.f32 %v3267_v47  ;;  %v3271_v38 = vadd.f32 1.0, %v3270_v14 }
 0x4ae   :  { %v3112_v51 = vmul.f32 %v3495_v0, %v3111_v46  ;;  %vm3114_vm9 = vcmp.lt.f32.partialorder %v3113_v50, 0.0004427343  ;;  %vm3274_vm13 = vcmp.lt.f32.partialorder %v3273_v28, 0.0004427343 }
 0x4af   :  { %v3272_v58 = vmul.f32 %v3271_v38, %v3139_v57 }
 0x4b5   :  { %v4362_v6 = vpop.eup %4361 }
 0x4b6   :  { %v3118_v1 = vmul.f32 0.6931472, %v4362_v6 }
 0x4b7   :  { %v4364_v3 = vpop.eup %4363 }
 0x4b8   :  { %v3278_v30 = vmul.f32 0.6931472, %v4364_v3  ;;  %v3124_v15 = vsel %vm3123_vm5, %v3121_v37, %v3118_v1  ;;  %v4366_v25 = vpop.eup %4365 }
 0x4b9   :  { %v3109_v7 = vmul.f32 0.6931472, %v4366_v25 }
 0x4ba   :  { %v3284_v34 = vsel %vm3283_vm0, %v3281_v39, %v3278_v30  ;;  %v4368_v20 = vpop.eup %4367 }
 0x4bb   :  { %v3300_v63 = vsub.f32 %v3124_v15, %v3284_v34  ;;  %v3269_v18 = vmul.f32 0.6931472, %v4368_v20  ;;  %v3115_v32 = vsel %vm3114_vm9, %v3112_v51, %v3109_v7 }
 0x4bd   :  { %v3316_v36 = vmul.f32 0.5, %v3300_v63  ;;  %v3275_v5 = vsel %vm3274_vm13, %v3272_v58, %v3269_v18 }
 0x4be   :  { %v3299_v44 = vsub.f32 %v3115_v32, %v3275_v5 }
 0x4bf   :  { %v3332_v61 = vmul.f32 2.0, %v3316_v36 }
 0x4c0   :  { %v3315_v31 = vmul.f32 0.5, %v3299_v44 }
 0x4c1   :  { %3348 = vst.msk [vmem:[%s7309_s4 + $0x78] sm:$0xff] %vm1648_vm4, %v3332_v61 }
 0x4c2   :  { %v3331_v59 = vmul.f32 2.0, %v3315_v31 }
 0x4c4   :  { %3347 = vst.msk [vmem:[%s7309_s4 + $0x70] sm:$0xff] %vm1648_vm4, %v3331_v59 }

</bundles_post_ra>
